<compile_context>
chip_gen: v7x
topology: tpu7x:2x2x1
jax: 0.10.0
libtpu: 0.0.40
codegen_flags: <defaults>
</compile_context>

<pallas_src>
import jax
import jax.numpy as jnp
from jax.experimental import pallas as pl
from jax.experimental.pallas import tpu as pltpu


# ----------------------------------------------------------------------------
# Pallas kernel: one (n, d) output plane of a 3x3x3 'SAME' conv as a single
# folded MXU matmul, plus per-step BatchNorm partial statistics.
# ----------------------------------------------------------------------------
def _conv3d_kernel(x0_ref, x1_ref, x2_ref, w_ref, y_ref, st_ref):
    # x{0,1,2}_ref : (H+2, W+2, Cin) bf16 -- padded depth slices d, d+1, d+2 (kd taps)
    # w_ref        : (27*Cin, Cout)  bf16 -- folded weights, k = kd*9 + kh*3 + kw
    # y_ref        : (H*W, Cout)     f32  -- pre-BatchNorm conv output plane
    # st_ref       : (2, Cout)       f32  -- per-step [sum, sum-of-squares]
    hp2, wp2, c = x0_ref.shape
    h, w = hp2 - 2, wp2 - 2

    # In-kernel im2col: 27 shifted windows folded along the channel (lane) axis.
    # Data movement is done in f32 (robust relayouts); the MXU operands are bf16.
    pieces = []
    for x_ref in (x0_ref, x1_ref, x2_ref):          # kd = 0, 1, 2
        t = x_ref[...].astype(jnp.float32)           # (H+2, W+2, Cin)
        for kh in range(3):
            for kw in range(3):
                pieces.append(t[kh:kh + h, kw:kw + w, :])
    a = jnp.concatenate(pieces, axis=-1)             # (H, W, 27*Cin)
    a = a.reshape(h * w, 27 * c).astype(jnp.bfloat16)

    # Single folded matmul, K = 27*Cin, f32 accumulation.
    acc = jnp.dot(a, w_ref[...], preferred_element_type=jnp.float32)  # (H*W, Cout)

    y_ref[...] = acc
    st_ref[0:1, :] = jnp.sum(acc, axis=0, keepdims=True)
    st_ref[1:2, :] = jnp.sum(acc * acc, axis=0, keepdims=True)


def _conv3d_pass(x_pad, w_folded):
    """3x3x3 'SAME' convolution (no bias) + partial BN statistics.

    x_pad    : (N, D+2, H+2, W+2, Cin) bf16, zero halo of width 1.
    w_folded : (27*Cin, Cout) bf16.
    Returns  y  (N, D, H*W, Cout) f32  pre-BN conv output,
             st (N, D, 2, Cout)   f32  per-(n, d) [sum, sumsq] partials.
    """
    n, dp2, hp2, wp2, c = x_pad.shape
    d, h, w = dp2 - 2, hp2 - 2, wp2 - 2
    cout = w_folded.shape[-1]

    def in_spec(kd):
        # Same padded array, three overlapping depth-slice views (the kd taps):
        # the im2col "depth" reads happen via BlockSpec, never materialized in HBM.
        return pl.BlockSpec((None, None, hp2, wp2, c),
                            lambda ni, di: (ni, di + kd, 0, 0, 0))

    return pl.pallas_call(
        _conv3d_kernel,
        grid=(n, d),
        in_specs=[
            in_spec(0), in_spec(1), in_spec(2),
            pl.BlockSpec((27 * c, cout), lambda ni, di: (0, 0)),   # weights, resident
        ],
        out_specs=(
            pl.BlockSpec((None, None, h * w, cout), lambda ni, di: (ni, di, 0, 0)),
            pl.BlockSpec((None, None, 2, cout), lambda ni, di: (ni, di, 0, 0)),
        ),
        out_shape=(
            jax.ShapeDtypeStruct((n, d, h * w, cout), jnp.float32),
            jax.ShapeDtypeStruct((n, d, 2, cout), jnp.float32),
        ),
        compiler_params=pltpu.CompilerParams(
            dimension_semantics=("parallel", "parallel")),
    )(x_pad, x_pad, x_pad, w_folded)


# ----------------------------------------------------------------------------
# BatchNorm finalize (two-pass, training-mode batch statistics, eps = 1e-5)
# ----------------------------------------------------------------------------
def _bn_scale_shift(stats, gamma, beta, count, eps=1e-5):
    s = jnp.sum(stats[:, :, 0, :], axis=(0, 1))
    ss = jnp.sum(stats[:, :, 1, :], axis=(0, 1))
    mean = s / count
    var = jnp.maximum(ss / count - mean * mean, 0.0)
    scale = gamma * jax.lax.rsqrt(var + eps)
    shift = beta - mean * scale
    return scale, shift


# ----------------------------------------------------------------------------
# Plain-JAX glue: trilinear upsample (align_corners=True), pad, concat
# ----------------------------------------------------------------------------
def _upsample_axis_align_corners(x, axis, out_size):
    in_size = x.shape[axis]
    if out_size == in_size:
        return x
    if in_size == 1:
        return jnp.repeat(x, out_size, axis=axis)
    src = jnp.arange(out_size, dtype=jnp.float32) * ((in_size - 1) / (out_size - 1))
    i0 = jnp.clip(jnp.floor(src).astype(jnp.int32), 0, in_size - 2)
    i1 = i0 + 1
    t = src - i0.astype(jnp.float32)
    x0 = jnp.take(x, i0, axis=axis)
    x1 = jnp.take(x, i1, axis=axis)
    tshape = [1] * x.ndim
    tshape[axis] = out_size
    t = t.reshape(tshape)
    return x0 * (1.0 - t) + x1 * t


# ----------------------------------------------------------------------------
# Up3D forward
# ----------------------------------------------------------------------------
@jax.jit
def up3d_forward(x1, x2, params):
    """x1: (N, Cin, D1, H1, W1), x2: (N, Cout, D2, H2, W2)  [NCDHW, like PyTorch]."""
    # NCDHW -> NDHWC (channels -> lanes)
    x1 = jnp.transpose(x1, (0, 2, 3, 4, 1)).astype(jnp.float32)
    x2 = jnp.transpose(x2, (0, 2, 3, 4, 1)).astype(jnp.float32)

    # nn.Upsample(scale_factor=(2,2,2), mode='trilinear', align_corners=True)
    for axis in (1, 2, 3):
        x1 = _upsample_axis_align_corners(x1, axis, 2 * x1.shape[axis])

    # F.pad so x1 matches x2's spatial extent
    dz = x2.shape[1] - x1.shape[1]
    dy = x2.shape[2] - x1.shape[2]
    dx = x2.shape[3] - x1.shape[3]
    x1 = jnp.pad(
        x1,
        ((0, 0),
         (dz // 2, dz - dz // 2),
         (dy // 2, dy - dy // 2),
         (dx // 2, dx - dx // 2),
         (0, 0)),
    )

    # torch.cat([x2, x1], dim=1)  (channel axis is last in NDHWC)
    x = jnp.concatenate([x2, x1], axis=-1)
    n, d, h, w, c1 = x.shape
    count = n * d * h * w
    halo = ((0, 0), (1, 1), (1, 1), (1, 1), (0, 0))

    # --- conv1 + BN1 + ReLU ----------------------------------------------
    xp = jnp.pad(x, halo).astype(jnp.bfloat16)                 # bf16 in HBM
    w1 = params["w1"].reshape(27 * c1, -1).astype(jnp.bfloat16)
    y1, st1 = _conv3d_pass(xp, w1)                             # Pallas
    sc1, sh1 = _bn_scale_shift(st1, params["g1"], params["bt1"], count)
    # conv bias is omitted: it is removed exactly by the BN mean subtraction.
    h1 = jnp.maximum(y1 * sc1 + sh1, 0.0).reshape(n, d, h, w, -1)

    # --- conv2 + BN2 + ReLU ----------------------------------------------
    c2 = h1.shape[-1]
    h1p = jnp.pad(h1, halo).astype(jnp.bfloat16)               # fused affine+ReLU+pad
    w2 = params["w2"].reshape(27 * c2, -1).astype(jnp.bfloat16)
    y2, st2 = _conv3d_pass(h1p, w2)                            # Pallas
    sc2, sh2 = _bn_scale_shift(st2, params["g2"], params["bt2"], count)
    out = jnp.maximum(y2 * sc2 + sh2, 0.0).reshape(n, d, h, w, -1)

    # NDHWC -> NCDHW
    return jnp.transpose(out, (0, 4, 1, 2, 3))


# ----------------------------------------------------------------------------
# Pure-JAX reference (same bf16 operand quantization, f32 accumulation/BN)
# ----------------------------------------------------------------------------
def _ref_conv_bn_relu(x, w27, b, gamma, beta):
    cin, cout = w27.shape[1], w27.shape[2]
    w_dhwio = w27.reshape(3, 3, 3, cin, cout).astype(jnp.bfloat16)
    y = jax.lax.conv_general_dilated(
        x.astype(jnp.bfloat16), w_dhwio,
        window_strides=(1, 1, 1), padding="SAME",
        dimension_numbers=("NDHWC", "DHWIO", "NDHWC"),
        preferred_element_type=jnp.float32,
    ) + b
    mean = jnp.mean(y, axis=(0, 1, 2, 3), keepdims=True)
    var = jnp.mean(jnp.square(y - mean), axis=(0, 1, 2, 3), keepdims=True)
    y = (y - mean) * jax.lax.rsqrt(var + 1e-5) * gamma + beta
    return jnp.maximum(y, 0.0)


def up3d_reference(x1, x2, params):
    x1 = jnp.transpose(x1, (0, 2, 3, 4, 1)).astype(jnp.float32)
    x2 = jnp.transpose(x2, (0, 2, 3, 4, 1)).astype(jnp.float32)
    for axis in (1, 2, 3):
        x1 = _upsample_axis_align_corners(x1, axis, 2 * x1.shape[axis])
    x = jnp.concatenate([x2, x1], axis=-1)
    h1 = _ref_conv_bn_relu(x, params["w1"], params["b1"], params["g1"], params["bt1"])
    h2 = _ref_conv_bn_relu(h1, params["w2"], params["b2"], params["g2"], params["bt2"])
    return jnp.transpose(h2, (0, 4, 1, 2, 3))


# ----------------------------------------------------------------------------
# Deterministic parameter init (shapes follow Up3D(in_ch=8, out_ch=4))
# ----------------------------------------------------------------------------
def init_params(key, in_channels, out_channels):
    c1_in = in_channels + out_channels   # concat(x2, upsample(x1))
    c1_out = out_channels
    keys = jax.random.split(key, 8)
    return {
        "w1": 0.1 * jax.random.normal(keys[0], (27, c1_in, c1_out), jnp.float32),
        "b1": 0.1 * jax.random.normal(keys[1], (c1_out,), jnp.float32),
        "g1": 1.0 + 0.1 * jax.random.normal(keys[2], (c1_out,), jnp.float32),
        "bt1": 0.1 * jax.random.normal(keys[3], (c1_out,), jnp.float32),
        "w2": 0.1 * jax.random.normal(keys[4], (27, c1_out, c1_out), jnp.float32),
        "b2": 0.1 * jax.random.normal(keys[5], (c1_out,), jnp.float32),
        "g2": 1.0 + 0.1 * jax.random.normal(keys[6], (c1_out,), jnp.float32),
        "bt2": 0.1 * jax.random.normal(keys[7], (c1_out,), jnp.float32),
    }


if __name__ == "__main__":
    key = jax.random.PRNGKey(0)
    k1, k2, kp = jax.random.split(key, 3)

    in_channels, out_channels = 8, 4
    # x1: decoder feature (NCDHW), x2: skip connection at 2x spatial resolution.
    x1 = jax.random.normal(k1, (2, in_channels, 4, 4, 4), jnp.float32)
    x2 = jax.random.normal(k2, (2, out_channels, 8, 8, 8), jnp.float32)
    params = init_params(kp, in_channels, out_channels)

    out = jax.block_until_ready(up3d_forward(x1, x2, params))
    assert out.shape == (2, out_channels, 8, 8, 8), out.shape

    ref = jax.block_until_ready(up3d_reference(x1, x2, params))
    max_err = float(jnp.max(jnp.abs(out - ref)))
    assert jnp.allclose(out, ref, atol=5e-3, rtol=5e-3), max_err

    print("KERNEL_OK")
</pallas_src>

<mosaic_0001>
module attributes {stable_mosaic.version = 11 : i64} {
  func.func @_conv3d_kernel(%arg0: i32, %arg1: i32, %arg2: memref<1x1x10x10x12xbf16, #tpu.memory_space<vmem>>, %arg3: memref<1x1x10x10x12xbf16, #tpu.memory_space<vmem>>, %arg4: memref<1x1x10x10x12xbf16, #tpu.memory_space<vmem>>, %arg5: memref<324x4xbf16, #tpu.memory_space<vmem>>, %arg6: memref<1x1x64x4xf32, #tpu.memory_space<vmem>>, %arg7: memref<1x1x2x4xf32, #tpu.memory_space<vmem>>) attributes {dimension_semantics = [#tpu.dimension_semantics<parallel>, #tpu.dimension_semantics<parallel>], iteration_bounds = array<i64: 2, 8>, scalar_prefetch = 0 : i64, scratch_operands = 0 : i64, tpu.core_type = #tpu.core_type<tc>, window_params = [{transform_indices = @transform_0, window_bounds = array<i64: 1, 1, 10, 10, 12>}, {transform_indices = @transform_1, window_bounds = array<i64: 1, 1, 10, 10, 12>}, {transform_indices = @transform_2, window_bounds = array<i64: 1, 1, 10, 10, 12>}, {pipeline_mode = #tpu.pipeline_mode<synchronous>, transform_indices = @transform_3, window_bounds = array<i64: 324, 4>}, {transform_indices = @transform_4, window_bounds = array<i64: 1, 1, 64, 4>}, {transform_indices = @transform_5, window_bounds = array<i64: 1, 1, 2, 4>}]} {
    %c0 = arith.constant 0 : index
    %c0_0 = arith.constant 0 : index
    %c0_1 = arith.constant 0 : index
    %c0_2 = arith.constant 0 : index
    %c0_3 = arith.constant 0 : index
    %0 = vector.load %arg2[%c0, %c0_0, %c0_1, %c0_2, %c0_3] : memref<1x1x10x10x12xbf16, #tpu.memory_space<vmem>>, vector<1x1x10x10x12xbf16>
    %1 = vector.shape_cast %0 : vector<1x1x10x10x12xbf16> to vector<10x10x12xbf16>
    %2 = arith.extf %1 : vector<10x10x12xbf16> to vector<10x10x12xf32>
    %3 = vector.extract_strided_slice %2 {offsets = [0, 0, 0], sizes = [8, 8, 12], strides = [1, 1, 1]} : vector<10x10x12xf32> to vector<8x8x12xf32>
    %4 = vector.extract_strided_slice %2 {offsets = [0, 1, 0], sizes = [8, 8, 12], strides = [1, 1, 1]} : vector<10x10x12xf32> to vector<8x8x12xf32>
    %5 = vector.extract_strided_slice %2 {offsets = [0, 2, 0], sizes = [8, 8, 12], strides = [1, 1, 1]} : vector<10x10x12xf32> to vector<8x8x12xf32>
    %6 = vector.extract_strided_slice %2 {offsets = [1, 0, 0], sizes = [8, 8, 12], strides = [1, 1, 1]} : vector<10x10x12xf32> to vector<8x8x12xf32>
    %7 = vector.extract_strided_slice %2 {offsets = [1, 1, 0], sizes = [8, 8, 12], strides = [1, 1, 1]} : vector<10x10x12xf32> to vector<8x8x12xf32>
    %8 = vector.extract_strided_slice %2 {offsets = [1, 2, 0], sizes = [8, 8, 12], strides = [1, 1, 1]} : vector<10x10x12xf32> to vector<8x8x12xf32>
    %9 = vector.extract_strided_slice %2 {offsets = [2, 0, 0], sizes = [8, 8, 12], strides = [1, 1, 1]} : vector<10x10x12xf32> to vector<8x8x12xf32>
    %10 = vector.extract_strided_slice %2 {offsets = [2, 1, 0], sizes = [8, 8, 12], strides = [1, 1, 1]} : vector<10x10x12xf32> to vector<8x8x12xf32>
    %11 = vector.extract_strided_slice %2 {offsets = [2, 2, 0], sizes = [8, 8, 12], strides = [1, 1, 1]} : vector<10x10x12xf32> to vector<8x8x12xf32>
    %c0_4 = arith.constant 0 : index
    %c0_5 = arith.constant 0 : index
    %c0_6 = arith.constant 0 : index
    %c0_7 = arith.constant 0 : index
    %c0_8 = arith.constant 0 : index
    %12 = vector.load %arg3[%c0_4, %c0_5, %c0_6, %c0_7, %c0_8] : memref<1x1x10x10x12xbf16, #tpu.memory_space<vmem>>, vector<1x1x10x10x12xbf16>
    %13 = vector.shape_cast %12 : vector<1x1x10x10x12xbf16> to vector<10x10x12xbf16>
    %14 = arith.extf %13 : vector<10x10x12xbf16> to vector<10x10x12xf32>
    %15 = vector.extract_strided_slice %14 {offsets = [0, 0, 0], sizes = [8, 8, 12], strides = [1, 1, 1]} : vector<10x10x12xf32> to vector<8x8x12xf32>
    %16 = vector.extract_strided_slice %14 {offsets = [0, 1, 0], sizes = [8, 8, 12], strides = [1, 1, 1]} : vector<10x10x12xf32> to vector<8x8x12xf32>
    %17 = vector.extract_strided_slice %14 {offsets = [0, 2, 0], sizes = [8, 8, 12], strides = [1, 1, 1]} : vector<10x10x12xf32> to vector<8x8x12xf32>
    %18 = vector.extract_strided_slice %14 {offsets = [1, 0, 0], sizes = [8, 8, 12], strides = [1, 1, 1]} : vector<10x10x12xf32> to vector<8x8x12xf32>
    %19 = vector.extract_strided_slice %14 {offsets = [1, 1, 0], sizes = [8, 8, 12], strides = [1, 1, 1]} : vector<10x10x12xf32> to vector<8x8x12xf32>
    %20 = vector.extract_strided_slice %14 {offsets = [1, 2, 0], sizes = [8, 8, 12], strides = [1, 1, 1]} : vector<10x10x12xf32> to vector<8x8x12xf32>
    %21 = vector.extract_strided_slice %14 {offsets = [2, 0, 0], sizes = [8, 8, 12], strides = [1, 1, 1]} : vector<10x10x12xf32> to vector<8x8x12xf32>
    %22 = vector.extract_strided_slice %14 {offsets = [2, 1, 0], sizes = [8, 8, 12], strides = [1, 1, 1]} : vector<10x10x12xf32> to vector<8x8x12xf32>
    %23 = vector.extract_strided_slice %14 {offsets = [2, 2, 0], sizes = [8, 8, 12], strides = [1, 1, 1]} : vector<10x10x12xf32> to vector<8x8x12xf32>
    %c0_9 = arith.constant 0 : index
    %c0_10 = arith.constant 0 : index
    %c0_11 = arith.constant 0 : index
    %c0_12 = arith.constant 0 : index
    %c0_13 = arith.constant 0 : index
    %24 = vector.load %arg4[%c0_9, %c0_10, %c0_11, %c0_12, %c0_13] : memref<1x1x10x10x12xbf16, #tpu.memory_space<vmem>>, vector<1x1x10x10x12xbf16>
    %25 = vector.shape_cast %24 : vector<1x1x10x10x12xbf16> to vector<10x10x12xbf16>
    %26 = arith.extf %25 : vector<10x10x12xbf16> to vector<10x10x12xf32>
    %27 = vector.extract_strided_slice %26 {offsets = [0, 0, 0], sizes = [8, 8, 12], strides = [1, 1, 1]} : vector<10x10x12xf32> to vector<8x8x12xf32>
    %28 = vector.extract_strided_slice %26 {offsets = [0, 1, 0], sizes = [8, 8, 12], strides = [1, 1, 1]} : vector<10x10x12xf32> to vector<8x8x12xf32>
    %29 = vector.extract_strided_slice %26 {offsets = [0, 2, 0], sizes = [8, 8, 12], strides = [1, 1, 1]} : vector<10x10x12xf32> to vector<8x8x12xf32>
    %30 = vector.extract_strided_slice %26 {offsets = [1, 0, 0], sizes = [8, 8, 12], strides = [1, 1, 1]} : vector<10x10x12xf32> to vector<8x8x12xf32>
    %31 = vector.extract_strided_slice %26 {offsets = [1, 1, 0], sizes = [8, 8, 12], strides = [1, 1, 1]} : vector<10x10x12xf32> to vector<8x8x12xf32>
    %32 = vector.extract_strided_slice %26 {offsets = [1, 2, 0], sizes = [8, 8, 12], strides = [1, 1, 1]} : vector<10x10x12xf32> to vector<8x8x12xf32>
    %33 = vector.extract_strided_slice %26 {offsets = [2, 0, 0], sizes = [8, 8, 12], strides = [1, 1, 1]} : vector<10x10x12xf32> to vector<8x8x12xf32>
    %34 = vector.extract_strided_slice %26 {offsets = [2, 1, 0], sizes = [8, 8, 12], strides = [1, 1, 1]} : vector<10x10x12xf32> to vector<8x8x12xf32>
    %35 = vector.extract_strided_slice %26 {offsets = [2, 2, 0], sizes = [8, 8, 12], strides = [1, 1, 1]} : vector<10x10x12xf32> to vector<8x8x12xf32>
    %36 = tpu.concatenate %3, %4, %5, %6, %7, %8, %9, %10, %11, %15, %16, %17, %18, %19, %20, %21 in 2 : vector<8x8x12xf32>, vector<8x8x12xf32>, vector<8x8x12xf32>, vector<8x8x12xf32>, vector<8x8x12xf32>, vector<8x8x12xf32>, vector<8x8x12xf32>, vector<8x8x12xf32>, vector<8x8x12xf32>, vector<8x8x12xf32>, vector<8x8x12xf32>, vector<8x8x12xf32>, vector<8x8x12xf32>, vector<8x8x12xf32>, vector<8x8x12xf32>, vector<8x8x12xf32> -> vector<8x8x192xf32>
    %37 = tpu.concatenate %22, %23, %27, %28, %29, %30, %31, %32, %33, %34, %35 in 2 : vector<8x8x12xf32>, vector<8x8x12xf32>, vector<8x8x12xf32>, vector<8x8x12xf32>, vector<8x8x12xf32>, vector<8x8x12xf32>, vector<8x8x12xf32>, vector<8x8x12xf32>, vector<8x8x12xf32>, vector<8x8x12xf32>, vector<8x8x12xf32> -> vector<8x8x132xf32>
    %38 = tpu.concatenate %36, %37 in 2 : vector<8x8x192xf32>, vector<8x8x132xf32> -> vector<8x8x324xf32>
    %39 = vector.shape_cast %38 : vector<8x8x324xf32> to vector<64x324xf32>
    %40 = arith.truncf %39 : vector<64x324xf32> to vector<64x324xbf16>
    %c0_14 = arith.constant 0 : index
    %c0_15 = arith.constant 0 : index
    %41 = vector.load %arg5[%c0_14, %c0_15] : memref<324x4xbf16, #tpu.memory_space<vmem>>, vector<324x4xbf16>
    %cst = arith.constant dense<0.000000e+00> : vector<64x4xf32>
    %42 = tpu.matmul %40, %41, %cst {dimension_numbers = #tpu.dot_dimension_numbers<[1], [0], [0], [1], [0, 0, 1, 1], [], []>} : vector<64x324xbf16>, vector<324x4xbf16>, vector<64x4xf32> -> vector<64x4xf32>
    %c0_16 = arith.constant 0 : index
    %c0_17 = arith.constant 0 : index
    %c0_18 = arith.constant 0 : index
    %c0_19 = arith.constant 0 : index
    %43 = vector.load %arg6[%c0_16, %c0_17, %c0_18, %c0_19] : memref<1x1x64x4xf32, #tpu.memory_space<vmem>>, vector<1x1x64x4xf32>
    %44 = vector.shape_cast %43 : vector<1x1x64x4xf32> to vector<64x4xf32>
    %45 = vector.shape_cast %42 : vector<64x4xf32> to vector<1x1x64x4xf32>
    tpu.vector_store %arg6[%c0_16, %c0_17, %c0_18, %c0_19], %45 {strides = array<i32>} : memref<1x1x64x4xf32, #tpu.memory_space<vmem>>, vector<1x1x64x4xf32>,
    %cst_20 = arith.constant dense<0.000000e+00> : vector<4xf32>
    %46 = vector.multi_reduction <add>, %42, %cst_20 [0] : vector<64x4xf32> to vector<4xf32>
    %47 = vector.shape_cast %46 : vector<4xf32> to vector<1x4xf32>
    %c0_21 = arith.constant 0 : index
    %c0_22 = arith.constant 0 : index
    %c0_23 = arith.constant 0 : index
    %c0_24 = arith.constant 0 : index
    %48 = vector.load %arg7[%c0_21, %c0_22, %c0_23, %c0_24] : memref<1x1x2x4xf32, #tpu.memory_space<vmem>>, vector<1x1x1x4xf32>
    %49 = vector.shape_cast %48 : vector<1x1x1x4xf32> to vector<1x4xf32>
    %50 = vector.shape_cast %47 : vector<1x4xf32> to vector<1x1x1x4xf32>
    tpu.vector_store %arg7[%c0_21, %c0_22, %c0_23, %c0_24], %50 {strides = array<i32>} : memref<1x1x2x4xf32, #tpu.memory_space<vmem>>, vector<1x1x1x4xf32>,
    %51 = arith.mulf %42, %42 : vector<64x4xf32>
    %cst_25 = arith.constant dense<0.000000e+00> : vector<4xf32>
    %52 = vector.multi_reduction <add>, %51, %cst_25 [0] : vector<64x4xf32> to vector<4xf32>
    %53 = vector.shape_cast %52 : vector<4xf32> to vector<1x4xf32>
    %c0_26 = arith.constant 0 : index
    %c0_27 = arith.constant 0 : index
    %c1 = arith.constant 1 : index
    %c0_28 = arith.constant 0 : index
    %54 = vector.load %arg7[%c0_26, %c0_27, %c1, %c0_28] : memref<1x1x2x4xf32, #tpu.memory_space<vmem>>, vector<1x1x1x4xf32>
    %55 = vector.shape_cast %54 : vector<1x1x1x4xf32> to vector<1x4xf32>
    %56 = vector.shape_cast %53 : vector<1x4xf32> to vector<1x1x1x4xf32>
    tpu.vector_store %arg7[%c0_26, %c0_27, %c1, %c0_28], %56 {strides = array<i32>} : memref<1x1x2x4xf32, #tpu.memory_space<vmem>>, vector<1x1x1x4xf32>,
    return
  }
  func.func @transform_0(%arg0: i32, %arg1: i32) -> (i32, i32, i32, i32, i32) {
    %c0_i32 = arith.constant 0 : i32
    %0 = arith.addi %arg1, %c0_i32 : i32
    %c0_i32_0 = arith.constant 0 : i32
    %c0_i32_1 = arith.constant 0 : i32
    %c0_i32_2 = arith.constant 0 : i32
    %c0_i32_3 = arith.constant 0 : i32
    return %arg0, %0, %c0_i32_0, %c0_i32_1, %c0_i32_2 : i32, i32, i32, i32, i32
  }
  func.func @transform_1(%arg0: i32, %arg1: i32) -> (i32, i32, i32, i32, i32) {
    %c1_i32 = arith.constant 1 : i32
    %0 = arith.addi %arg1, %c1_i32 : i32
    %c0_i32 = arith.constant 0 : i32
    %c0_i32_0 = arith.constant 0 : i32
    %c0_i32_1 = arith.constant 0 : i32
    %c0_i32_2 = arith.constant 0 : i32
    return %arg0, %0, %c0_i32, %c0_i32_0, %c0_i32_1 : i32, i32, i32, i32, i32
  }
  func.func @transform_2(%arg0: i32, %arg1: i32) -> (i32, i32, i32, i32, i32) {
    %c2_i32 = arith.constant 2 : i32
    %0 = arith.addi %arg1, %c2_i32 : i32
    %c0_i32 = arith.constant 0 : i32
    %c0_i32_0 = arith.constant 0 : i32
    %c0_i32_1 = arith.constant 0 : i32
    %c0_i32_2 = arith.constant 0 : i32
    return %arg0, %0, %c0_i32, %c0_i32_0, %c0_i32_1 : i32, i32, i32, i32, i32
  }
  func.func @transform_3(%arg0: i32, %arg1: i32) -> (i32, i32) {
    %c0_i32 = arith.constant 0 : i32
    %c0_i32_0 = arith.constant 0 : i32
    %c0_i32_1 = arith.constant 0 : i32
    return %c0_i32, %c0_i32_0 : i32, i32
  }
  func.func @transform_4(%arg0: i32, %arg1: i32) -> (i32, i32, i32, i32) {
    %c0_i32 = arith.constant 0 : i32
    %c0_i32_0 = arith.constant 0 : i32
    %c0_i32_1 = arith.constant 0 : i32
    return %arg0, %arg1, %c0_i32, %c0_i32_0 : i32, i32, i32, i32
  }
  func.func @transform_5(%arg0: i32, %arg1: i32) -> (i32, i32, i32, i32) {
    %c0_i32 = arith.constant 0 : i32
    %c0_i32_0 = arith.constant 0 : i32
    %c0_i32_1 = arith.constant 0 : i32
    return %arg0, %arg1, %c0_i32, %c0_i32_0 : i32, i32, i32, i32
  }
}

module attributes {stable_mosaic.version = 11 : i64} {
  func.func @_conv3d_kernel(%arg0: i32, %arg1: i32, %arg2: memref<1x1x10x10x4xbf16, #tpu.memory_space<vmem>>, %arg3: memref<1x1x10x10x4xbf16, #tpu.memory_space<vmem>>, %arg4: memref<1x1x10x10x4xbf16, #tpu.memory_space<vmem>>, %arg5: memref<108x4xbf16, #tpu.memory_space<vmem>>, %arg6: memref<1x1x64x4xf32, #tpu.memory_space<vmem>>, %arg7: memref<1x1x2x4xf32, #tpu.memory_space<vmem>>) attributes {dimension_semantics = [#tpu.dimension_semantics<parallel>, #tpu.dimension_semantics<parallel>], iteration_bounds = array<i64: 2, 8>, scalar_prefetch = 0 : i64, scratch_operands = 0 : i64, tpu.core_type = #tpu.core_type<tc>, window_params = [{transform_indices = @transform_0, window_bounds = array<i64: 1, 1, 10, 10, 4>}, {transform_indices = @transform_1, window_bounds = array<i64: 1, 1, 10, 10, 4>}, {transform_indices = @transform_2, window_bounds = array<i64: 1, 1, 10, 10, 4>}, {pipeline_mode = #tpu.pipeline_mode<synchronous>, transform_indices = @transform_3, window_bounds = array<i64: 108, 4>}, {transform_indices = @transform_4, window_bounds = array<i64: 1, 1, 64, 4>}, {transform_indices = @transform_5, window_bounds = array<i64: 1, 1, 2, 4>}]} {
    %c0 = arith.constant 0 : index
    %c0_0 = arith.constant 0 : index
    %c0_1 = arith.constant 0 : index
    %c0_2 = arith.constant 0 : index
    %c0_3 = arith.constant 0 : index
    %0 = vector.load %arg2[%c0, %c0_0, %c0_1, %c0_2, %c0_3] : memref<1x1x10x10x4xbf16, #tpu.memory_space<vmem>>, vector<1x1x10x10x4xbf16>
    %1 = vector.shape_cast %0 : vector<1x1x10x10x4xbf16> to vector<10x10x4xbf16>
    %2 = arith.extf %1 : vector<10x10x4xbf16> to vector<10x10x4xf32>
    %3 = vector.extract_strided_slice %2 {offsets = [0, 0, 0], sizes = [8, 8, 4], strides = [1, 1, 1]} : vector<10x10x4xf32> to vector<8x8x4xf32>
    %4 = vector.extract_strided_slice %2 {offsets = [0, 1, 0], sizes = [8, 8, 4], strides = [1, 1, 1]} : vector<10x10x4xf32> to vector<8x8x4xf32>
    %5 = vector.extract_strided_slice %2 {offsets = [0, 2, 0], sizes = [8, 8, 4], strides = [1, 1, 1]} : vector<10x10x4xf32> to vector<8x8x4xf32>
    %6 = vector.extract_strided_slice %2 {offsets = [1, 0, 0], sizes = [8, 8, 4], strides = [1, 1, 1]} : vector<10x10x4xf32> to vector<8x8x4xf32>
    %7 = vector.extract_strided_slice %2 {offsets = [1, 1, 0], sizes = [8, 8, 4], strides = [1, 1, 1]} : vector<10x10x4xf32> to vector<8x8x4xf32>
    %8 = vector.extract_strided_slice %2 {offsets = [1, 2, 0], sizes = [8, 8, 4], strides = [1, 1, 1]} : vector<10x10x4xf32> to vector<8x8x4xf32>
    %9 = vector.extract_strided_slice %2 {offsets = [2, 0, 0], sizes = [8, 8, 4], strides = [1, 1, 1]} : vector<10x10x4xf32> to vector<8x8x4xf32>
    %10 = vector.extract_strided_slice %2 {offsets = [2, 1, 0], sizes = [8, 8, 4], strides = [1, 1, 1]} : vector<10x10x4xf32> to vector<8x8x4xf32>
    %11 = vector.extract_strided_slice %2 {offsets = [2, 2, 0], sizes = [8, 8, 4], strides = [1, 1, 1]} : vector<10x10x4xf32> to vector<8x8x4xf32>
    %c0_4 = arith.constant 0 : index
    %c0_5 = arith.constant 0 : index
    %c0_6 = arith.constant 0 : index
    %c0_7 = arith.constant 0 : index
    %c0_8 = arith.constant 0 : index
    %12 = vector.load %arg3[%c0_4, %c0_5, %c0_6, %c0_7, %c0_8] : memref<1x1x10x10x4xbf16, #tpu.memory_space<vmem>>, vector<1x1x10x10x4xbf16>
    %13 = vector.shape_cast %12 : vector<1x1x10x10x4xbf16> to vector<10x10x4xbf16>
    %14 = arith.extf %13 : vector<10x10x4xbf16> to vector<10x10x4xf32>
    %15 = vector.extract_strided_slice %14 {offsets = [0, 0, 0], sizes = [8, 8, 4], strides = [1, 1, 1]} : vector<10x10x4xf32> to vector<8x8x4xf32>
    %16 = vector.extract_strided_slice %14 {offsets = [0, 1, 0], sizes = [8, 8, 4], strides = [1, 1, 1]} : vector<10x10x4xf32> to vector<8x8x4xf32>
    %17 = vector.extract_strided_slice %14 {offsets = [0, 2, 0], sizes = [8, 8, 4], strides = [1, 1, 1]} : vector<10x10x4xf32> to vector<8x8x4xf32>
    %18 = vector.extract_strided_slice %14 {offsets = [1, 0, 0], sizes = [8, 8, 4], strides = [1, 1, 1]} : vector<10x10x4xf32> to vector<8x8x4xf32>
    %19 = vector.extract_strided_slice %14 {offsets = [1, 1, 0], sizes = [8, 8, 4], strides = [1, 1, 1]} : vector<10x10x4xf32> to vector<8x8x4xf32>
    %20 = vector.extract_strided_slice %14 {offsets = [1, 2, 0], sizes = [8, 8, 4], strides = [1, 1, 1]} : vector<10x10x4xf32> to vector<8x8x4xf32>
    %21 = vector.extract_strided_slice %14 {offsets = [2, 0, 0], sizes = [8, 8, 4], strides = [1, 1, 1]} : vector<10x10x4xf32> to vector<8x8x4xf32>
    %22 = vector.extract_strided_slice %14 {offsets = [2, 1, 0], sizes = [8, 8, 4], strides = [1, 1, 1]} : vector<10x10x4xf32> to vector<8x8x4xf32>
    %23 = vector.extract_strided_slice %14 {offsets = [2, 2, 0], sizes = [8, 8, 4], strides = [1, 1, 1]} : vector<10x10x4xf32> to vector<8x8x4xf32>
    %c0_9 = arith.constant 0 : index
    %c0_10 = arith.constant 0 : index
    %c0_11 = arith.constant 0 : index
    %c0_12 = arith.constant 0 : index
    %c0_13 = arith.constant 0 : index
    %24 = vector.load %arg4[%c0_9, %c0_10, %c0_11, %c0_12, %c0_13] : memref<1x1x10x10x4xbf16, #tpu.memory_space<vmem>>, vector<1x1x10x10x4xbf16>
    %25 = vector.shape_cast %24 : vector<1x1x10x10x4xbf16> to vector<10x10x4xbf16>
    %26 = arith.extf %25 : vector<10x10x4xbf16> to vector<10x10x4xf32>
    %27 = vector.extract_strided_slice %26 {offsets = [0, 0, 0], sizes = [8, 8, 4], strides = [1, 1, 1]} : vector<10x10x4xf32> to vector<8x8x4xf32>
    %28 = vector.extract_strided_slice %26 {offsets = [0, 1, 0], sizes = [8, 8, 4], strides = [1, 1, 1]} : vector<10x10x4xf32> to vector<8x8x4xf32>
    %29 = vector.extract_strided_slice %26 {offsets = [0, 2, 0], sizes = [8, 8, 4], strides = [1, 1, 1]} : vector<10x10x4xf32> to vector<8x8x4xf32>
    %30 = vector.extract_strided_slice %26 {offsets = [1, 0, 0], sizes = [8, 8, 4], strides = [1, 1, 1]} : vector<10x10x4xf32> to vector<8x8x4xf32>
    %31 = vector.extract_strided_slice %26 {offsets = [1, 1, 0], sizes = [8, 8, 4], strides = [1, 1, 1]} : vector<10x10x4xf32> to vector<8x8x4xf32>
    %32 = vector.extract_strided_slice %26 {offsets = [1, 2, 0], sizes = [8, 8, 4], strides = [1, 1, 1]} : vector<10x10x4xf32> to vector<8x8x4xf32>
    %33 = vector.extract_strided_slice %26 {offsets = [2, 0, 0], sizes = [8, 8, 4], strides = [1, 1, 1]} : vector<10x10x4xf32> to vector<8x8x4xf32>
    %34 = vector.extract_strided_slice %26 {offsets = [2, 1, 0], sizes = [8, 8, 4], strides = [1, 1, 1]} : vector<10x10x4xf32> to vector<8x8x4xf32>
    %35 = vector.extract_strided_slice %26 {offsets = [2, 2, 0], sizes = [8, 8, 4], strides = [1, 1, 1]} : vector<10x10x4xf32> to vector<8x8x4xf32>
    %36 = tpu.concatenate %3, %4, %5, %6, %7, %8, %9, %10, %11, %15, %16, %17, %18, %19, %20, %21 in 2 : vector<8x8x4xf32>, vector<8x8x4xf32>, vector<8x8x4xf32>, vector<8x8x4xf32>, vector<8x8x4xf32>, vector<8x8x4xf32>, vector<8x8x4xf32>, vector<8x8x4xf32>, vector<8x8x4xf32>, vector<8x8x4xf32>, vector<8x8x4xf32>, vector<8x8x4xf32>, vector<8x8x4xf32>, vector<8x8x4xf32>, vector<8x8x4xf32>, vector<8x8x4xf32> -> vector<8x8x64xf32>
    %37 = tpu.concatenate %22, %23, %27, %28, %29, %30, %31, %32, %33, %34, %35 in 2 : vector<8x8x4xf32>, vector<8x8x4xf32>, vector<8x8x4xf32>, vector<8x8x4xf32>, vector<8x8x4xf32>, vector<8x8x4xf32>, vector<8x8x4xf32>, vector<8x8x4xf32>, vector<8x8x4xf32>, vector<8x8x4xf32>, vector<8x8x4xf32> -> vector<8x8x44xf32>
    %38 = tpu.concatenate %36, %37 in 2 : vector<8x8x64xf32>, vector<8x8x44xf32> -> vector<8x8x108xf32>
    %39 = vector.shape_cast %38 : vector<8x8x108xf32> to vector<64x108xf32>
    %40 = arith.truncf %39 : vector<64x108xf32> to vector<64x108xbf16>
    %c0_14 = arith.constant 0 : index
    %c0_15 = arith.constant 0 : index
    %41 = vector.load %arg5[%c0_14, %c0_15] : memref<108x4xbf16, #tpu.memory_space<vmem>>, vector<108x4xbf16>
    %cst = arith.constant dense<0.000000e+00> : vector<64x4xf32>
    %42 = tpu.matmul %40, %41, %cst {dimension_numbers = #tpu.dot_dimension_numbers<[1], [0], [0], [1], [0, 0, 1, 1], [], []>} : vector<64x108xbf16>, vector<108x4xbf16>, vector<64x4xf32> -> vector<64x4xf32>
    %c0_16 = arith.constant 0 : index
    %c0_17 = arith.constant 0 : index
    %c0_18 = arith.constant 0 : index
    %c0_19 = arith.constant 0 : index
    %43 = vector.load %arg6[%c0_16, %c0_17, %c0_18, %c0_19] : memref<1x1x64x4xf32, #tpu.memory_space<vmem>>, vector<1x1x64x4xf32>
    %44 = vector.shape_cast %43 : vector<1x1x64x4xf32> to vector<64x4xf32>
    %45 = vector.shape_cast %42 : vector<64x4xf32> to vector<1x1x64x4xf32>
    tpu.vector_store %arg6[%c0_16, %c0_17, %c0_18, %c0_19], %45 {strides = array<i32>} : memref<1x1x64x4xf32, #tpu.memory_space<vmem>>, vector<1x1x64x4xf32>,
    %cst_20 = arith.constant dense<0.000000e+00> : vector<4xf32>
    %46 = vector.multi_reduction <add>, %42, %cst_20 [0] : vector<64x4xf32> to vector<4xf32>
    %47 = vector.shape_cast %46 : vector<4xf32> to vector<1x4xf32>
    %c0_21 = arith.constant 0 : index
    %c0_22 = arith.constant 0 : index
    %c0_23 = arith.constant 0 : index
    %c0_24 = arith.constant 0 : index
    %48 = vector.load %arg7[%c0_21, %c0_22, %c0_23, %c0_24] : memref<1x1x2x4xf32, #tpu.memory_space<vmem>>, vector<1x1x1x4xf32>
    %49 = vector.shape_cast %48 : vector<1x1x1x4xf32> to vector<1x4xf32>
    %50 = vector.shape_cast %47 : vector<1x4xf32> to vector<1x1x1x4xf32>
    tpu.vector_store %arg7[%c0_21, %c0_22, %c0_23, %c0_24], %50 {strides = array<i32>} : memref<1x1x2x4xf32, #tpu.memory_space<vmem>>, vector<1x1x1x4xf32>,
    %51 = arith.mulf %42, %42 : vector<64x4xf32>
    %cst_25 = arith.constant dense<0.000000e+00> : vector<4xf32>
    %52 = vector.multi_reduction <add>, %51, %cst_25 [0] : vector<64x4xf32> to vector<4xf32>
    %53 = vector.shape_cast %52 : vector<4xf32> to vector<1x4xf32>
    %c0_26 = arith.constant 0 : index
    %c0_27 = arith.constant 0 : index
    %c1 = arith.constant 1 : index
    %c0_28 = arith.constant 0 : index
    %54 = vector.load %arg7[%c0_26, %c0_27, %c1, %c0_28] : memref<1x1x2x4xf32, #tpu.memory_space<vmem>>, vector<1x1x1x4xf32>
    %55 = vector.shape_cast %54 : vector<1x1x1x4xf32> to vector<1x4xf32>
    %56 = vector.shape_cast %53 : vector<1x4xf32> to vector<1x1x1x4xf32>
    tpu.vector_store %arg7[%c0_26, %c0_27, %c1, %c0_28], %56 {strides = array<i32>} : memref<1x1x2x4xf32, #tpu.memory_space<vmem>>, vector<1x1x1x4xf32>,
    return
  }
  func.func @transform_0(%arg0: i32, %arg1: i32) -> (i32, i32, i32, i32, i32) {
    %c0_i32 = arith.constant 0 : i32
    %0 = arith.addi %arg1, %c0_i32 : i32
    %c0_i32_0 = arith.constant 0 : i32
    %c0_i32_1 = arith.constant 0 : i32
    %c0_i32_2 = arith.constant 0 : i32
    %c0_i32_3 = arith.constant 0 : i32
    return %arg0, %0, %c0_i32_0, %c0_i32_1, %c0_i32_2 : i32, i32, i32, i32, i32
  }
  func.func @transform_1(%arg0: i32, %arg1: i32) -> (i32, i32, i32, i32, i32) {
    %c1_i32 = arith.constant 1 : i32
    %0 = arith.addi %arg1, %c1_i32 : i32
    %c0_i32 = arith.constant 0 : i32
    %c0_i32_0 = arith.constant 0 : i32
    %c0_i32_1 = arith.constant 0 : i32
    %c0_i32_2 = arith.constant 0 : i32
    return %arg0, %0, %c0_i32, %c0_i32_0, %c0_i32_1 : i32, i32, i32, i32, i32
  }
  func.func @transform_2(%arg0: i32, %arg1: i32) -> (i32, i32, i32, i32, i32) {
    %c2_i32 = arith.constant 2 : i32
    %0 = arith.addi %arg1, %c2_i32 : i32
    %c0_i32 = arith.constant 0 : i32
    %c0_i32_0 = arith.constant 0 : i32
    %c0_i32_1 = arith.constant 0 : i32
    %c0_i32_2 = arith.constant 0 : i32
    return %arg0, %0, %c0_i32, %c0_i32_0, %c0_i32_1 : i32, i32, i32, i32, i32
  }
  func.func @transform_3(%arg0: i32, %arg1: i32) -> (i32, i32) {
    %c0_i32 = arith.constant 0 : i32
    %c0_i32_0 = arith.constant 0 : i32
    %c0_i32_1 = arith.constant 0 : i32
    return %c0_i32, %c0_i32_0 : i32, i32
  }
  func.func @transform_4(%arg0: i32, %arg1: i32) -> (i32, i32, i32, i32) {
    %c0_i32 = arith.constant 0 : i32
    %c0_i32_0 = arith.constant 0 : i32
    %c0_i32_1 = arith.constant 0 : i32
    return %arg0, %arg1, %c0_i32, %c0_i32_0 : i32, i32, i32, i32
  }
  func.func @transform_5(%arg0: i32, %arg1: i32) -> (i32, i32, i32, i32) {
    %c0_i32 = arith.constant 0 : i32
    %c0_i32_0 = arith.constant 0 : i32
    %c0_i32_1 = arith.constant 0 : i32
    return %arg0, %arg1, %c0_i32, %c0_i32_0 : i32, i32, i32, i32
  }
}

</mosaic_0001>

<bundles_post_ra>
// kernel: up3d_forward.2
= control target key start
LH: loop header
LB: loop body
LE: loop exit
PB: predicated region body
PF: predicated region fallthrough
CT: control target
= control target key end

     0   :  { %s3419_s18 = smov 0   ;;  %s3421_s19 = smov 0   ;;  %s4970_s0 = inlined_call_operand.vmem [shape: bf16[2,10,10,10,12], index: 0, kind: input, shape index: {}, may-alias: {0,1,2}]   ;;  %s4971_s1 = inlined_call_operand.vmem [shape: bf16[2,10,10,10,12], index: 1, kind: input, shape index: {}, may-alias: {0,1,2}]   ;;  %s4972_s2 = inlined_call_operand.vmem [shape: bf16[2,10,10,10,12], index: 2, kind: input, shape index: {}, may-alias: {0,1,2}]   ;;  %s4973_s3 = inlined_call_operand.vmem [shape: bf16[324,4], index: 3, kind: input, shape index: {}]   ;;  %s4974_s4 = inlined_call_operand.vmem [shape: f32[2,8,64,4], index: 4, kind: output, shape index: {0}]   ;;  %s4975_s5 = inlined_call_operand.vmem [shape: f32[2,8,2,4], index: 5, kind: output, shape index: {1}]  }
   0x1   :  { %s3423_s20 = smov 0   ;;  %s3425_s21 = smov 0  }
   0x2   :  { %s3427_s22 = smov 0  }
   0x3 LB: > { %s25_s23 = sadd.s32 1, %s3363_s20  ;;  %s28_s24 = sadd.s32 1, %s3367_s21  ;;  %s3371_s22 = sphi %s3427_s22, %s16_s22   ;;  %s3367_s21 = sphi %s3425_s21, %s5113_s21   ;;  %s3363_s20 = sphi %s3423_s20, %s5112_s20   ;;  %s3359_s19 = sphi %s3421_s19, %s5111_s19   ;;  %s3355_s18 = sphi %s3419_s18, %s5110_s18  }
   0x4   : > { %p26_p0 = scmp.ge.s32.totalorder %s25_s23, 8  ;;  %p2468_p1 = scmp.ge.s32.totalorder %s3371_s22, 1 }
   0x5   : > { %p252_p2 = scmp.lt.s32.totalorder %s3371_s22, 17 }
   0x6   : > { %s5115_s23 = smov (%p26_p0, %s25_s23), 0  ;;  %s5117_s24 = smov (!%p26_p0, %s28_s24), %s3367_s21 }
   0x7   : > { %p253_p3 = pnand %p2468_p1, %p252_p2  ;;  %p30_p4 = scmp.ge.s32.totalorder %s5117_s24, 2 }
   0x9   : > { %s5119_s24 = smov (%p30_p4, %s5117_s24), 0  ;;  %256 = sbr.rel (%p253_p3) target bundleno = 729 (0x2d9), region = 36 }
  0x10   : > { %p316_p5 = scmp.lt.s32.totalorder %s3359_s19, 1  ;;  %p318_p6 = scmp.lt.s32.totalorder %s3355_s18, 9  ;;  %vm501_vm0 = vcmask 1046528   ;;  %vm550_vm1 = vcmask 1045504   ;;  %vm1000_vm2 = vcmask 97280   ;;  %vm1009_vm3 = vcmask 195584  }
  0x11   : > { %s325_s8 = sadd.s32 1, %s3355_s18  ;;  %s3373_s10 = smov 12   ;;  %vm1018_vm4 = vcmask 293888   ;;  %vm1027_vm5 = vcmask 392192   ;;  %vm1036_vm6 = vcmask 490496   ;;  %vm5018_vm7 = vcmask 588800  }
  0x12   : > { %s5121_s19 = smov (!%p316_p5, %s3359_s19), 1  ;;  %p3499_p7 = scmp.lt.s32.totalorder %s325_s8, 9  ;;  %vm5017_vm8 = vcmask 687104   ;;  %vm1063_vm9 = vcmask 785408   ;;  %vm1072_vm10 = vcmask 883712   ;;  %vm5016_vm11 = vcmask 982016  }
  0x13   : > { %s319_s25 = scalar_select %p318_p6, %s3355_s18, 9  ;;  %vm2085_vm12 = vcmask 1041408   ;;  %vm1090_vm13 = vcmask 31744   ;;  %vm1099_vm14 = vcmask 130048   ;;  %vm1108_vm15 = vcmask 228352  }
  0x14   : > { %s3456_s26 = smul.u32 200, %s5121_s19  ;;  %s5123_s8 = smov (!%p3499_p7, %s325_s8), 9 }
  0x15   : > { %s2572_s27 = smul.u32 20, %s319_s25  ;;  %s3374_s14 = smov 24  }
  0x16   : > { %s2574_s11 = smul.u32 20, %s5123_s8  ;;  %s3375_s25 = smov 36  }
  0x17   : > { %s322_s28 = sadd.s32 %s3456_s26, %s2572_s27  ;;  %s3376_s27 = smov 48  }
  0x18   : > { %s2469_s29 = sshll.u32 %s322_s28, 2  ;;  %s332_s12 = sadd.s32 %s2574_s11, %s3456_s26 }
  0x19   : > { %s3462_s7 = scalar_lea.vmem %s4970_s0, %s2469_s29  ;;  %s2470_s13 = sshll.u32 %s332_s12, 2 }
  0x1a   : > { %v373_v0 = vld [vmem:[%s3462_s7 + $0x20] ss:$8 sps:$4 sm:$0xff]   ;;  %v3466_v1 = vld [vmem:[%s3462_s7 + $0x24] sm:$0x1]  ;;  %v3469_v2 = vld [vmem:[%s3462_s7 + $0x2c] sm:$0x1]  ;;  %s3625_s17 = scalar_lea.vmem %s4971_s1, %s2470_s13 }
  0x1b   : > { %v3472_v3 = vunpack.c.l.bf16 %v373_v0  ;;  %v394_v4 = vunpack.c.l.bf16 %v3466_v1  ;;  %v3475_v5 = vunpack.c.h.bf16 %v373_v0  ;;  %v396_v6 = vunpack.c.l.bf16 %v3469_v2  ;;  %v367_v7 = vld [vmem:[%s3462_s7 + $0x8] ss:$8 sps:$4 sm:$0xff]   ;;  %v3480_v8 = vld [vmem:[%s3462_s7 + $0xc] sm:$0x1]  ;;  %v370_v9 = vld [vmem:[%s3462_s7 + $0x14] sm:$0x1] }
  0x1c   : > { %v3483_v10 = vunpack.c.l.bf16 %v367_v7  ;;  %v388_v11 = vunpack.c.l.bf16 %v3480_v8  ;;  %v3486_v12 = vunpack.c.h.bf16 %v367_v7  ;;  %v365_v13 = vld [vmem:[%s3462_s7] ss:$48 sps:$4 sm:$0xff]   ;;  %v366_v14 = vld [vmem:[%s3462_s7 + $0x4] sm:$0x1]  ;;  %v378_v19 = vld [vmem:[%s3462_s7 + $0x34] sm:$0x1]  ;;  %v390_v20 = vunpack.c.l.bf16 %v370_v9 }
  0x1d   : > { %5019 = vst [vmem:[#allocation2_spill] sm:$0xff] %v3472_v3  ;;  %5020 = vst [vmem:[#allocation3_spill] sm:$0xff] %v3475_v5  ;;  %v514_v15 = vrot.slane %v3472_v3, 1  ;;  %v515_v16 = vrot.slane %v394_v4, 1  ;;  %v517_v17 = vrot.slane %v3475_v5, 1  ;;  %v518_v18 = vrot.slane %v396_v6, 1 }
  0x1e   : > { %5021 = vst [vmem:[#allocation4_spill] sm:$0xff] %v3486_v12  ;;  %v505_v21 = vrot.slane %v3483_v10, 1  ;;  %v506_v22 = vrot.slane %v388_v11, 1  ;;  %v508_v23 = vrot.slane %v3486_v12, 1  ;;  %v3506_v24 = vld [vmem:[%s3462_s7 + $0x38] ss:$8 sps:$4 sm:$0xff]   ;;  %v3514_v27 = vunpack.c.l.bf16 %v365_v13 }
  0x1f   : > { %v3509_v25 = vsel %vm501_vm0, %v514_v15, %v515_v16  ;;  %v3512_v26 = vsel %vm501_vm0, %v517_v17, %v518_v18  ;;  %v386_v28 = vunpack.c.l.bf16 %v366_v14  ;;  %v380_v29 = vld [vmem:[%s3462_s7 + $0x3c] sm:$0x1]  ;;  %v3518_v30 = vld [vmem:[%s3462_s7 + $0x18] ss:$48 sps:$4 sm:$0xff]   ;;  %v509_v33 = vrot.slane %v390_v20, 1  ;;  %s336_s28 = sadd.s32 2, %s3355_s18 }
  0x20   : > { %v3522_v31 = vpack.i.bf16 %v3512_v26, %v3509_v25  ;;  %v3525_v32 = vsel %vm501_vm0, %v505_v21, %v506_v22  ;;  %v3527_v34 = vunpack.c.h.bf16 %v365_v13  ;;  %v502_v35 = vrot.slane %v3514_v27, 1  ;;  %v372_v39 = vld [vmem:[%s3462_s7 + $0x1c] sm:$0x1]  ;;  %v382_v2 = vld [vmem:[%s3462_s7 + $0x44] sm:$0x1]  ;;  %p339_p8 = scmp.lt.s32.totalorder %s336_s28, 9 }
  0x21   : > { %v503_v36 = vrot.slane %v386_v28, 1  ;;  %v398_v37 = vunpack.c.l.bf16 %v378_v19  ;;  %v3531_v38 = vunpack.c.l.bf16 %v3506_v24  ;;  %v400_v40 = vunpack.c.l.bf16 %v380_v29  ;;  %s3377_s29 = smov 60   ;;  %s3378_s8 = smov 72  }
  0x22   : > { %5023 = vst [vmem:[#allocation5_spill] sm:$0xff] %v3527_v34  ;;  %2643 = vrot.lane.b32.xlu1 %v3522_v31, %s3373_s10  ;;  %v520_v41 = vrot.slane %v3527_v34, 1  ;;  %v3544_v42 = vunpack.c.l.bf16 %v3518_v30  ;;  %v3547_v43 = vsel %vm501_vm0, %v508_v23, %v509_v33  ;;  %v392_v49 = vunpack.c.l.bf16 %v372_v39  ;;  %v3639_v39 = vld [vmem:[%s3625_s17 + $0x10] ss:$8 sps:$4 sm:$0xff]   ;;  %s5125_s28 = smov (!%p339_p8, %s336_s28), 9  ;;  %s3379_s12 = smov 84  }
  0x23   : > { %5024 = vst [vmem:[#allocation6_spill] sm:$0xff] %v3531_v38  ;;  %v504_v44 = vsel %vm501_vm0, %v502_v35, %v503_v36  ;;  %v521_v45 = vrot.slane %v398_v37, 1  ;;  %v523_v46 = vrot.slane %v3531_v38, 1  ;;  %v524_v48 = vrot.slane %v400_v40, 1  ;;  %s2575_s30 = smul.u32 20, %s5125_s28  ;;  %s3380_s13 = smov 96  }
  0x24   : > { %5025 = vst [vmem:[#allocation7_spill] sm:$0xff] %v3544_v42  ;;  %v2632_v47 = vpack.i.bf16 %v3525_v32, %v504_v44  ;;  %v511_v50 = vrot.slane %v3544_v42, 1  ;;  %v557_v52 = vrot.slane %v3486_v12, 2  ;;  %v558_v53 = vrot.slane %v390_v20, 2  ;;  %s3381_s15 = smov 108   ;;  %s3382_s16 = smov 120  }
  0x25   : > { %v3554_v51 = vsel %vm501_vm0, %v520_v41, %v521_v45  ;;  %v560_v54 = vrot.slane %v3544_v42, 2  ;;  %v3561_v55 = vsel %vm501_vm0, %v523_v46, %v524_v48  ;;  %v512_v56 = vrot.slane %v392_v49, 1  ;;  %v3645_v41 = vld [vmem:[%s3625_s17] ss:$8 sps:$4 sm:$0xff]   ;;  %v410_v46 = vld [vmem:[%s3625_s17 + $0x14] sm:$0x1]  ;;  %s343_s6 = sadd.s32 %s2575_s30, %s3456_s26 }
  0x26   : > { %2633 = vrot.lane.b32.xlu0 %v2632_v47, %s3373_s10  ;;  %v561_v57 = vrot.slane %v392_v49, 2  ;;  %v551_v58 = vrot.slane %v3514_v27, 2  ;;  %v3566_v59 = vpack.i.bf16 %v3561_v55, %v3554_v51  ;;  %v3569_v60 = vsel %vm550_vm1, %v557_v52, %v558_v53  ;;  %v3653_v47 = vld [vmem:[%s3625_s17 + $0xc] sm:$0x1]  ;;  %s3385_s28 = smov 40   ;;  %p349_p9 = scmp.lt.s32.totalorder %s3355_s18, 7 }
  0x27   : > { %v552_v61 = vrot.slane %v386_v28, 2  ;;  %v554_v62 = vrot.slane %v3483_v10, 2  ;;  %v513_v63 = vsel %vm501_vm0, %v511_v50, %v512_v56  ;;  %v555_v7 = vrot.slane %v388_v11, 2 }
  0x28   : > { %v3574_v0 = vsel %vm550_vm1, %v560_v54, %v561_v57  ;;  %v569_v8 = vrot.slane %v3527_v34, 2  ;;  %2648 = vrot.lane.b32.xlu1 %v3566_v59, %s3373_s10  ;;  %v3580_v9 = vpack.i.bf16 %v513_v63, %v3547_v43  ;;  %v570_v15 = vrot.slane %v398_v37, 2  ;;  %s5127_s18 = smov (!%p349_p9, %s3355_s18), 7 }
  0x29   : > { %v3584_v13 = vpack.i.bf16 %v3574_v0, %v3569_v60  ;;  %v553_v14 = vsel %vm550_vm1, %v551_v58, %v552_v61  ;;  %v3589_v16 = vsel %vm550_vm1, %v554_v62, %v555_v7  ;;  %v572_v11 = vrot.slane %v3531_v38, 2 }
  0x2a   : > { %v573_v17 = vrot.slane %v400_v40, 2  ;;  %v563_v18 = vrot.slane %v3472_v3, 2  ;;  %2638 = vrot.lane.b32.xlu0 %v3580_v9, %s3373_s10  ;;  %v2652_v19 = vpack.i.bf16 %v3589_v16, %v553_v14  ;;  %v3597_v20 = vsel %vm550_vm1, %v569_v8, %v570_v15 }
  0x2b   : > { %v564_v21 = vrot.slane %v394_v4, 2  ;;  %v566_v22 = vrot.slane %v3475_v5, 2  ;;  %v567_v28 = vrot.slane %v396_v6, 2  ;;  %v2677_v6 = vpack.i.bf16 %v3472_v3, %v3544_v42 }
  0x2c   : > { %v3603_v23 = vsel %vm550_vm1, %v572_v11, %v573_v17  ;;  %2658 = vrot.lane.b32.xlu1 %v3584_v13, %s3374_s14  ;;  %v3632_v35 = vunpack.c.h.bf16 %v3506_v24  ;;  %v402_v36 = vunpack.c.l.bf16 %v382_v2  ;;  %v2667_v37 = vpack.i.bf16 %v3486_v12, %v3483_v10 }
  0x2d   : > { %v3611_v29 = vpack.i.bf16 %v3603_v23, %v3597_v20  ;;  %v565_v1 = vsel %vm550_vm1, %v563_v18, %v564_v21  ;;  %v3615_v4 = vsel %vm550_vm1, %v566_v22, %v567_v28  ;;  %v2682_v45 = vpack.i.bf16 %v3527_v34, %v3475_v5 }
  0x2e   : > { %2653 = vrot.lane.b32.xlu0 %v2652_v19, %s3374_s14  ;;  %v3619_v33 = vpack.i.bf16 %v3615_v4, %v565_v1  ;;  %v2687_v40 = vpack.i.bf16 %v3632_v35, %v3531_v38  ;;  %v625_v24 = vrot.slane %v3632_v35, 1  ;;  %v626_v44 = vrot.slane %v402_v36, 1 }
  0x2f   : > { %v2697_v48 = vpack.i.bf16 %v3509_v25, %v513_v63  ;;  %v3658_v49 = vunpack.c.l.bf16 %v3639_v39  ;;  %v3661_v50 = vunpack.c.h.bf16 %v3645_v41  ;;  %v3666_v53 = vunpack.c.l.bf16 %v410_v46  ;;  %v417_v46 = vld [vmem:[%s3625_s17 + $0x30] ss:$8 sps:$4 sm:$0xff]  }
  0x30   : > { %2673 = vrot.lane.b32.xlu1 %v3611_v29, %s3374_s14  ;;  %v3664_v52 = vsel %vm501_vm0, %v625_v24, %v626_v44  ;;  %v2692_v54 = vpack.i.bf16 %v3547_v43, %v3525_v32  ;;  %v428_v25 = vunpack.c.l.bf16 %v3653_v47  ;;  %v652_v32 = vrot.slane %v3632_v35, 2  ;;  %v412_v24 = vld [vmem:[%s3625_s17 + $0x1c] sm:$0x1] }
  0x31   : > { %v805_v56 = vrot.slane %v3658_v49, 1  ;;  %v802_v57 = vrot.slane %v3661_v50, 1  ;;  %v806_v58 = vrot.slane %v3666_v53, 1  ;;  %v2707_v61 = vpack.i.bf16 %v3664_v52, %v3561_v55 }
  0x32   : > { %2663 = vrot.lane.b32.xlu0 %v3619_v33, %s3374_s14  ;;  %v803_v62 = vrot.slane %v428_v25, 1  ;;  %v653_v43 = vrot.slane %v402_v36, 2  ;;  %v2702_v63 = vpack.i.bf16 %v3554_v51, %v3512_v26  ;;  %v2717_v14 = vpack.i.bf16 %v565_v1, %v3574_v0  ;;  %v384_v0 = vld [vmem:[%s3462_s7 + $0x4c] sm:$0x1]  ;;  %s2471_s7 = sshll.u32 %s343_s6, 2 }
  0x33   : > { %v3688_v7 = vsel %vm501_vm0, %v805_v56, %v806_v58  ;;  %v2712_v26 = vpack.i.bf16 %v3569_v60, %v3589_v16  ;;  %v2722_v11 = vpack.i.bf16 %v3597_v20, %v3615_v4  ;;  %v2737_v17 = vpack.i.bf16 %v3475_v5, %v3472_v3  ;;  %s3725_s26 = scalar_lea.vmem %s4972_s2, %s2471_s7  ;;  %s3386_s7 = smov 28  }
  0x34   : > { %2678 = vrot.lane.b32.xlu1 %v2677_v6, %s3375_s25  ;;  %v3691_v55 = vsel %vm501_vm0, %v802_v57, %v803_v62  ;;  %v654_v15 = vsel %vm550_vm1, %v652_v32, %v653_v43  ;;  %v403_v60 = vunpack.c.h.bf16 %v3518_v30  ;;  %v404_v16 = vunpack.c.l.bf16 %v384_v0  ;;  %v3732_v28 = vld [vmem:[%s3725_s26 + $0x30] ss:$8 sps:$4 sm:$0xff]  }
  0x35   : > { %v2727_v51 = vpack.i.bf16 %v654_v15, %v3603_v23  ;;  %v2732_v18 = vpack.i.bf16 %v3544_v42, %v3486_v12  ;;  %v2742_v22 = vpack.i.bf16 %v3531_v38, %v3527_v34  ;;  %v3729_v23 = vld [vmem:[%s3725_s26 + $0x20] ss:$8 sps:$4 sm:$0xff]   ;;  %v3761_v44 = vunpack.c.h.bf16 %v3639_v39 }
  0x36   : > { %2668 = vrot.lane.b32.xlu0 %v2667_v37, %s3375_s25  ;;  %v2747_v19 = vpack.i.bf16 %v403_v60, %v3632_v35  ;;  %v705_v20 = vrot.slane %v403_v60, 1  ;;  %v706_v21 = vrot.slane %v404_v16, 1  ;;  %v3735_v1 = vunpack.c.h.bf16 %v3729_v23 }
  0x37   : > { %v732_v2 = vrot.slane %v403_v60, 2  ;;  %v733_v6 = vrot.slane %v404_v16, 2  ;;  %v3741_v35 = vunpack.c.l.bf16 %v3732_v28  ;;  %v3778_v39 = vunpack.c.l.bf16 %v417_v46 }
  0x38   : > { %2688 = vrot.lane.b32.xlu1 %v2687_v40, %s3375_s25  ;;  %v707_v30 = vsel %vm501_vm0, %v705_v20, %v706_v21  ;;  %v1200_v36 = vrot.slane %v3735_v1, 7  ;;  %v3780_v56 = vunpack.c.h.bf16 %v417_v46  ;;  %v808_v57 = vrot.slane %v3761_v44, 1 }
  0x39   : > { %v2767_v4 = vpack.i.bf16 %v707_v30, %v3664_v52  ;;  %v4976_v37 = vrot.slane %v3741_v35, 7  ;;  %v3770_v52 = vunpack.c.l.bf16 %v3645_v41  ;;  %v2822_v30 = vpack.i.bf16 %v806_v58, %v3688_v7 }
  0x3a   : > { %2683 = vrot.lane.b32.xlu0 %v2682_v45, %s3375_s25  ;;  %v406_v45 = vld [vmem:[%s3625_s17 + $0x4] sm:$0x1] }
  0x3b   : > { %v3753_v40 = vpack.i.bf16 %v4976_v37, %v1200_v36  ;;  %v2792_v41 = vpack.i.bf16 %v3661_v50, %v3770_v52  ;;  %v799_v32 = vrot.slane %v3770_v52, 1 }
  0x3c   : > { %2698 = vrot.lane.b32.xlu1 %v2697_v48, %s3376_s27  ;;  %v3765_v48 = vunpack.c.l.bf16 %v412_v24 }
  0x3e   : > { %2693 = vrot.lane.b32.xlu0 %v2692_v54, %s3376_s27  ;;  %v426_v54 = vunpack.c.l.bf16 %v406_v45  ;;  %v450_v45 = vld [vmem:[%s3725_s26 + $0x14] sm:$0x1] }
  0x40   : > { %2708 = vrot.lane.b32.xlu1 %v2707_v61, %s3376_s27  ;;  %v800_v43 = vrot.slane %v426_v54, 1 }
  0x42   : > { %2703 = vrot.lane.b32.xlu0 %v2702_v63, %s3376_s27  ;;  %v3797_v63 = vpack.i.bf16 %v3780_v56, %v3778_v39 }
  0x44   : > { %2718 = vrot.lane.b32.xlu1 %v2717_v14, %s3377_s29 }
  0x46   : > { %2713 = vrot.lane.b32.xlu0 %v2712_v26, %s3377_s29  ;;  %v801_v26 = vsel %vm501_vm0, %v799_v32, %v800_v43  ;;  %v847_v32 = vrot.slane %v3770_v52, 2  ;;  %v848_v43 = vrot.slane %v426_v54, 2 }
  0x48   : > { %2728 = vrot.lane.b32.xlu1 %v2727_v51, %s3377_s29  ;;  %v445_v51 = vld [vmem:[%s3725_s26] ss:$8 sps:$4 sm:$0xff]  }
  0x49   : > { %v465_v60 = vunpack.c.l.bf16 %v445_v51  ;;  %v467_v16 = vunpack.c.h.bf16 %v445_v51 }
  0x4a   : > { %2723 = vrot.lane.b32.xlu0 %v2722_v11, %s3377_s29 }
  0x4b   : > { %v1283_v20 = vrot.slane %v465_v60, 1 }
  0x4c   : > { %2738 = vrot.lane.b32.xlu1 %v2737_v17, %s3378_s8  ;;  %v2812_v17 = vpack.i.bf16 %v3691_v55, %v801_v26  ;;  %v851_v26 = vrot.slane %v428_v25, 2 }
  0x4e   : > { %2733 = vrot.lane.b32.xlu0 %v2732_v18, %s3378_s8 }
  0x50   : > { %2748 = vrot.lane.b32.xlu1 %v2747_v19, %s3378_s8  ;;  %v448_v19 = vld [vmem:[%s3725_s26 + $0xc] sm:$0x1] }
  0x52   : > { %2743 = vrot.lane.b32.xlu0 %v2742_v22, %s3378_s8  ;;  %v449_v22 = vld [vmem:[%s3725_s26 + $0x10] ss:$8 sps:$4 sm:$0xff]  }
  0x53   : > { %v469_v24 = vunpack.c.l.bf16 %v449_v22 }
  0x54   : > { %2758 = vrot.lane.b32.xlu1 %v3522_v31, %s3379_s12  ;;  %v734_v31 = vsel %vm550_vm1, %v732_v2, %v733_v6  ;;  %v1196_v2 = vrot.slane %v467_v16, 7  ;;  %v468_v6 = vunpack.c.l.bf16 %v448_v19 }
  0x55   : > { %v1197_v58 = vrot.slane %v469_v24, 7  ;;  %v1289_v25 = vrot.slane %v469_v24, 1 }
  0x56   : > { %2753 = vrot.lane.b32.xlu0 %v3580_v9, %s3379_s12  ;;  %v2787_v9 = vpack.i.bf16 %v734_v31, %v654_v15  ;;  %v446_v15 = vld [vmem:[%s3725_s26 + $0x4] sm:$0x1]  ;;  %v2842_v51 = vpack.i.bf16 %v468_v6, %v467_v16 }
  0x57   : > { %v466_v0 = vunpack.c.l.bf16 %v446_v15  ;;  %v850_v15 = vrot.slane %v3661_v50, 2  ;;  %v2857_v52 = vpack.i.bf16 %v1197_v58, %v1196_v2 }
  0x58   : > { %2768 = vrot.lane.b32.xlu1 %v2767_v4, %s3379_s12  ;;  %v1195_v4 = vrot.slane %v465_v60, 7 }
  0x59   : > { %v1284_v21 = vrot.slane %v466_v0, 1  ;;  %v2837_v31 = vpack.i.bf16 %v466_v0, %v465_v60  ;;  %v3841_v60 = vsel %vm550_vm1, %v850_v15, %v851_v26 }
  0x5a   : > { %2763 = vrot.lane.b32.xlu0 %v3566_v59, %s3379_s12  ;;  %v413_v59 = vld [vmem:[%s3625_s17 + $0x20] ss:$8 sps:$4 sm:$0xff]   ;;  %v2832_v46 = vpack.i.bf16 %v1196_v2, %v1195_v4  ;;  %v471_v2 = vunpack.c.h.bf16 %v449_v22 }
  0x5b   : > { %v3788_v61 = vunpack.c.l.bf16 %v413_v59  ;;  %v3790_v62 = vunpack.c.h.bf16 %v413_v59  ;;  %v1286_v59 = vrot.slane %v467_v16, 1 }
  0x5c   : > { %2778 = vrot.lane.b32.xlu1 %v3619_v33, %s3380_s13  ;;  %v3776_v33 = vpack.i.bf16 %v3761_v44, %v3658_v49 }
  0x5d   : > { %v3805_v14 = vpack.i.bf16 %v3790_v62, %v3788_v61 }
  0x5e   : > { %2773 = vrot.lane.b32.xlu0 %v3584_v13, %s3380_s13  ;;  %v809_v13 = vrot.slane %v3765_v48, 1 }
  0x60   : > { %2788 = vrot.lane.b32.xlu1 %v2787_v9, %s3380_s13  ;;  %v1285_v9 = vsel %vm501_vm0, %v1283_v20, %v1284_v21  ;;  %v416_v20 = vld [vmem:[%s3625_s17 + $0x2c] sm:$0x1] }
  0x62   : > { %2783 = vrot.lane.b32.xlu0 %v3611_v29, %s3380_s13  ;;  %v3800_v29 = vsel %vm501_vm0, %v808_v57, %v809_v13  ;;  %v1287_v57 = vrot.slane %v468_v6, 1  ;;  %v3855_v6 = vunpack.c.l.bf16 %v416_v20  ;;  %v420_v20 = vld [vmem:[%s3625_s17 + $0x3c] sm:$0x1] }
  0x63   : > { %v2817_v11 = vpack.i.bf16 %v3800_v29, %v3688_v7  ;;  %v2827_v18 = vpack.i.bf16 %v809_v13, %v3800_v29  ;;  %v2847_v13 = vpack.i.bf16 %v1284_v21, %v1285_v9 }
  0x64   : > { %2798 = vrot.lane.b32.xlu1 %v3776_v33, %s3381_s15  ;;  %v1288_v0 = vsel %vm501_vm0, %v1286_v59, %v1287_v57  ;;  %v815_v59 = vrot.slane %v3855_v6, 1 }
  0x65   : > { %v2852_v16 = vpack.i.bf16 %v1287_v57, %v1288_v0  ;;  %v473_v0 = vunpack.c.l.bf16 %v3729_v23 }
  0x66   : > { %2793 = vrot.lane.b32.xlu0 %v2792_v41, %s3381_s15  ;;  %v470_v41 = vunpack.c.l.bf16 %v450_v45  ;;  %v452_v45 = vld [vmem:[%s3725_s26 + $0x1c] sm:$0x1] }
  0x67   : > { %v472_v57 = vunpack.c.l.bf16 %v452_v45 }
  0x68   : > { %2808 = vrot.lane.b32.xlu1 %v3797_v63, %s3381_s15  ;;  %v1290_v54 = vrot.slane %v470_v41, 1  ;;  %v2867_v19 = vpack.i.bf16 %v470_v41, %v469_v24  ;;  %v1198_v24 = vrot.slane %v471_v2, 7 }
  0x6a   : > { %2803 = vrot.lane.b32.xlu0 %v3805_v14, %s3381_s15  ;;  %v1291_v21 = vsel %vm501_vm0, %v1289_v25, %v1290_v54  ;;  %v454_v25 = vld [vmem:[%s3725_s26 + $0x24] sm:$0x1] }
  0x6c   : > { %2818 = vrot.lane.b32.xlu1 %v2817_v11, %s3382_s16  ;;  %v414_v11 = vld [vmem:[%s3625_s17 + $0x24] sm:$0x1] }
  0x6e   : > { %2813 = vrot.lane.b32.xlu0 %v2812_v17, %s3382_s16  ;;  %v3838_v17 = vsel %vm550_vm1, %v847_v32, %v848_v43  ;;  %v1292_v32 = vrot.slane %v471_v2, 1  ;;  %v1293_v43 = vrot.slane %v472_v57, 1 }
  0x70   : > { %2828 = vrot.lane.b32.xlu1 %v2827_v18, %s3373_s10  ;;  %v3846_v18 = vunpack.c.l.bf16 %v414_v11  ;;  %v1294_v26 = vsel %vm501_vm0, %v1292_v32, %v1293_v43 }
  0x72   : > { %2823 = vrot.lane.b32.xlu0 %v2822_v30, %s3373_s10  ;;  %v811_v30 = vrot.slane %v3788_v61, 1  ;;  %v812_v4 = vrot.slane %v3846_v18, 1 }
  0x74   : > { %2838 = vrot.lane.b32.xlu1 %v2837_v31, %s3375_s25  ;;  %v2877_v31 = vpack.i.bf16 %v1290_v54, %v1291_v21  ;;  %v3859_v9 = vsel %vm501_vm0, %v811_v30, %v812_v4  ;;  %v474_v21 = vunpack.c.l.bf16 %v454_v25 }
  0x75   : > { %v2887_v22 = vpack.i.bf16 %v812_v4, %v3859_v9  ;;  %v418_v4 = vld [vmem:[%s3625_s17 + $0x34] sm:$0x1] }
  0x76   : > { %2833 = vrot.lane.b32.xlu0 %v2832_v46, %s3374_s14  ;;  %v814_v46 = vrot.slane %v3790_v62, 1 }
  0x78   : > { %2848 = vrot.lane.b32.xlu1 %v2847_v13, %s3376_s27  ;;  %v2882_v13 = vpack.i.bf16 %v1198_v24, %v1197_v58  ;;  %v3869_v41 = vsel %vm501_vm0, %v814_v46, %v815_v59  ;;  %v2902_v58 = vpack.i.bf16 %v472_v57, %v471_v2  ;;  %v3896_v2 = vunpack.c.l.bf16 %v420_v20  ;;  %v456_v20 = vld [vmem:[%s3725_s26 + $0x2c] sm:$0x1] }
  0x79   : > { %v2892_v15 = vpack.i.bf16 %v815_v59, %v3869_v41  ;;  %v1295_v46 = vrot.slane %v473_v0, 1  ;;  %v1296_v59 = vrot.slane %v474_v21, 1  ;;  %v820_v57 = vrot.slane %v3780_v56, 1 }
  0x7a   : > { %2843 = vrot.lane.b32.xlu0 %v2842_v51, %s3375_s25 }
  0x7c   : > { %2858 = vrot.lane.b32.xlu1 %v2857_v52, %s3377_s29 }
  0x7e   : > { %2853 = vrot.lane.b32.xlu0 %v2852_v16, %s3376_s27 }
  0x80   : > { %2868 = vrot.lane.b32.xlu1 %v2867_v19, %s3378_s8 }
  0x82   : > { %2863 = vrot.lane.b32.xlu0 %v2842_v51, %s3378_s8  ;;  %v2917_v51 = vpack.i.bf16 %v1293_v43, %v1294_v26  ;;  %v817_v43 = vrot.slane %v3778_v39, 1 }
  0x84   : > { %2878 = vrot.lane.b32.xlu1 %v2877_v31, %s3379_s12 }
  0x86   : > { %2873 = vrot.lane.b32.xlu0 %v2852_v16, %s3379_s12  ;;  %v1199_v16 = vrot.slane %v473_v0, 7 }
  0x88   : > { %2888 = vrot.lane.b32.xlu1 %v2887_v22, %s3373_s10  ;;  %v2942_v45 = vpack.i.bf16 %v1199_v16, %v1198_v24  ;;  %v1297_v24 = vsel %vm501_vm0, %v1295_v46, %v1296_v59  ;;  %v476_v46 = vunpack.c.l.bf16 %v456_v20 }
  0x8a   : > { %2883 = vrot.lane.b32.xlu0 %v2882_v13, %s3380_s13 }
  0x8c   : > { %2898 = vrot.lane.b32.xlu1 %v2867_v19, %s3381_s15 }
  0x8e   : > { %2893 = vrot.lane.b32.xlu0 %v2892_v15, %s3373_s10 }
  0x90   : > { %2908 = vrot.lane.b32.xlu1 %v2882_v13, %s3374_s14  ;;  %v821_v13 = vrot.slane %v3896_v2, 1 }
  0x92   : > { %2903 = vrot.lane.b32.xlu0 %v2902_v58, %s3381_s15  ;;  %v3920_v25 = vsel %vm501_vm0, %v820_v57, %v821_v13 }
  0x94   : > { %2918 = vrot.lane.b32.xlu1 %v2917_v51, %s3382_s16  ;;  %v3880_v11 = vpop.permute.xlu1 %2643 }
  0x95   : > { %5026 = vst [vmem:[#allocation8_spill] sm:$0xff] %v3880_v11 }
  0x96   : > { %2913 = vrot.lane.b32.xlu0 %v2877_v31, %s3382_s16 }
  0x98   : > { %v3884_v52 = vpop.permute.xlu0 %2633  ;;  %2928 = vrot.lane.b32.xlu1 %v2902_v58, %s3375_s25 }
  0x9a   : > { %2923 = vrot.lane.b32.xlu0 %v2867_v19, %s3375_s25  ;;  %v3889_v54 = vpop.permute.xlu1 %2648  ;;  %v3901_v19 = vunpack.c.l.bf16 %v418_v4 }
  0x9b   : > { %5027 = vst [vmem:[#allocation9_spill] sm:$0xff] %v3889_v54 }
  0x9c   : > { %v3892_v30 = vpop.permute.xlu0 %2638  ;;  %2938 = vrot.lane.b32.xlu1 %v2917_v51, %s3376_s27  ;;  %v818_v15 = vrot.slane %v3901_v19, 1 }
  0x9d   : > { %5028 = vst [vmem:[#allocation10_spill] sm:$0xff] %v3892_v30  ;;  %v3319_v30 = vld [vmem:[%s4973_s3 + $0x18] sm:$0xff]  }
  0x9e   : > { %2933 = vrot.lane.b32.xlu0 %v2877_v31, %s3376_s27  ;;  %v3899_v23 = vpop.permute.xlu1 %2658  ;;  %v2952_v31 = vpack.i.bf16 %v474_v21, %v473_v0  ;;  %v2962_v21 = vpack.i.bf16 %v1296_v59, %v1297_v24  ;;  %v3927_v4 = vsel %vm501_vm0, %v817_v43, %v818_v15  ;;  %v2987_v59 = vpack.i.bf16 %v476_v46, %v3735_v1 }
  0x9f   : > { %5029 = vst [vmem:[#allocation11_spill] sm:$0xff] %v3899_v23  ;;  %v1299_v43 = vrot.slane %v476_v46, 1 }
  0xa0   : > { %v3903_v22 = vpop.permute.xlu0 %2653  ;;  %2948 = vrot.lane.b32.xlu1 %v2902_v58, %s3378_s8  ;;  %v2967_v58 = vpack.i.bf16 %v1200_v36, %v1199_v16  ;;  %v2972_v16 = vpack.i.bf16 %v818_v15, %v3927_v4 }
  0xa2   : > { %2943 = vrot.lane.b32.xlu0 %v2942_v45, %s3377_s29  ;;  %v3909_v32 = vpop.permute.xlu1 %2673 }
  0xa3   : > { %5030 = vst [vmem:[#allocation12_spill] sm:$0xff] %v3909_v32 }
  0xa4   : > { %v3914_v26 = vpop.permute.xlu0 %2663  ;;  %2958 = vrot.lane.b32.xlu1 %v2917_v51, %s3379_s12  ;;  %v2977_v51 = vpack.i.bf16 %v821_v13, %v3920_v25  ;;  %v1298_v13 = vrot.slane %v3735_v1, 1 }
  0xa5   : > { %5031 = vst [vmem:[#allocation13_spill] sm:$0xff] %v3914_v26 }
  0xa6   : > { %2953 = vrot.lane.b32.xlu0 %v2952_v31, %s3378_s8  ;;  %v3924_v0 = vpop.permute.xlu1 %2678 }
  0xa7   : > { %5032 = vst [vmem:[#allocation14_spill] sm:$0xff] %v3924_v0 }
  0xa8   : > { %v3929_v45 = vpop.permute.xlu0 %2668  ;;  %2968 = vrot.lane.b32.xlu1 %v2967_v58, %s3380_s13 }
  0xaa   : > { %2963 = vrot.lane.b32.xlu0 %v2962_v21, %s3379_s12  ;;  %v3934_v36 = vpop.permute.xlu1 %2688 }
  0xab   : > { %5033 = vst [vmem:[#allocation15_spill] sm:$0xff] %v3934_v36  ;;  %v3967_v36 = vld [vmem:[%s3625_s17 + $0x4c] sm:$0x1] }
  0xac   : > { %v3937_v57 = vpop.permute.xlu0 %2683  ;;  %2978 = vrot.lane.b32.xlu1 %v2977_v51, %s3373_s10  ;;  %v1300_v51 = vsel %vm501_vm0, %v1298_v13, %v1299_v43  ;;  %v423_v13 = vld [vmem:[%s3625_s17 + $0x40] ss:$8 sps:$4 sm:$0xff]  }
  0xad   : > { %5034 = vst [vmem:[#allocation16_spill] sm:$0xff] %v3937_v57  ;;  %v3002_v46 = vpack.i.bf16 %v1299_v43, %v1300_v51  ;;  %v1301_v43 = vrot.slane %v3741_v35, 1  ;;  %v3974_v38 = vunpack.c.h.bf16 %v423_v13 }
  0xae   : > { %2973 = vrot.lane.b32.xlu0 %v2972_v16, %s3373_s10  ;;  %v3942_v24 = vpop.permute.xlu1 %2698  ;;  %v458_v16 = vld [vmem:[%s3725_s26 + $0x34] sm:$0x1] }
  0xaf   : > { %5035 = vst [vmem:[#allocation17_spill] sm:$0xff] %v3942_v24  ;;  %v478_v37 = vunpack.c.l.bf16 %v458_v16 }
  0xb0   : > { %v3945_v20 = vpop.permute.xlu0 %2693  ;;  %2988 = vrot.lane.b32.xlu1 %v2987_v59, %s3381_s15 }
  0xb1   : > { %v1302_v51 = vrot.slane %v478_v37, 1 }
  0xb2   : > { %2983 = vrot.lane.b32.xlu0 %v2952_v31, %s3381_s15  ;;  %v3949_v15 = vpop.permute.xlu1 %2708 }
  0xb3   : > { %5036 = vst [vmem:[#allocation18_spill] sm:$0xff] %v3949_v15 }
  0xb4   : > { %v3952_v8 = vpop.permute.xlu0 %2703  ;;  %2998 = vrot.lane.b32.xlu1 %v2962_v21, %s3382_s16 }
  0xb5   : > { %5037 = vst [vmem:[#allocation19_spill] sm:$0xff] %v3952_v8  ;;  %v1136_v8 = vrot.slane %v3974_v38, 1 }
  0xb6   : > { %2993 = vrot.lane.b32.xlu0 %v2967_v58, %s3374_s14  ;;  %v3956_v1 = vpop.permute.xlu1 %2718  ;;  %v422_v58 = vld [vmem:[%s3625_s17 + $0x44] sm:$0x1] }
  0xb7   : > { %5038 = vst [vmem:[#allocation20_spill] sm:$0xff] %v3956_v1  ;;  %v3982_v32 = vunpack.c.l.bf16 %v422_v58 }
  0xb8   : > { %v3959_v47 = vpop.permute.xlu0 %2713  ;;  %3008 = vrot.lane.b32.xlu1 %v2952_v31, %s3375_s25  ;;  %v4989_v31 = vunpack.c.l.bf16 %v3967_v36 }
  0xb9   : > { %v922_v5 = vrot.slane %v3982_v32, 1 }
  0xba   : > { %3003 = vrot.lane.b32.xlu0 %v3002_v46, %s3382_s16  ;;  %v3963_v15 = vpop.permute.xlu1 %2728  ;;  %v1137_v3 = vrot.slane %v4989_v31, 1 }
  0xbb   : > { %5039 = vst [vmem:[#allocation21_spill] sm:$0xff] %v3963_v15  ;;  %v3980_v15 = vunpack.c.l.bf16 %v423_v13 }
  0xbc   : > { %v3969_v34 = vpop.permute.xlu0 %2723  ;;  %3018 = vrot.lane.b32.xlu1 %v2962_v21, %s3376_s27  ;;  %v3037_v21 = vpack.i.bf16 %v478_v37, %v3741_v35 }
  0xbd   : > { %5040 = vst [vmem:[#allocation22_spill] sm:$0xff] %v3969_v34  ;;  %v1303_v34 = vsel %vm501_vm0, %v1301_v43, %v1302_v51  ;;  %v921_v58 = vrot.slane %v3980_v15, 1  ;;  %v1138_v43 = vsel %vm501_vm0, %v1136_v8, %v1137_v3 }
  0xbe   : > { %3013 = vrot.lane.b32.xlu0 %v2987_v59, %s3375_s25  ;;  %v3978_v16 = vpop.permute.xlu1 %2738  ;;  %v3047_v37 = vpack.i.bf16 %v1302_v51, %v1303_v34  ;;  %v3057_v11 = vpack.i.bf16 %v1137_v3, %v1138_v43 }
  0xbf   : > { %5041 = vst [vmem:[#allocation23_spill] sm:$0xff] %v3978_v16  ;;  %v4007_v26 = vsel %vm501_vm0, %v921_v58, %v922_v5  ;;  %v460_v16 = vld [vmem:[%s3725_s26 + $0x3c] sm:$0x1] }
  0xc0   : > { %v3984_v54 = vpop.permute.xlu0 %2733  ;;  %3028 = vrot.lane.b32.xlu1 %v3753_v40, %s3377_s29  ;;  %v479_v40 = vunpack.c.h.bf16 %v3732_v28  ;;  %v3052_v8 = vpack.i.bf16 %v922_v5, %v4007_v26  ;;  %v480_v58 = vunpack.c.l.bf16 %v460_v16 }
  0xc2   : > { %3023 = vrot.lane.b32.xlu0 %v3002_v46, %s3376_s27  ;;  %v3994_v13 = vpop.permute.xlu1 %2748  ;;  %v1305_v5 = vrot.slane %v480_v58, 1 }
  0xc3   : > { %5042 = vst [vmem:[#allocation24_spill] sm:$0xff] %v3994_v13 }
  0xc4   : > { %v3998_v57 = vpop.permute.xlu0 %2743  ;;  %3038 = vrot.lane.b32.xlu1 %v3037_v21, %s3378_s8 }
  0xc5   : > { %5043 = vst [vmem:[#allocation25_spill] sm:$0xff] %v3998_v57  ;;  %v1202_v57 = vrot.slane %v479_v40, 7 }
  0xc6   : > { %3033 = vrot.lane.b32.xlu0 %v2987_v59, %s3378_s8  ;;  %v4004_v31 = vpop.permute.xlu1 %2758  ;;  %v5048_v59 = vrot.slane %v3741_v35, 7 }
  0xc7   : > { %5044 = vst [vmem:[#allocation26_spill] sm:$0xff] %v4004_v31 }
  0xc8   : > { %v4009_v13 = vpop.permute.xlu0 %2753  ;;  %3048 = vrot.lane.b32.xlu1 %v3047_v37, %s3379_s12  ;;  %v3067_v51 = vpack.i.bf16 %v1202_v57, %v5048_v59  ;;  %v461_v59 = vld [vmem:[%s3725_s26 + $0x40] ss:$8 sps:$4 sm:$0xff]  }
  0xc9   : > { %5045 = vst [vmem:[#allocation27_spill] sm:$0xff] %v4009_v13 }
  0xca   : > { %3043 = vrot.lane.b32.xlu0 %v3002_v46, %s3379_s12  ;;  %v4014_v34 = vpop.permute.xlu1 %2768  ;;  %v3077_v46 = vpack.i.bf16 %v480_v58, %v479_v40  ;;  %v481_v58 = vunpack.c.l.bf16 %v461_v59 }
  0xcb   : > { %5046 = vst [vmem:[#allocation28_spill] sm:$0xff] %v4014_v34  ;;  %v1304_v34 = vrot.slane %v479_v40, 1 }
  0xcc   : > { %v4017_v28 = vpop.permute.xlu0 %2763  ;;  %3058 = vrot.lane.b32.xlu1 %v3057_v11, %s3373_s10 }
  0xcd   : > { %5047 = vst [vmem:[#allocation29_spill] sm:$0xff] %v4017_v28  ;;  %v1306_v16 = vsel %vm501_vm0, %v1304_v34, %v1305_v5  ;;  %v462_v34 = vld [vmem:[%s3725_s26 + $0x44] sm:$0x1] }
  0xce   : > { %3053 = vrot.lane.b32.xlu0 %v3052_v8, %s3373_s10  ;;  %v4023_v3 = vpop.permute.xlu1 %2778  ;;  %v3097_v40 = vpack.i.bf16 %v1305_v5, %v1306_v16  ;;  %s3384_s10 = smov 4  }
  0xcf   : > { %5049 = vst [vmem:[#allocation30_spill] sm:$0xff] %v4023_v3  ;;  %v482_v3 = vunpack.c.l.bf16 %v462_v34 }
  0xd0   : > { %v4025_v43 = vpop.permute.xlu0 %2773  ;;  %3068 = vrot.lane.b32.xlu1 %v3067_v51, %s3374_s14 }
  0xd1   : > { %5050 = vst [vmem:[#allocation31_spill] sm:$0xff] %v4025_v43  ;;  %v1431_v1 = vrot.slane %v482_v3, 1  ;;  %v3122_v24 = vpack.i.bf16 %v482_v3, %v481_v58  ;;  %v3313_v3 = vld [vmem:[%s4973_s3] sm:$0xff]  }
  0xd2   : > { %3063 = vrot.lane.b32.xlu0 %v3067_v51, %s3380_s13  ;;  %v4029_v11 = vpop.permute.xlu1 %2788 }
  0xd3   : > { %5051 = vst [vmem:[#allocation32_spill] sm:$0xff] %v4029_v11 }
  0xd4   : > { %v4031_v35 = vpop.permute.xlu0 %2783  ;;  %3078 = vrot.lane.b32.xlu1 %v3077_v46, %s3381_s15 }
  0xd5   : > { %5052 = vst [vmem:[#allocation33_spill] sm:$0xff] %v4031_v35 }
  0xd6   : > { %3073 = vrot.lane.b32.xlu0 %v3037_v21, %s3381_s15  ;;  %v4036_v8 = vpop.permute.xlu1 %2798 }
  0xd7   : > { %5053 = vst [vmem:[#allocation34_spill] sm:$0xff] %v4036_v8  ;;  %v1356_v8 = vrot.slane %v481_v58, 7 }
  0xd8   : > { %v4039_v28 = vpop.permute.xlu0 %2793  ;;  %3088 = vrot.lane.b32.xlu1 %v3077_v46, %s3375_s25 }
  0xd9   : > { %5054 = vst [vmem:[#allocation35_spill] sm:$0xff] %v4039_v28  ;;  %v3112_v16 = vpack.i.bf16 %v1356_v8, %v1202_v57 }
  0xda   : > { %3083 = vrot.lane.b32.xlu0 %v3037_v21, %s3375_s25  ;;  %v4043_v51 = vpop.permute.xlu1 %2808  ;;  %v483_v21 = vunpack.c.h.bf16 %v461_v59 }
  0xdb   : > { %5055 = vst [vmem:[#allocation36_spill] sm:$0xff] %v4043_v51  ;;  %v464_v51 = vld [vmem:[%s3725_s26 + $0x4c] sm:$0x1] }
  0xdc   : > { %v4045_v11 = vpop.permute.xlu0 %2803  ;;  %3098 = vrot.lane.b32.xlu1 %v3097_v40, %s3382_s16  ;;  %v484_v42 = vunpack.c.l.bf16 %v464_v51  ;;  %v1556_v0 = vrot.slane %v483_v21, 1 }
  0xdd   : > { %5056 = vst [vmem:[#allocation37_spill] sm:$0xff] %v4045_v11  ;;  %v1430_v11 = vrot.slane %v481_v58, 1  ;;  %v3315_v58 = vld [vmem:[%s4973_s3 + $0x8] sm:$0xff]  }
  0xde   : > { %3093 = vrot.lane.b32.xlu0 %v3047_v37, %s3382_s16  ;;  %v4050_v35 = vpop.permute.xlu1 %2818  ;;  %v1557_v23 = vrot.slane %v484_v42, 1 }
  0xdf   : > { %5057 = vst [vmem:[#allocation38_spill] sm:$0xff] %v4050_v35  ;;  %v1482_v35 = vrot.slane %v483_v21, 7  ;;  %v1432_v59 = vsel %vm501_vm0, %v1430_v11, %v1431_v1 }
  0xe0   : > { %v4052_v31 = vpop.permute.xlu0 %2813  ;;  %3108 = vrot.lane.b32.xlu1 %v3097_v40, %s3376_s27 }
  0xe1   : > { %5058 = vst [vmem:[#allocation39_spill] sm:$0xff] %v4052_v31  ;;  %v3137_v57 = vpack.i.bf16 %v1482_v35, %v1356_v8  ;;  %v3147_v35 = vpack.i.bf16 %v484_v42, %v483_v21  ;;  %v1558_v8 = vsel %vm501_vm0, %v1556_v0, %v1557_v23  ;;  %v853_v0 = vrot.slane %v3658_v49, 2 }
  0xe2   : > { %3103 = vrot.lane.b32.xlu0 %v3047_v37, %s3376_s27  ;;  %v4056_v5 = vpop.permute.xlu1 %2828  ;;  %v3157_v42 = vpack.i.bf16 %v1557_v23, %v1558_v8  ;;  %v854_v21 = vrot.slane %v3666_v53, 2  ;;  %v3317_v23 = vld [vmem:[%s4973_s3 + $0x10] sm:$0xff]  }
  0xe3   : > { %v2831_v28 = vunpack.i.h.bf16 %v4056_v5 }
  0xe4   : > { %v4059_v12 = vpop.permute.xlu0 %2823  ;;  %3118 = vrot.lane.b32.xlu1 %v3077_v46, %s3378_s8  ;;  %v3312_v46 = vld [vmem:[%s4973_s3 + $0x40] sm:$0xff]   ;;  %v4113_v8 = vsel %vm550_vm1, %v853_v0, %v854_v21  ;;  %v2830_v0 = vunpack.i.l.bf16 %v4056_v5 }
  0xe5   : > { %2504 = vmatprep.subr.bf16.mxu0 %v3312_v46  ;;  %v856_v46 = vrot.slane %v3761_v44, 2  ;;  %v2826_v21 = vunpack.i.h.bf16 %v4059_v12 }
  0xe6   : > { %3113 = vrot.lane.b32.xlu0 %v3112_v16, %s3377_s29  ;;  %v4063_v34 = vpop.permute.xlu1 %2838  ;;  %v3132_v16 = vpack.i.bf16 %v1431_v1, %v1432_v59  ;;  %2505 = vmatpush3.bf16.msra.mxu0 %v3313_v3  ;;  %v857_v3 = vrot.slane %v3765_v48, 2  ;;  %s3388_s29 = smov 64  }
  0xe7   : > { %v2840_v31 = vunpack.i.l.bf16 %v4063_v34 }
  0xe8   : > { %v4066_v37 = vpop.permute.xlu0 %2833  ;;  %3128 = vrot.lane.b32.xlu1 %v3097_v40, %s3379_s12  ;;  %v3314_v40 = vld [vmem:[%s4973_s3 + $0x48] sm:$0xff]  }
  0xe9   : > { %2506 = vmatprep.subr.bf16.mxu0 %v3314_v40  ;;  %v3316_v40 = vld [vmem:[%s4973_s3 + $0x50] sm:$0xff]   ;;  %v2835_v5 = vunpack.i.l.bf16 %v4066_v37 }
  0xea   : > { %3123 = vrot.lane.b32.xlu0 %v3122_v24, %s3378_s8  ;;  %v4073_v51 = vpop.permute.xlu1 %2848  ;;  %2507 = vmatpush3.bf16.msra.mxu0 %v3315_v58  ;;  %v3318_v58 = vld [vmem:[%s4973_s3 + $0x58] sm:$0xff]  }
  0xeb   : > { %2508 = vmatprep.subr.bf16.mxu0 %v3316_v40  ;;  %v2825_v40 = vunpack.i.l.bf16 %v4059_v12  ;;  %v1610_v12 = vsel %vm1000_vm2, %v3765_v48, %v2831_v28  ;;  %v1609_v48 = vsel %vm1000_vm2, %v3761_v44, %v2830_v0  ;;  %v1608_v28 = vsel %vm1000_vm2, %v3666_v53, %v2826_v21 }
  0xec   : > { %v4078_v11 = vpop.permute.xlu0 %2843  ;;  %3138 = vrot.lane.b32.xlu1 %v3137_v57, %s3380_s13  ;;  %s3387_s13 = smov 52  }
  0xee   : > { %3133 = vrot.lane.b32.xlu0 %v3132_v16, %s3379_s12  ;;  %v4086_v1 = vpop.permute.xlu1 %2858  ;;  %2509 = vmatpush3.bf16.msra.mxu0 %v3317_v23 }
  0xef   : > { %2510 = vmatprep.subr.bf16.mxu0 %v3318_v58  ;;  %v2845_v58 = vunpack.i.l.bf16 %v4078_v11 }
  0xf0   : > { %v4091_v59 = vpop.permute.xlu0 %2853  ;;  %3148 = vrot.lane.b32.xlu1 %v3147_v35, %s3381_s15 }
  0xf1   : > { %v2856_v0 = vunpack.i.h.bf16 %v4091_v59 }
  0xf2   : > { %3143 = vrot.lane.b32.xlu0 %v3122_v24, %s3381_s15  ;;  %v4097_v57 = vpop.permute.xlu1 %2868  ;;  %v3167_v24 = vpack.i.bf16 %v3658_v49, %v3661_v50  ;;  %v4126_v50 = vsel %vm550_vm1, %v856_v46, %v857_v3  ;;  %s3383_s15 = smov 16   ;;  %v2836_v46 = vunpack.i.h.bf16 %v4066_v37  ;;  %2511 = vmatpush3.bf16.msra.mxu0 %v3319_v30  ;;  %v3320_v30 = vld [vmem:[%s4973_s3 + $0x60] sm:$0xff]   ;;  %v2846_v3 = vunpack.i.h.bf16 %v4078_v11 }
  0xf3   : > { %v2841_v37 = vunpack.i.h.bf16 %v4063_v34  ;;  %2512 = vmatprep.subr.bf16.mxu0 %v3320_v30  ;;  %v3322_v34 = vld [vmem:[%s4973_s3 + $0x68] sm:$0xff]  }
  0xf4   : > { %v4107_v35 = vpop.permute.xlu0 %2863  ;;  %3158 = vrot.lane.b32.xlu1 %v3157_v42, %s3382_s16  ;;  %v1625_v53 = vsel %vm1009_vm3, %v1609_v48, %v2836_v46  ;;  %v1626_v11 = vsel %vm1009_vm3, %v1610_v12, %v2836_v46  ;;  %v2861_v46 = vunpack.i.h.bf16 %v4086_v1 }
  0xf5   : > { %v1641_v30 = vsel %vm1018_vm4, %v1625_v53, %v2845_v58  ;;  %v1642_v48 = vsel %vm1018_vm4, %v1626_v11, %v2846_v3  ;;  %v2871_v53 = vunpack.i.h.bf16 %v4097_v57 }
  0xf6   : > { %3153 = vrot.lane.b32.xlu0 %v3132_v16, %s3382_s16  ;;  %v4123_v42 = vpop.permute.xlu1 %2878  ;;  %v3177_v16 = vpack.i.bf16 %v4113_v8, %v3841_v60 }
  0xf7   : > { %v2880_v11 = vunpack.i.l.bf16 %v4123_v42 }
  0xf8   : > { %v4131_v23 = vpop.permute.xlu0 %2873  ;;  %3168 = vrot.lane.b32.xlu1 %v3167_v24, %s3383_s15  ;;  %v5059_v24 = vpack.i.bf16 %v3841_v60, %v3838_v17  ;;  %v2855_v17 = vunpack.i.l.bf16 %v4091_v59  ;;  %v3321_v60 = vld [vmem:[%s4973_s3 + $0x20] sm:$0xff]   ;;  %v3323_v59 = vld [vmem:[%s4973_s3 + $0x28] sm:$0xff]  }
  0xf9   : > { %2513 = vmatpush3.bf16.msra.mxu0 %v3321_v60 }
  0xfa   : > { %3163 = vrot.lane.b32.xlu0 %v5059_v24, %s3384_s10  ;;  %v4147_v43 = vpop.permute.xlu1 %2888  ;;  %v1607_v24 = vsel %vm1000_vm2, %v3658_v49, %v2825_v40  ;;  %v1624_v49 = vsel %vm1009_vm3, %v1608_v28, %v2835_v5  ;;  %v2851_v40 = vunpack.i.h.bf16 %v4073_v51  ;;  %v2860_v28 = vunpack.i.l.bf16 %v4086_v1  ;;  %2514 = vmatprep.subr.bf16.mxu0 %v3322_v34 }
  0xfb   : > { %v1623_v21 = vsel %vm1009_vm3, %v1607_v24, %v2835_v5  ;;  %v5060_v5 = vpack.i.bf16 %v3688_v7, %v3691_v55  ;;  %v1657_v60 = vsel %vm1027_vm5, %v1641_v30, %v2855_v17  ;;  %v1658_v24 = vsel %vm1027_vm5, %v1642_v48, %v2856_v0 }
  0xfc   : > { %v4168_v13 = vpop.permute.xlu0 %2883  ;;  %3178 = vrot.lane.b32.xlu1 %v3177_v16, %s3385_s28  ;;  %v2850_v16 = vunpack.i.l.bf16 %v4073_v51  ;;  %v2870_v51 = vunpack.i.l.bf16 %v4097_v57  ;;  %v1639_v58 = vsel %vm1018_vm4, %v1623_v21, %v2840_v31  ;;  %v2865_v7 = vunpack.i.l.bf16 %v4107_v35  ;;  %v3324_v31 = vld [vmem:[%s4973_s3 + $0x70] sm:$0xff]  }
  0xfd   : > { %v1640_v3 = vsel %vm1018_vm4, %v1624_v49, %v2841_v37  ;;  %v2866_v1 = vunpack.i.h.bf16 %v4107_v35  ;;  %v2881_v17 = vunpack.i.h.bf16 %v4123_v42  ;;  %2515 = vmatpush3.bf16.msra.mxu0 %v3323_v59  ;;  %v3325_v57 = vld [vmem:[%s4973_s3 + $0x30] sm:$0xff]   ;;  %v1673_v37 = vsel %vm1036_vm6, %v1657_v60, %v2861_v46 }
  0xfe   : > { %3173 = vrot.lane.b32.xlu0 %v5060_v5, %s3386_s7  ;;  %v4189_v12 = vpop.permute.xlu1 %2898  ;;  %v1655_v0 = vsel %vm1027_vm5, %v1639_v58, %v2850_v16  ;;  %v1656_v21 = vsel %vm1027_vm5, %v1640_v3, %v2851_v40  ;;  %v2886_v35 = vunpack.i.h.bf16 %v4168_v13  ;;  %v1674_v59 = vsel %vm1036_vm6, %v1658_v24, %v2861_v46  ;;  %2516 = vmatprep.subr.bf16.mxu0 %v3324_v31  ;;  %v3327_v24 = vld [vmem:[%s4973_s3 + $0x38] sm:$0xff]  }
  0xff   : > { %v1671_v49 = vsel %vm1036_vm6, %v1655_v0, %v2860_v28  ;;  %v1672_v34 = vsel %vm1036_vm6, %v1656_v21, %v2860_v28  ;;  %v1689_v16 = vsel %vm5018_vm7, %v1673_v37, %v2870_v51  ;;  %v1690_v40 = vsel %vm5018_vm7, %v1674_v59, %v2871_v53  ;;  %v3326_v51 = vld [vmem:[%s4973_s3 + $0x78] sm:$0xff]  }
 0x100   : > { %v4199_v55 = vpop.permute.xlu0 %2893  ;;  %v1687_v30 = vsel %vm5018_vm7, %v1671_v49, %v2865_v7  ;;  %v2876_v5 = vunpack.i.h.bf16 %v4131_v23  ;;  %v2875_v48 = vunpack.i.l.bf16 %v4131_v23  ;;  %v1688_v60 = vsel %vm5018_vm7, %v1672_v34, %v2866_v1 }
 0x101   : > { %v1705_v58 = vsel %vm5017_vm8, %v1689_v16, %v2880_v11  ;;  %v1706_v28 = vsel %vm5017_vm8, %v1690_v40, %v2881_v17  ;;  %v2885_v46 = vunpack.i.l.bf16 %v4168_v13  ;;  %2517 = vmatpush3.bf16.msra.mxu0 %v3325_v57  ;;  %v5061_v1 = vpack.i.bf16 %v4126_v50, %v4113_v8 }
 0x102   : > { %3183 = vrot.lane.b32.xlu0 %v3776_v33, %s3387_s13  ;;  %v4217_v42 = vpop.permute.xlu1 %2908  ;;  %v1721_v23 = vsel %vm1063_vm9, %v1705_v58, %v2886_v35  ;;  %v1722_v53 = vsel %vm1063_vm9, %v1706_v28, %v2886_v35  ;;  %v2901_v17 = vunpack.i.h.bf16 %v4189_v12  ;;  %v2900_v11 = vunpack.i.l.bf16 %v4189_v12  ;;  %2518 = vmatprep.subr.bf16.mxu0 %v3326_v51 }
 0x103   : > { %v1703_v0 = vsel %vm5017_vm8, %v1687_v30, %v2875_v48  ;;  %v1704_v21 = vsel %vm5017_vm8, %v1688_v60, %v2876_v5  ;;  %v5062_v48 = vpack.i.bf16 %v3859_v9, %v3800_v29 }
 0x104   : > { %v2904_v33 = vpop.permute.xlu0 %2903  ;;  %v1719_v49 = vsel %vm1063_vm9, %v1703_v0, %v2885_v46  ;;  %v1720_v34 = vsel %vm1063_vm9, %v1704_v21, %v2885_v46  ;;  %v866_v0 = vrot.slane %v3901_v19, 2 }
 0x105   : > { %v2906_v7 = vunpack.i.h.bf16 %v2904_v33  ;;  %v2905_v3 = vunpack.i.l.bf16 %v2904_v33  ;;  %2519 = vmatpush3.bf16.msra.mxu0 %v3327_v24  ;;  %v1735_v60 = vsel %vm1072_vm10, %v1719_v49, %v2900_v11  ;;  %v1736_v58 = vsel %vm1072_vm10, %v1720_v34, %v2901_v17 }
 0x106   : > { %3193 = vrot.lane.b32.xlu0 %v5061_v1, %s3384_s10  ;;  %v4243_v13 = vpop.permute.xlu1 %2918  ;;  %v860_v17 = vrot.slane %v3846_v18, 2  ;;  %v865_v11 = vrot.slane %v3778_v39, 2  ;;  %v3197_v49 = vpack.i.bf16 %v3788_v61, %v3761_v44  ;;  %v3232_v34 = vpack.i.bf16 %v3778_v39, %v3790_v62 }
 0x107   : > { %v2921_v31 = vunpack.i.h.bf16 %v4243_v13  ;;  %v2920_v57 = vunpack.i.l.bf16 %v4243_v13  ;;  %v1737_v37 = vsel %vm1072_vm10, %v1721_v23, %v2905_v3  ;;  %v1738_v8 = vsel %vm1072_vm10, %v1722_v53, %v2906_v7 }
 0x108   : > { %v4253_v35 = vpop.permute.xlu0 %2913  ;;  %v3222_v7 = vpack.i.bf16 %v3869_v41, %v3859_v9  ;;  %v859_v3 = vrot.slane %v3788_v61, 2  ;;  %v3237_v13 = vpack.i.bf16 %v3927_v4, %v3869_v41 }
 0x109   : > { %v1753_v12 = vsel %vm5016_vm11, %v1737_v37, %v2920_v57  ;;  %v1754_v59 = vsel %vm5016_vm11, %v1738_v8, %v2921_v31  ;;  %v2916_v30 = vunpack.i.h.bf16 %v4253_v35  ;;  %v2915_v5 = vunpack.i.l.bf16 %v4253_v35 }
 0x10a   : > { %v1789_v16 = vrot.slane %v1753_v12, 1  ;;  %v1790_v40 = vrot.slane %v1754_v59, 1  ;;  %3203 = vrot.lane.b32.xlu0 %v5062_v48, %s3386_s7  ;;  %v4269_v33 = vpop.permute.xlu1 %2928  ;;  %v863_v8 = vrot.slane %v3855_v6, 2  ;;  %v4304_v12 = vsel %vm550_vm1, %v859_v3, %v860_v17 }
 0x10b   : > { %v1751_v28 = vsel %vm5016_vm11, %v1735_v60, %v2915_v5  ;;  %v1752_v46 = vsel %vm5016_vm11, %v1736_v58, %v2916_v30  ;;  %v4307_v59 = vsel %vm550_vm1, %v865_v11, %v866_v0  ;;  %v3207_v44 = vpack.i.bf16 %v4304_v12, %v4126_v50 }
 0x10c   : > { %v4279_v51 = vpop.permute.xlu0 %2923  ;;  %v1783_v24 = vrot.slane %v1751_v28, 1  ;;  %v1784_v23 = vrot.slane %v1752_v46, 1  ;;  %v1791_v53 = vsel %vm501_vm0, %v1789_v16, %v1790_v40  ;;  %v2891_v28 = vunpack.i.h.bf16 %v4147_v43 }
 0x10d   : > { %v2890_v46 = vunpack.i.l.bf16 %v4147_v43  ;;  %v2895_v50 = vunpack.i.l.bf16 %v4199_v55  ;;  %v2930_v17 = vunpack.i.l.bf16 %v4269_v33  ;;  %v2925_v11 = vunpack.i.l.bf16 %v4279_v51 }
 0x10e   : > { %3213 = vrot.lane.b32.xlu0 %v3805_v14, %s3387_s13  ;;  %v4283_v29 = vpop.permute.xlu1 %2938  ;;  %v1785_v1 = vsel %vm501_vm0, %v1783_v24, %v1784_v23  ;;  %v862_v14 = vrot.slane %v3790_v62, 2  ;;  %v2896_v24 = vunpack.i.h.bf16 %v4199_v55  ;;  %v2931_v55 = vunpack.i.h.bf16 %v4269_v33 }
 0x10f   : > { %v3187_v37 = vpack.i.bf16 %v1791_v53, %v1785_v1  ;;  %v2910_v53 = vunpack.i.l.bf16 %v4217_v42  ;;  %v1612_v1 = vsel %vm1000_vm2, %v3846_v18, %v2891_v28  ;;  %v1611_v43 = vsel %vm1000_vm2, %v3788_v61, %v2890_v46 }
 0x110   : > { %v2934_v21 = vpop.permute.xlu0 %2933  ;;  %v4310_v40 = vsel %vm550_vm1, %v862_v14, %v863_v8  ;;  %v1614_v0 = vsel %vm1000_vm2, %v3855_v6, %v2896_v24  ;;  %v1613_v61 = vsel %vm1000_vm2, %v3790_v62, %v2895_v50  ;;  %v2941_v62 = vunpack.i.h.bf16 %v4283_v29 }
 0x111   : > { %3188 = vrot.lane.b32.xlu1 %v3187_v37, %s3388_s29  ;;  %v3242_v60 = vpack.i.bf16 %v4307_v59, %v4310_v40  ;;  %v2926_v37 = vunpack.i.h.bf16 %v4279_v51  ;;  %v1627_v18 = vsel %vm1009_vm3, %v1611_v43, %v2910_v53  ;;  %v2936_v8 = vunpack.i.h.bf16 %v2934_v21 }
 0x112   : > { %3223 = vrot.lane.b32.xlu0 %v3222_v7, %s3382_s16  ;;  %v4297_v9 = vpop.permute.xlu1 %2948  ;;  %v2911_v7 = vunpack.i.h.bf16 %v4217_v42  ;;  %v2935_v42 = vunpack.i.l.bf16 %v2934_v21  ;;  %v2940_v51 = vunpack.i.l.bf16 %v4283_v29 }
 0x113   : > { %v2950_v50 = vunpack.i.l.bf16 %v4297_v9 }
 0x114   : > { %v2944_v16 = vpop.permute.xlu0 %2943  ;;  %v1629_v6 = vsel %vm1009_vm3, %v1613_v61, %v2911_v7  ;;  %v1630_v33 = vsel %vm1009_vm3, %v1614_v0, %v2911_v7 }
 0x115   : > { %3198 = vrot.lane.b32.xlu1 %v3197_v49, %s3383_s15  ;;  %v2945_v49 = vunpack.i.l.bf16 %v2944_v16  ;;  %v2946_v28 = vunpack.i.h.bf16 %v2944_v16  ;;  %v1646_v21 = vsel %vm1018_vm4, %v1630_v33, %v2931_v55 }
 0x116   : > { %v4313_v48 = vpop.permute.xlu1 %2958  ;;  %3233 = vrot.lane.b32.xlu0 %v3232_v34, %s3383_s15  ;;  %v1628_v34 = vsel %vm1009_vm3, %v1612_v1, %v2910_v53  ;;  %v2951_v1 = vunpack.i.h.bf16 %v4297_v9 }
 0x117   : > { %v1644_v46 = vsel %vm1018_vm4, %v1628_v34, %v2926_v37  ;;  %v1662_v37 = vsel %vm1027_vm5, %v1646_v21, %v2941_v62 }
 0x118   : > { %v4320_v58 = vpop.permute.xlu0 %2953  ;;  %v1660_v7 = vsel %vm1027_vm5, %v1644_v46, %v2936_v8 }
 0x119   : > { %3208 = vrot.lane.b32.xlu1 %v3207_v44, %s3385_s28  ;;  %v1676_v16 = vsel %vm1036_vm6, %v1660_v7, %v2945_v49  ;;  %v2955_v0 = vunpack.i.l.bf16 %v4320_v58  ;;  %v2956_v61 = vunpack.i.h.bf16 %v4320_v58  ;;  %v3328_v7 = vld [vmem:[%s4973_s3 + $0x80] sm:$0xff]  }
 0x11a   : > { %v4326_v23 = vpop.permute.xlu1 %2968  ;;  %3243 = vrot.lane.b32.xlu0 %v3242_v60, %s3385_s28  ;;  %v1645_v60 = vsel %vm1018_vm4, %v1629_v6, %v2930_v17  ;;  %v2960_v17 = vunpack.i.l.bf16 %v4313_v48  ;;  %v1692_v6 = vsel %vm5018_vm7, %v1676_v16, %v2951_v1  ;;  %2553 = vmatprep.subr.bf16.mxu1 %v3328_v7 }
 0x11b   : > { %v1661_v29 = vsel %vm1027_vm5, %v1645_v60, %v2940_v51  ;;  %v2970_v9 = vunpack.i.l.bf16 %v4326_v23  ;;  %v2971_v46 = vunpack.i.h.bf16 %v4326_v23  ;;  %2554 = vmatpush3.bf16.msra.mxu1 %v3328_v7 }
 0x11c   : > { %v4332_v3 = vpop.permute.xlu0 %2963 }
 0x11d   : > { %v2966_v34 = vunpack.i.h.bf16 %v4332_v3 }
 0x11e   : > { %v4344_v14 = vpop.permute.xlu1 %2978  ;;  %3253 = vrot.lane.b32.xlu0 %v3797_v63, %s3387_s13  ;;  %v1643_v63 = vsel %vm1018_vm4, %v1627_v18, %v2925_v11  ;;  %v2961_v11 = vunpack.i.h.bf16 %v4313_v48  ;;  %v1678_v18 = vsel %vm1036_vm6, %v1662_v37, %v2946_v28 }
 0x11f   : > { %v1659_v24 = vsel %vm1027_vm5, %v1643_v63, %v2935_v42  ;;  %v1677_v42 = vsel %vm1036_vm6, %v1661_v29, %v2946_v28  ;;  %v2980_v41 = vunpack.i.l.bf16 %v4344_v14 }
 0x120   : > { %v4355_v44 = vpop.permute.xlu0 %2973  ;;  %v1675_v43 = vsel %vm1036_vm6, %v1659_v24, %v2945_v49  ;;  %v2965_v49 = vunpack.i.l.bf16 %v4332_v3  ;;  %v1708_v58 = vsel %vm5017_vm8, %v1692_v6, %v2961_v11  ;;  %v1693_v63 = vsel %vm5018_vm7, %v1677_v42, %v2955_v0 }
 0x121   : > { %v1691_v8 = vsel %vm5018_vm7, %v1675_v43, %v2950_v50  ;;  %v1694_v3 = vsel %vm5018_vm7, %v1678_v18, %v2956_v61  ;;  %v1724_v50 = vsel %vm1063_vm9, %v1708_v58, %v2970_v9  ;;  %v3329_v18 = vld [vmem:[%s4973_s3 + $0x88] sm:$0xff]  }
 0x122   : > { %v2989_v53 = vpop.permute.xlu1 %2988  ;;  %v1707_v33 = vsel %vm5017_vm8, %v1691_v8, %v2960_v17  ;;  %v1709_v1 = vsel %vm5017_vm8, %v1693_v63, %v2965_v49  ;;  %v1710_v43 = vsel %vm5017_vm8, %v1694_v3, %v2966_v34  ;;  %2555 = vmatprep.subr.bf16.mxu1 %v3329_v18 }
 0x123   : > { %v1723_v24 = vsel %vm1063_vm9, %v1707_v33, %v2970_v9  ;;  %v2991_v17 = vunpack.i.h.bf16 %v2989_v53  ;;  %v2990_v29 = vunpack.i.l.bf16 %v2989_v53  ;;  %v1725_v42 = vsel %vm1063_vm9, %v1709_v1, %v2971_v46  ;;  %2556 = vmatpush3.bf16.msra.mxu1 %v3329_v18 }
 0x124   : > { %v2984_v55 = vpop.permute.xlu0 %2983  ;;  %v1726_v53 = vsel %vm1063_vm9, %v1710_v43, %v2971_v46  ;;  %v3330_v46 = vld [vmem:[%s4973_s3 + $0x90] sm:$0xff]  }
 0x125   : > { %v2986_v51 = vunpack.i.h.bf16 %v2984_v55  ;;  %v2985_v60 = vunpack.i.l.bf16 %v2984_v55  ;;  %v1741_v8 = vsel %vm1072_vm10, %v1725_v42, %v2990_v29  ;;  %v1742_v34 = vsel %vm1072_vm10, %v1726_v53, %v2991_v17  ;;  %2557 = vmatprep.subr.bf16.mxu1 %v3330_v46  ;;  %v3331_v17 = vld [vmem:[%s4973_s3 + $0x98] sm:$0xff]  }
 0x126   : > { %v4380_v48 = vpop.permute.xlu1 %2998  ;;  %v1787_v42 = vrot.slane %v2916_v30, 1  ;;  %v1786_v53 = vrot.slane %v2915_v5, 1 }
 0x127   : > { %v3001_v62 = vunpack.i.h.bf16 %v4380_v48  ;;  %v3000_v28 = vunpack.i.l.bf16 %v4380_v48  ;;  %v1739_v11 = vsel %vm1072_vm10, %v1723_v24, %v2985_v60  ;;  %v1740_v23 = vsel %vm1072_vm10, %v1724_v50, %v2986_v51  ;;  %2558 = vmatpush3.bf16.msra.mxu1 %v3330_v46 }
 0x128   : > { %v4388_v21 = vpop.permute.xlu0 %2993  ;;  %2559 = vmatprep.subr.bf16.mxu1 %v3331_v17  ;;  %v1788_v30 = vsel %vm501_vm0, %v1786_v53, %v1787_v42  ;;  %v1617_v48 = vsel %vm1000_vm2, %v3780_v56, %v2980_v41 }
 0x129   : > { %v1755_v0 = vsel %vm5016_vm11, %v1739_v11, %v3000_v28  ;;  %v1756_v55 = vsel %vm5016_vm11, %v1740_v23, %v3001_v62  ;;  %v3227_v11 = vpack.i.bf16 %v4310_v40, %v4304_v12  ;;  %v948_v23 = vrot.slane %v3980_v15, 2  ;;  %v3332_v12 = vld [vmem:[%s4973_s3 + $0xa0] ss:$0 sps:$4 sm:$0x33]  }
 0x12a   : > { %v4399_v16 = vpop.permute.xlu1 %3008  ;;  %v1795_v6 = vrot.slane %v1755_v0, 1  ;;  %v1796_v33 = vrot.slane %v1756_v55, 1  ;;  %v949_v0 = vrot.slane %v3982_v32, 2  ;;  %v1793_v55 = vrot.slane %v2921_v31, 1 }
 0x12b   : > { %2560 = vmatpush3.bf16.msra.mxu1 %v3331_v17  ;;  %v868_v31 = vrot.slane %v3780_v56, 2 }
 0x12c   : > { %v3004_v37 = vpop.permute.xlu0 %3003  ;;  %v1797_v7 = vsel %vm501_vm0, %v1795_v6, %v1796_v33  ;;  %2571 = vmatprep.subr.msk.bf16.mxu1 %vm2085_vm12, %v3332_v12  ;;  %v2981_v6 = vunpack.i.h.bf16 %v4344_v14  ;;  %v1799_v14 = vrot.slane %v3001_v62, 1 }
 0x12d   : > { %v3006_v61 = vunpack.i.h.bf16 %v3004_v37  ;;  %v3005_v9 = vunpack.i.l.bf16 %v3004_v37  ;;  %v1792_v37 = vrot.slane %v2920_v57, 1  ;;  %v869_v57 = vrot.slane %v3896_v2, 2 }
 0x12e   : > { %v4416_v49 = vpop.permute.xlu1 %3018  ;;  %v1618_v62 = vsel %vm1000_vm2, %v3896_v2, %v2981_v6 }
 0x12f   : > { %v1757_v51 = vsel %vm5016_vm11, %v1741_v8, %v3005_v9  ;;  %v1758_v60 = vsel %vm5016_vm11, %v1742_v34, %v3006_v61  ;;  %v1794_v35 = vsel %vm501_vm0, %v1792_v37, %v1793_v55  ;;  %v4466_v8 = vsel %vm550_vm1, %v948_v23, %v949_v0 }
 0x130   : > { %v1801_v58 = vrot.slane %v1757_v51, 1  ;;  %v1802_v63 = vrot.slane %v1758_v60, 1  ;;  %v4420_v3 = vpop.permute.xlu0 %3013  ;;  %v2087_v34 = vsel %vm2085_vm12, %v3332_v12, 0  ;;  %v1805_v33 = vrot.slane %v3006_v61, 1 }
 0x131   : > { %v1804_v51 = vrot.slane %v3005_v9, 1  ;;  %2562 = vmatpush3.bf16.msra.mxu1 %v2087_v34  ;;  %v2976_v60 = vunpack.i.h.bf16 %v4355_v44  ;;  %v4477_v46 = vsel %vm550_vm1, %v868_v31, %v869_v57  ;;  %v1798_v61 = vrot.slane %v3000_v28, 1 }
 0x132   : > { %v4425_v24 = vpop.permute.xlu1 %3028  ;;  %v1803_v50 = vsel %vm501_vm0, %v1801_v58, %v1802_v63  ;;  %v3267_v63 = vpack.i.bf16 %v3920_v25, %v3927_v4  ;;  %v3277_v9 = vpack.i.bf16 %v3980_v15, %v3780_v56  ;;  %v3247_v17 = vpack.i.bf16 %v1794_v35, %v1788_v30 }
 0x133   : > { %v3217_v43 = vpack.i.bf16 %v1803_v50, %v1797_v7  ;;  %v2975_v50 = vunpack.i.l.bf16 %v4355_v44  ;;  %v2996_v7 = vunpack.i.h.bf16 %v4388_v21  ;;  %v3287_v4 = vpack.i.bf16 %v4466_v8, %v4477_v46 }
 0x134   : > { %v4429_v1 = vpop.permute.xlu0 %3023  ;;  %v3297_v44 = vpack.i.bf16 %v3974_v38, %v3980_v15  ;;  %v2995_v28 = vunpack.i.l.bf16 %v4388_v21  ;;  %v1616_v23 = vsel %vm1000_vm2, %v3901_v19, %v2976_v60  ;;  %v3011_v0 = vunpack.i.h.bf16 %v4399_v16 }
 0x135   : > { %3218 = vrot.lane.b32.xlu1 %v3217_v43, %s3388_s29  ;;  %v3010_v55 = vunpack.i.l.bf16 %v4399_v16  ;;  %v3015_v37 = vunpack.i.l.bf16 %v4420_v3  ;;  %v1615_v2 = vsel %vm1000_vm2, %v3778_v39, %v2975_v50  ;;  %v1800_v21 = vsel %vm501_vm0, %v1798_v61, %v1799_v14 }
 0x136   : > { %v4435_v29 = vpop.permute.xlu1 %3038  ;;  %v3016_v53 = vunpack.i.h.bf16 %v4420_v3  ;;  %v3025_v12 = vunpack.i.l.bf16 %v4429_v1  ;;  %v1633_v19 = vsel %vm1009_vm3, %v1617_v48, %v2996_v7  ;;  %v3026_v16 = vunpack.i.h.bf16 %v4429_v1 }
 0x137   : > { %v1634_v35 = vsel %vm1009_vm3, %v1618_v62, %v2996_v7  ;;  %v1631_v30 = vsel %vm1009_vm3, %v1615_v2, %v2995_v28  ;;  %v1632_v39 = vsel %vm1009_vm3, %v1616_v23, %v2995_v28  ;;  %v3021_v34 = vunpack.i.h.bf16 %v4416_v49 }
 0x138   : > { %v4449_v18 = vpop.permute.xlu0 %3033  ;;  %v1647_v3 = vsel %vm1018_vm4, %v1631_v30, %v3010_v55  ;;  %v1648_v6 = vsel %vm1018_vm4, %v1632_v39, %v3011_v0  ;;  %v1649_v41 = vsel %vm1018_vm4, %v1633_v19, %v3015_v37  ;;  %v3030_v60 = vunpack.i.l.bf16 %v4425_v24 }
 0x139   : > { %3228 = vrot.lane.b32.xlu1 %v3227_v11, %s3384_s10  ;;  %v1806_v11 = vsel %vm501_vm0, %v1804_v51, %v1805_v33  ;;  %v3031_v33 = vunpack.i.h.bf16 %v4425_v24  ;;  %v1650_v51 = vsel %vm1018_vm4, %v1634_v35, %v3016_v53  ;;  %v1665_v50 = vsel %vm1027_vm5, %v1649_v41, %v3025_v12 }
 0x13a   : > { %v4455_v40 = vpop.permute.xlu1 %3048  ;;  %v3257_v57 = vpack.i.bf16 %v1806_v11, %v1800_v21  ;;  %v3040_v14 = vunpack.i.l.bf16 %v4435_v29  ;;  %v1666_v61 = vsel %vm1027_vm5, %v1650_v51, %v3026_v16  ;;  %v3041_v7 = vunpack.i.h.bf16 %v4435_v29 }
 0x13b   : > { %v1664_v48 = vsel %vm1027_vm5, %v1648_v6, %v3021_v34  ;;  %v3036_v28 = vunpack.i.h.bf16 %v4449_v18  ;;  %v3051_v11 = vunpack.i.h.bf16 %v4455_v40  ;;  %v3050_v24 = vunpack.i.l.bf16 %v4455_v40 }
 0x13c   : > { %v4463_v5 = vpop.permute.xlu0 %3043  ;;  %v1681_v23 = vsel %vm1036_vm6, %v1665_v50, %v3031_v33  ;;  %v1680_v21 = vsel %vm1036_vm6, %v1664_v48, %v3030_v60  ;;  %vm1126_vm1 = vcmask 424960   ;;  %vm1863_vm12 = vcmask 523264  }
 0x13d   : > { %3238 = vrot.lane.b32.xlu1 %v3237_v13, %s3386_s7  ;;  %v3020_v13 = vunpack.i.l.bf16 %v4416_v49  ;;  %v3046_v0 = vunpack.i.h.bf16 %v4463_v5  ;;  %v3045_v55 = vunpack.i.l.bf16 %v4463_v5  ;;  %v1697_v53 = vsel %vm5018_vm7, %v1681_v23, %v3040_v14 }
 0x13e   : > { %v4472_v58 = vpop.permute.xlu1 %3058  ;;  %v1713_v16 = vsel %vm5017_vm8, %v1697_v53, %v3050_v24  ;;  %v5063_v53 = vunpack.c.l.bf16 %v3967_v36 }
 0x13f   : > { %v1663_v49 = vsel %vm1027_vm5, %v1647_v3, %v3020_v13 }
 0x140   : > { %v4487_v43 = vpop.permute.xlu0 %3053  ;;  %v1679_v2 = vsel %vm1036_vm6, %v1663_v49, %v3030_v60  ;;  %v3060_v60 = vunpack.i.l.bf16 %v4472_v58 }
 0x141   : > { %3248 = vrot.lane.b32.xlu1 %v3247_v17, %s3388_s29  ;;  %v3035_v17 = vunpack.i.l.bf16 %v4449_v18  ;;  %v1682_v18 = vsel %vm1036_vm6, %v1666_v61, %v3031_v33  ;;  %v3055_v24 = vunpack.i.l.bf16 %v4487_v43 }
 0x142   : > { %v4505_v42 = vpop.permute.xlu1 %3068  ;;  %v1698_v40 = vsel %vm5018_vm7, %v1682_v18, %v3041_v7  ;;  %v3282_v18 = vpack.i.bf16 %v4007_v26, %v3920_v25 }
 0x143   : > { %v1695_v12 = vsel %vm5018_vm7, %v1679_v2, %v3035_v17 }
 0x144   : > { %v3064_v31 = vpop.permute.xlu0 %3063  ;;  %v1711_v30 = vsel %vm5017_vm8, %v1695_v12, %v3045_v55  ;;  %v3070_v55 = vunpack.i.l.bf16 %v4505_v42 }
 0x145   : > { %3258 = vrot.lane.b32.xlu1 %v3257_v57, %s3388_s29  ;;  %v3066_v37 = vunpack.i.h.bf16 %v3064_v31  ;;  %v1714_v57 = vsel %vm5017_vm8, %v1698_v40, %v3051_v11  ;;  %v3065_v35 = vunpack.i.l.bf16 %v3064_v31  ;;  %v3061_v31 = vunpack.i.h.bf16 %v4472_v58 }
 0x146   : > { %v3079_v1 = vpop.permute.xlu1 %3078  ;;  %v3056_v58 = vunpack.i.h.bf16 %v4487_v43  ;;  %v3071_v40 = vunpack.i.h.bf16 %v4505_v42  ;;  %v1619_v42 = vsel %vm1000_vm2, %v3980_v15, %v3055_v24 }
 0x147   : > { %v3081_v19 = vunpack.i.h.bf16 %v3079_v1  ;;  %v3080_v13 = vunpack.i.l.bf16 %v3079_v1  ;;  %v1729_v34 = vsel %vm1063_vm9, %v1713_v16, %v3066_v37  ;;  %v1730_v3 = vsel %vm1063_vm9, %v1714_v57, %v3066_v37 }
 0x148   : > { %v3074_v62 = vpop.permute.xlu0 %3073  ;;  %v1727_v61 = vsel %vm1063_vm9, %v1711_v30, %v3065_v35  ;;  %v1622_v43 = vsel %vm1000_vm2, %v5063_v53, %v3061_v31  ;;  %v1620_v36 = vsel %vm1000_vm2, %v3982_v32, %v3056_v58  ;;  %v1635_v57 = vsel %vm1009_vm3, %v1619_v42, %v3070_v55 }
 0x149   : > { %3268 = vrot.lane.b32.xlu1 %v3267_v63, %s3382_s16  ;;  %v1696_v63 = vsel %vm5018_vm7, %v1680_v21, %v3036_v28  ;;  %v3076_v41 = vunpack.i.h.bf16 %v3074_v62  ;;  %v3075_v33 = vunpack.i.l.bf16 %v3074_v62  ;;  %v1745_v50 = vsel %vm1072_vm10, %v1729_v34, %v3080_v13  ;;  %s2472_s16 = sshll.u32 %s5127_s18, 3 }
 0x14a   : > { %v4540_v29 = vpop.permute.xlu1 %3088  ;;  %v1712_v39 = vsel %vm5017_vm8, %v1696_v63, %v3046_v0  ;;  %v1746_v14 = vsel %vm1072_vm10, %v1730_v3, %v3081_v19  ;;  %v3272_v13 = vpack.i.bf16 %v4477_v46, %v4307_v59  ;;  %v1621_v63 = vsel %vm1000_vm2, %v3974_v38, %v3060_v60 }
 0x14b   : > { %v1728_v7 = vsel %vm1063_vm9, %v1712_v39, %v3065_v35  ;;  %v1743_v23 = vsel %vm1072_vm10, %v1727_v61, %v3075_v33  ;;  %v3091_v59 = vunpack.i.h.bf16 %v4540_v29  ;;  %v3090_v46 = vunpack.i.l.bf16 %v4540_v29 }
 0x14c   : > { %v4548_v5 = vpop.permute.xlu0 %3083  ;;  %v1744_v0 = vsel %vm1072_vm10, %v1728_v7, %v3076_v41  ;;  %v1636_v32 = vsel %vm1009_vm3, %v1620_v36, %v3070_v55  ;;  %v1637_v15 = vsel %vm1009_vm3, %v1621_v63, %v3071_v40  ;;  %v1638_v33 = vsel %vm1009_vm3, %v1622_v43, %v3071_v40 }
 0x14d   : > { %3278 = vrot.lane.b32.xlu1 %v3277_v9, %s3383_s15  ;;  %v3085_v38 = vunpack.i.l.bf16 %v4548_v5  ;;  %s2473_s15 = sshll.u32 %s5121_s19, 6 }
 0x14e   : > { %v3099_v6 = vpop.permute.xlu1 %3098 }
 0x14f   : > { %v3101_v1 = vunpack.i.h.bf16 %v3099_v6  ;;  %v3100_v51 = vunpack.i.l.bf16 %v3099_v6  ;;  %v1651_v61 = vsel %vm1018_vm4, %v1635_v57, %v3085_v38 }
 0x150   : > { %v3094_v49 = vpop.permute.xlu0 %3093 }
 0x151   : > { %v1761_v56 = vsel %vm5016_vm11, %v1745_v50, %v3100_v51  ;;  %v1762_v9 = vsel %vm5016_vm11, %v1746_v14, %v3101_v1  ;;  %v3096_v48 = vunpack.i.h.bf16 %v3094_v49  ;;  %v3095_v28 = vunpack.i.l.bf16 %v3094_v49  ;;  %3288 = vrot.lane.b32.xlu1 %v3287_v4, %s3385_s28 }
 0x152   : > { %v1813_v17 = vrot.slane %v1761_v56, 1  ;;  %v1814_v62 = vrot.slane %v1762_v9, 1  ;;  %v3109_v11 = vpop.permute.xlu1 %3108  ;;  %v1817_v39 = vrot.slane %v3101_v1, 1  ;;  %v1816_v34 = vrot.slane %v3100_v51, 1 }
 0x153   : > { %v1759_v37 = vsel %vm5016_vm11, %v1743_v23, %v3095_v28  ;;  %v1760_v2 = vsel %vm5016_vm11, %v1744_v0, %v3096_v48  ;;  %v3111_v3 = vunpack.i.h.bf16 %v3109_v11  ;;  %v3110_v6 = vunpack.i.l.bf16 %v3109_v11 }
 0x154   : > { %v3104_v21 = vpop.permute.xlu0 %3103  ;;  %v1807_v8 = vrot.slane %v1759_v37, 1  ;;  %v1808_v4 = vrot.slane %v1760_v2, 1  ;;  %v1815_v19 = vsel %vm501_vm0, %v1813_v17, %v1814_v62  ;;  %v1811_v29 = vrot.slane %v3096_v48, 1 }
 0x155   : > { %3298 = vrot.lane.b32.xlu1 %v3297_v44, %s3387_s13  ;;  %v3086_v44 = vunpack.i.h.bf16 %v4548_v5  ;;  %v1810_v31 = vrot.slane %v3095_v28, 1  ;;  %v3105_v60 = vunpack.i.l.bf16 %v3104_v21  ;;  %v1653_v50 = vsel %vm1018_vm4, %v1637_v15, %v3090_v46 }
 0x156   : > { %v4586_v12 = vpop.permute.xlu1 %3118  ;;  %v1809_v16 = vsel %vm501_vm0, %v1807_v8, %v1808_v4  ;;  %v3106_v14 = vunpack.i.h.bf16 %v3104_v21  ;;  %v1654_v49 = vsel %vm1018_vm4, %v1638_v33, %v3091_v59  ;;  %v1818_v56 = vsel %vm501_vm0, %v1816_v34, %v1817_v39 }
 0x157   : > { %v3262_v30 = vpack.i.bf16 %v1815_v19, %v1809_v16  ;;  %v1652_v7 = vsel %vm1018_vm4, %v1636_v32, %v3086_v44  ;;  %v1669_v9 = vsel %vm1027_vm5, %v1653_v50, %v3110_v6  ;;  %v1670_v17 = vsel %vm1027_vm5, %v1654_v49, %v3111_v3 }
 0x158   : > { %v3114_v35 = vpop.permute.xlu0 %3113  ;;  %v1812_v11 = vsel %vm501_vm0, %v1810_v31, %v1811_v29  ;;  %v1667_v58 = vsel %vm1027_vm5, %v1651_v61, %v3105_v60  ;;  %v3121_v24 = vunpack.i.h.bf16 %v4586_v12  ;;  %v3120_v23 = vunpack.i.l.bf16 %v4586_v12 }
 0x159   : > { %3263 = vrot.lane.b32.xlu0 %v3262_v30, %s3388_s29  ;;  %v3116_v5 = vunpack.i.h.bf16 %v3114_v35  ;;  %v3115_v1 = vunpack.i.l.bf16 %v3114_v35  ;;  %v1668_v0 = vsel %vm1027_vm5, %v1652_v7, %v3106_v14  ;;  %v3292_v35 = vpack.i.bf16 %v1818_v56, %v1812_v11 }
 0x15a   : > { %v3129_v41 = vpop.permute.xlu1 %3128 }
 0x15b   : > { %v1685_v55 = vsel %vm1036_vm6, %v1669_v9, %v3116_v5  ;;  %v1686_v37 = vsel %vm1036_vm6, %v1670_v17, %v3116_v5  ;;  %v1683_v2 = vsel %vm1036_vm6, %v1667_v58, %v3115_v1  ;;  %v1684_v8 = vsel %vm1036_vm6, %v1668_v0, %v3115_v1 }
 0x15c   : > { %v3124_v51 = vpop.permute.xlu0 %3123  ;;  %v3131_v4 = vunpack.i.h.bf16 %v3129_v41  ;;  %v3130_v40 = vunpack.i.l.bf16 %v3129_v41  ;;  %v1699_v30 = vsel %vm5018_vm7, %v1683_v2, %v3120_v23  ;;  %v1700_v44 = vsel %vm5018_vm7, %v1684_v8, %v3121_v24 }
 0x15d   : > { %v3126_v62 = vunpack.i.h.bf16 %v3124_v51  ;;  %v3125_v48 = vunpack.i.l.bf16 %v3124_v51  ;;  %3273 = vrot.lane.b32.xlu0 %v3272_v13, %s3384_s10  ;;  %v2636_v2 = vunpack.i.h.bf16 %v3884_v52  ;;  %s353_s10 = sadd.s32 %s2473_s15, %s2472_s16 }
 0x15e   : > { %v3139_v28 = vpop.permute.xlu1 %3138  ;;  %v1715_v38 = vsel %vm5017_vm8, %v1699_v30, %v3130_v40  ;;  %v1716_v39 = vsel %vm5017_vm8, %v1700_v44, %v3131_v4  ;;  %v2656_v4 = vunpack.i.h.bf16 %v3903_v22  ;;  %v2670_v40 = vunpack.i.l.bf16 %v3929_v45  ;;  %s2474_s28 = sshll.u32 %s353_s10, 3 }
 0x15f   : > { %v1701_v19 = vsel %vm5018_vm7, %v1685_v55, %v3125_v48  ;;  %v1702_v13 = vsel %vm5018_vm7, %v1686_v37, %v3126_v62  ;;  %v3141_v12 = vunpack.i.h.bf16 %v3139_v28  ;;  %v3140_v16 = vunpack.i.l.bf16 %v3139_v28  ;;  %s4916_s27 = scalar_lea.vmem %s4974_s4, %s2474_s28 }
 0x160   : > { %v3134_v21 = vpop.permute.xlu0 %3133 }
 0x161   : > { %v3136_v53 = vunpack.i.h.bf16 %v3134_v21  ;;  %v3135_v43 = vunpack.i.l.bf16 %v3134_v21  ;;  %3283 = vrot.lane.b32.xlu0 %v3282_v18, %s3386_s7  ;;  %v1731_v6 = vsel %vm1063_vm9, %v1715_v38, %v3140_v16  ;;  %v1732_v41 = vsel %vm1063_vm9, %v1716_v39, %v3140_v16  ;;  %v5064_v38 = vld [vmem:[#allocation27_spill] sm:$0xff] }
 0x162   : > { %v3149_v63 = vpop.permute.xlu1 %3148  ;;  %v2635_v21 = vunpack.i.l.bf16 %v3884_v52  ;;  %v2755_v39 = vunpack.i.l.bf16 %v5064_v38 }
 0x163   : > { %v1717_v36 = vsel %vm5017_vm8, %v1701_v19, %v3135_v43  ;;  %v1718_v42 = vsel %vm5017_vm8, %v1702_v13, %v3136_v53  ;;  %v3151_v57 = vunpack.i.h.bf16 %v3149_v63  ;;  %v3150_v59 = vunpack.i.l.bf16 %v3149_v63 }
 0x164   : > { %v3144_v46 = vpop.permute.xlu0 %3143  ;;  %v1733_v26 = vsel %vm1063_vm9, %v1717_v36, %v3141_v12  ;;  %v1734_v25 = vsel %vm1063_vm9, %v1718_v42, %v3141_v12  ;;  %v2655_v53 = vunpack.i.l.bf16 %v3903_v22  ;;  %v2671_v43 = vunpack.i.h.bf16 %v3929_v45 }
 0x165   : > { %3293 = vrot.lane.b32.xlu0 %v3292_v35, %s3388_s29  ;;  %v3146_v34 = vunpack.i.h.bf16 %v3144_v46  ;;  %v3145_v32 = vunpack.i.l.bf16 %v3144_v46  ;;  %v1749_v33 = vsel %vm1072_vm10, %v1733_v26, %v3150_v59  ;;  %v1750_v29 = vsel %vm1072_vm10, %v1734_v25, %v3151_v57 }
 0x166   : > { %v3159_v18 = vpop.permute.xlu1 %3158  ;;  %v2696_v19 = vunpack.i.h.bf16 %v3945_v20  ;;  %v2695_v13 = vunpack.i.l.bf16 %v3945_v20  ;;  %v1002_v12 = vsel %vm1000_vm2, %v3483_v10, %v2636_v2  ;;  %v1001_v52 = vsel %vm1000_vm2, %v3514_v27, %v2635_v21 }
 0x167   : > { %v3161_v15 = vunpack.i.h.bf16 %v3159_v18  ;;  %v3160_v3 = vunpack.i.l.bf16 %v3159_v18  ;;  %v1747_v7 = vsel %vm1072_vm10, %v1731_v6, %v3145_v32  ;;  %v1748_v56 = vsel %vm1072_vm10, %v1732_v41, %v3146_v34  ;;  %v5065_v18 = vld [vmem:[#allocation39_spill] sm:$0xff] }
 0x168   : > { %v3154_v31 = vpop.permute.xlu0 %3153  ;;  %v2716_v63 = vunpack.i.h.bf16 %v3959_v47  ;;  %v2715_v36 = vunpack.i.l.bf16 %v3959_v47  ;;  %v1010_v22 = vsel %vm1009_vm3, %v1001_v52, %v2655_v53  ;;  %v1011_v42 = vsel %vm1009_vm3, %v1002_v12, %v2656_v4 }
 0x169   : > { %v1829_v60 = vrot.slane %v3161_v15, 1  ;;  %v1765_v50 = vsel %vm5016_vm11, %v1749_v33, %v3160_v3  ;;  %v1766_v14 = vsel %vm5016_vm11, %v1750_v29, %v3161_v15  ;;  %v1828_v5 = vrot.slane %v3160_v3, 1 }
 0x16a   : > { %v1825_v1 = vrot.slane %v1765_v50, 1  ;;  %v1826_v51 = vrot.slane %v1766_v14, 1  ;;  %v3156_v49 = vunpack.i.h.bf16 %v3154_v31  ;;  %v3155_v61 = vunpack.i.l.bf16 %v3154_v31  ;;  %v3169_v16 = vpop.permute.xlu1 %3168  ;;  %v5066_v50 = vld [vmem:[#allocation31_spill] sm:$0xff] }
 0x16b   : > { %v1830_v28 = vsel %vm501_vm0, %v1828_v5, %v1829_v60  ;;  %v2735_v45 = vunpack.i.l.bf16 %v3984_v54  ;;  %v1019_v57 = vsel %vm1018_vm4, %v1010_v22, %v2670_v40  ;;  %v1020_v20 = vsel %vm1018_vm4, %v1011_v42, %v2671_v43 }
 0x16c   : > { %v1823_v9 = vrot.slane %v3156_v49, 1  ;;  %v1763_v17 = vsel %vm5016_vm11, %v1747_v7, %v3155_v61  ;;  %v1764_v62 = vsel %vm5016_vm11, %v1748_v56, %v3156_v49  ;;  %v1822_v48 = vrot.slane %v3155_v61, 1  ;;  %v3164_v8 = vpop.permute.xlu0 %3163  ;;  %v5067_v49 = vld [vmem:[#allocation35_spill] sm:$0xff] }
 0x16d   : > { %v1819_v11 = vrot.slane %v1763_v17, 1  ;;  %v1820_v58 = vrot.slane %v1764_v62, 1  ;;  %v1827_v23 = vsel %vm501_vm0, %v1825_v1, %v1826_v51  ;;  %v2736_v10 = vunpack.i.h.bf16 %v3984_v54 }
 0x16e   : > { %v1824_v24 = vsel %vm501_vm0, %v1822_v48, %v1823_v9  ;;  %v3307_v55 = vpack.i.bf16 %v1830_v28, %v1827_v23  ;;  %v1028_v27 = vsel %vm1027_vm5, %v1019_v57, %v2695_v13  ;;  %v1029_v46 = vsel %vm1027_vm5, %v1020_v20, %v2696_v19  ;;  %v3179_v31 = vpop.permute.xlu1 %3178 }
 0x16f   : > { %v1821_v0 = vsel %vm501_vm0, %v1819_v11, %v1820_v58  ;;  %v3166_v35 = vunpack.i.h.bf16 %v3164_v8  ;;  %v3165_v47 = vunpack.i.l.bf16 %v3164_v8  ;;  %v1037_v30 = vsel %vm1036_vm6, %v1028_v27, %v2715_v36  ;;  %v5068_v36 = vld [vmem:[#allocation10_spill] sm:$0xff] }
 0x170   : > { %v3302_v37 = vpack.i.bf16 %v1824_v24, %v1821_v0  ;;  %3308 = vrot.lane.b32.xlu1 %v3307_v55, %s3388_s29  ;;  %v3174_v59 = vpop.permute.xlu0 %3173  ;;  %v1038_v44 = vsel %vm1036_vm6, %v1029_v46, %v2716_v63  ;;  %v1046_v26 = vsel %vm5018_vm7, %v1037_v30, %v2735_v45  ;;  %v2756_v25 = vunpack.i.h.bf16 %v5064_v38  ;;  %v5069_v45 = vld [vmem:[#allocation11_spill] sm:$0xff] }
 0x171   : > { %v2816_v54 = vunpack.i.h.bf16 %v5065_v18  ;;  %v2815_v34 = vunpack.i.l.bf16 %v5065_v18  ;;  %v1047_v32 = vsel %vm5018_vm7, %v1038_v44, %v2736_v10  ;;  %v3171_v15 = vunpack.i.h.bf16 %v3169_v16  ;;  %v5070_v10 = vld [vmem:[#allocation14_spill] sm:$0xff]  ;;  %v5072_v44 = vld [vmem:[#allocation7_spill] sm:$0xff] }
 0x172   : > { %3303 = vrot.lane.b32.xlu0 %v3302_v37, %s3388_s29  ;;  %v3170_v3 = vunpack.i.l.bf16 %v3169_v16  ;;  %v3176_v33 = vunpack.i.h.bf16 %v3174_v59  ;;  %v3175_v29 = vunpack.i.l.bf16 %v3174_v59  ;;  %v1055_v60 = vsel %vm5017_vm8, %v1046_v26, %v2755_v39  ;;  %v5073_v39 = vld [vmem:[#allocation4_spill] sm:$0xff]  ;;  %s2475_s29 = sshll.u32 %s5121_s19, 3 }
 0x173   : > { %v1091_v6 = vsel %vm1090_vm13, %v2815_v34, %v3165_v47  ;;  %v1092_v41 = vsel %vm1090_vm13, %v2816_v54, %v3166_v35  ;;  %v2776_v14 = vunpack.i.h.bf16 %v5066_v50  ;;  %v2775_v5 = vunpack.i.l.bf16 %v5066_v50  ;;  %v5071_v35 = vld [vmem:[#allocation17_spill] sm:$0xff]  ;;  %s361_s30 = sadd.s32 %s2475_s29, %s5127_s18 }
 0x174   : > { %v3184_v1 = vpop.permute.xlu0 %3183  ;;  %v1056_v51 = vsel %vm5017_vm8, %v1047_v32, %v2756_v25  ;;  %v2796_v61 = vunpack.i.h.bf16 %v5067_v49  ;;  %v2795_v7 = vunpack.i.l.bf16 %v5067_v49  ;;  %vm1117_vm0 = vcmask 326656   ;;  %v5076_v49 = vld [vmem:[#allocation23_spill] sm:$0xff]  ;;  %s2476_s6 = sshll.u32 %s361_s30, 1 }
 0x175   : > { %v1100_v56 = vsel %vm1099_vm14, %v1091_v6, %v3170_v3  ;;  %v1101_v9 = vsel %vm1099_vm14, %v1092_v41, %v3171_v15  ;;  %v3181_v17 = vunpack.i.h.bf16 %v3179_v31  ;;  %v3180_v62 = vunpack.i.l.bf16 %v3179_v31  ;;  %v5074_v31 = vld [vmem:[#allocation20_spill] sm:$0xff]  ;;  %s363_s11 = scalar_lea.vmem %s4975_s5, %s2476_s6 }
 0x176   : > { %v1109_v48 = vsel %vm1108_vm15, %v1100_v56, %v3175_v29  ;;  %v1110_v28 = vsel %vm1108_vm15, %v1101_v9, %v3176_v33  ;;  %v3186_v11 = vunpack.i.h.bf16 %v3184_v1  ;;  %v3185_v58 = vunpack.i.l.bf16 %v3184_v1  ;;  %v5077_v56 = vld [vmem:[#allocation26_spill] sm:$0xff] }
 0x177   : > { %v1064_v24 = vsel %vm1063_vm9, %v1055_v60, %v2775_v5  ;;  %v1065_v23 = vsel %vm1063_vm9, %v1056_v51, %v2776_v14  ;;  %v1118_v8 = vsel %vm1117_vm0, %v1109_v48, %v3180_v62  ;;  %v1119_v4 = vsel %vm1117_vm0, %v1110_v28, %v3181_v17  ;;  %v5075_v14 = vld [vmem:[#allocation38_spill] sm:$0xff] }
 0x178   : > { %v1073_v55 = vsel %vm1072_vm10, %v1064_v24, %v2795_v7  ;;  %v1074_v37 = vsel %vm1072_vm10, %v1065_v23, %v2796_v61  ;;  %v1127_v53 = vsel %vm1126_vm1, %v1118_v8, %v3185_v58  ;;  %v1128_v43 = vsel %vm1126_vm1, %v1119_v4, %v3186_v11  ;;  %v3194_v20 = vpop.permute.xlu0 %3193  ;;  %v5078_v4 = vld [vmem:[#allocation30_spill] sm:$0xff] }
 0x179   : > { %v1082_v40 = vsel %vm5016_vm11, %v1073_v55, %v2815_v34  ;;  %v1083_v19 = vsel %vm5016_vm11, %v1074_v37, %v2816_v54  ;;  %v2641_v22 = vunpack.i.h.bf16 %v5068_v36  ;;  %v2640_v42 = vunpack.i.l.bf16 %v5068_v36 }
 0x17a   : > { %v1896_v63 = vpack.c.bf16 %v1083_v19, %v1082_v40  ;;  %v2661_v16 = vunpack.i.h.bf16 %v5069_v45  ;;  %v2660_v57 = vunpack.i.l.bf16 %v5069_v45  ;;  %v2681_v59 = vunpack.i.h.bf16 %v5070_v10 }
 0x17b   : > { %v2680_v27 = vunpack.i.l.bf16 %v5070_v10  ;;  %v2701_v47 = vunpack.i.h.bf16 %v5071_v35  ;;  %v2700_v30 = vunpack.i.l.bf16 %v5071_v35  ;;  %v1004_v38 = vsel %vm1000_vm2, %v5072_v44, %v2641_v22 }
 0x17c   : > { %v1003_v26 = vsel %vm1000_vm2, %v5073_v39, %v2640_v42  ;;  %v1013_v18 = vsel %vm1009_vm3, %v1004_v38, %v2661_v16  ;;  %v3196_v32 = vunpack.i.h.bf16 %v3194_v20  ;;  %v3195_v15 = vunpack.i.l.bf16 %v3194_v20  ;;  %v3204_v41 = vpop.permute.xlu0 %3203 }
 0x17d   : > { %v1012_v25 = vsel %vm1009_vm3, %v1003_v26, %v2660_v57  ;;  %v1022_v34 = vsel %vm1018_vm4, %v1013_v18, %v2681_v59  ;;  %v2721_v60 = vunpack.i.h.bf16 %v5074_v31  ;;  %v2720_v50 = vunpack.i.l.bf16 %v5074_v31 }
 0x17e   : > { %v1021_v54 = vsel %vm1018_vm4, %v1012_v25, %v2680_v27  ;;  %v1031_v6 = vsel %vm1027_vm5, %v1022_v34, %v2701_v47  ;;  %v2821_v5 = vunpack.i.h.bf16 %v5075_v14  ;;  %v2820_v1 = vunpack.i.l.bf16 %v5075_v14 }
 0x17f   : > { %v1030_v3 = vsel %vm1027_vm5, %v1021_v54, %v2700_v30  ;;  %v2741_v61 = vunpack.i.h.bf16 %v5076_v49  ;;  %v2740_v7 = vunpack.i.l.bf16 %v5076_v49  ;;  %v2761_v9 = vunpack.i.h.bf16 %v5077_v56 }
 0x180   : > { %v2760_v17 = vunpack.i.l.bf16 %v5077_v56  ;;  %v1094_v62 = vsel %vm1090_vm13, %v2821_v5, %v3196_v32  ;;  %v1093_v48 = vsel %vm1090_vm13, %v2820_v1, %v3195_v15  ;;  %v3206_v28 = vunpack.i.h.bf16 %v3204_v41  ;;  %v5080_v56 = vld [vmem:[#allocation8_spill] sm:$0xff] }
 0x181   : > { %v3205_v11 = vunpack.i.l.bf16 %v3204_v41  ;;  %v1039_v37 = vsel %vm1036_vm6, %v1030_v3, %v2720_v50  ;;  %v1040_v8 = vsel %vm1036_vm6, %v1031_v6, %v2721_v60 }
 0x182   : > { %v1048_v40 = vsel %vm5018_vm7, %v1039_v37, %v2740_v7  ;;  %v1049_v19 = vsel %vm5018_vm7, %v1040_v8, %v2741_v61  ;;  %v5083_v37 = vld [vmem:[#allocation3_spill] sm:$0xff] }
 0x183   : > { %v4703_v0 = vpop.permute.xlu1 %3188  ;;  %v1057_v16 = vsel %vm5017_vm8, %v1048_v40, %v2760_v17  ;;  %v1058_v57 = vsel %vm5017_vm8, %v1049_v19, %v2761_v9  ;;  %v2646_v9 = vunpack.i.h.bf16 %v5080_v56  ;;  %v5085_v19 = vld [vmem:[#allocation19_spill] sm:$0xff] }
 0x184   : > { %v3191_v2 = vunpack.i.h.bf16 %v4703_v0  ;;  %v3190_v21 = vunpack.i.l.bf16 %v4703_v0 }
 0x185   : > { %v1006_v8 = vsel %vm1000_vm2, %v5083_v37, %v2646_v9 }
 0x186   : > { %v1888_v13 = vsel %vm1863_vm12, %v1127_v53, %v3190_v21  ;;  %v1889_v12 = vsel %vm1863_vm12, %v1128_v43, %v3191_v2  ;;  %v2781_v53 = vunpack.i.h.bf16 %v5078_v4  ;;  %v2780_v43 = vunpack.i.l.bf16 %v5078_v4  ;;  %v5084_v4 = vld [vmem:[#allocation2_spill] sm:$0xff] }
 0x187   : > { %v1897_v52 = vpack.c.bf16 %v1889_v12, %v1888_v13  ;;  %v3199_v46 = vpop.permute.xlu1 %3198  ;;  %v5079_v13 = vld [vmem:[#allocation34_spill] sm:$0xff] }
 0x188   : > { %v3201_v33 = vunpack.i.h.bf16 %v3199_v46  ;;  %v3200_v29 = vunpack.i.l.bf16 %v3199_v46  ;;  %v2801_v12 = vunpack.i.h.bf16 %v5079_v13  ;;  %v1066_v59 = vsel %vm1063_vm9, %v1057_v16, %v2780_v43 }
 0x189   : > { %2121 = vmatprep.mubr.bf16.mxu0 %v1897_v52  ;;  %v2800_v52 = vunpack.i.l.bf16 %v5079_v13  ;;  %v1067_v27 = vsel %vm1063_vm9, %v1058_v57, %v2781_v53  ;;  %v2706_v13 = vunpack.i.h.bf16 %v5085_v19 }
 0x18a   : > { %2122 = vmatmul.mubr.bf16.vlgmr.msra.gmra.mrb[0].mxu0 %v1896_v63  ;;  %v1103_v58 = vsel %vm1099_vm14, %v1094_v62, %v3201_v33  ;;  %v1102_v24 = vsel %vm1099_vm14, %v1093_v48, %v3200_v29  ;;  %v3214_v63 = vpop.permute.xlu0 %3213  ;;  %v1076_v44 = vsel %vm1072_vm10, %v1067_v27, %v2801_v12  ;;  %v2705_v12 = vunpack.i.l.bf16 %v5085_v19  ;;  %v5093_v19 = vld [vmem:[#allocation9_spill] sm:$0xff] }
 0x18b   : > { %v3209_v51 = vpop.permute.xlu1 %3208  ;;  %v3216_v36 = vunpack.i.h.bf16 %v3214_v63  ;;  %v3215_v22 = vunpack.i.l.bf16 %v3214_v63  ;;  %v1111_v42 = vsel %vm1108_vm15, %v1102_v24, %v3205_v11  ;;  %v1112_v45 = vsel %vm1108_vm15, %v1103_v58, %v3206_v28  ;;  %v5082_v28 = vld [vmem:[#allocation16_spill] sm:$0xff] }
 0x18c   : > { %v3211_v23 = vunpack.i.h.bf16 %v3209_v51  ;;  %v3210_v55 = vunpack.i.l.bf16 %v3209_v51  ;;  %v1075_v30 = vsel %vm1072_vm10, %v1066_v59, %v2800_v52  ;;  %v1085_v25 = vsel %vm5016_vm11, %v1076_v44, %v2821_v5 }
 0x18d   : > { %v1084_v26 = vsel %vm5016_vm11, %v1075_v30, %v2820_v1  ;;  %vm2072_vm11 = vcmask 556032   ;;  %v2686_v11 = vunpack.i.h.bf16 %v5082_v28  ;;  %v2685_v58 = vunpack.i.l.bf16 %v5082_v28  ;;  %v5087_v30 = vld [vmem:[#allocation25_spill] sm:$0xff] }
 0x18e   : > { %v1120_v20 = vsel %vm1117_vm0, %v1111_v42, %v3210_v55  ;;  %v1121_v10 = vsel %vm1117_vm0, %v1112_v45, %v3211_v23  ;;  %v1899_v15 = vpack.c.bf16 %v1085_v25, %v1084_v26  ;;  %v4775_v29 = vpop.permute.xlu0 %3223  ;;  %v2746_v44 = vunpack.i.h.bf16 %v5087_v30  ;;  %v5088_v26 = vld [vmem:[#allocation29_spill] sm:$0xff] }
 0x18f   : > { %v1129_v38 = vsel %vm1126_vm1, %v1120_v20, %v3215_v22  ;;  %v1130_v39 = vsel %vm1126_vm1, %v1121_v10, %v3216_v36  ;;  %v3226_v24 = vunpack.i.h.bf16 %v4775_v29  ;;  %v3225_v23 = vunpack.i.l.bf16 %v4775_v29  ;;  %v5086_v20 = vld [vmem:[#allocation22_spill] sm:$0xff] }
 0x190   : > { %v2726_v10 = vunpack.i.h.bf16 %v5086_v20  ;;  %v2725_v59 = vunpack.i.l.bf16 %v5086_v20  ;;  %v2766_v25 = vunpack.i.h.bf16 %v5088_v26 }
 0x192   : > { %v3234_v51 = vpop.permute.xlu0 %3233 }
 0x193   : > { %v3236_v43 = vunpack.i.h.bf16 %v3234_v51  ;;  %v3235_v40 = vunpack.i.l.bf16 %v3234_v51 }
 0x196   : > { %v3244_v55 = vpop.permute.xlu0 %3243 }
 0x1a7   : > { %v3219_v46 = vpop.permute.xlu1 %3218 }
 0x1a8   : > { %v3221_v35 = vunpack.i.h.bf16 %v3219_v46  ;;  %v3220_v47 = vunpack.i.l.bf16 %v3219_v46 }
 0x1aa   : > { %v1890_v18 = vsel %vm1863_vm12, %v1129_v38, %v3220_v47  ;;  %v1891_v54 = vsel %vm1863_vm12, %v1130_v39, %v3221_v35  ;;  %v2745_v38 = vunpack.i.l.bf16 %v5087_v30  ;;  %v3254_v39 = vpop.permute.xlu0 %3253 }
 0x1ab   : > { %v3229_v34 = vpop.permute.xlu1 %3228  ;;  %v1900_v32 = vpack.c.bf16 %v1891_v54, %v1890_v18  ;;  %v2765_v18 = vunpack.i.l.bf16 %v5088_v26  ;;  %v3246_v54 = vunpack.i.h.bf16 %v3244_v55  ;;  %v3255_v51 = vunpack.i.l.bf16 %v3254_v39 }
 0x1ac   : > { %v3231_v0 = vunpack.i.h.bf16 %v3229_v34  ;;  %v3230_v17 = vunpack.i.l.bf16 %v3229_v34  ;;  %v3245_v34 = vunpack.i.l.bf16 %v3244_v55 }
 0x1ad   : > { %2129 = vmatprep.mubr.bf16.mxu0 %v1900_v32  ;;  %v5089_v32 = vld [vmem:[#allocation33_spill] sm:$0xff] }
 0x1ae   : > { %2130 = vmatmul.mubr.bf16.gmra.mrb[4].mxu0 %v1899_v15  ;;  %v1096_v52 = vsel %vm1090_vm13, %v3226_v24, %v3231_v0  ;;  %v1095_v63 = vsel %vm1090_vm13, %v3225_v23, %v3230_v17  ;;  %v2786_v15 = vunpack.i.h.bf16 %v5089_v32 }
 0x1af   : > { %v3239_v3 = vpop.permute.xlu1 %3238  ;;  %v1104_v27 = vsel %vm1099_vm14, %v1095_v63, %v3235_v40  ;;  %v1105_v46 = vsel %vm1099_vm14, %v1096_v52, %v3236_v43  ;;  %v5094_v52 = vld [vmem:[#allocation12_spill] sm:$0xff] }
 0x1b0   : > { %v3241_v16 = vunpack.i.h.bf16 %v3239_v3  ;;  %v3240_v57 = vunpack.i.l.bf16 %v3239_v3  ;;  %v2785_v3 = vunpack.i.l.bf16 %v5089_v32  ;;  %v2676_v63 = vunpack.i.h.bf16 %v5094_v52 }
 0x1b3   : > { %v3249_v6 = vpop.permute.xlu1 %3248 }
 0x1b4   : > { %v3251_v41 = vunpack.i.h.bf16 %v3249_v6  ;;  %v3250_v33 = vunpack.i.l.bf16 %v3249_v6  ;;  %v1113_v6 = vsel %vm1108_vm15, %v1104_v27, %v3240_v57 }
 0x1b6   : > { %v1864_v31 = vsel %vm1863_vm12, %v3190_v21, %v3250_v33  ;;  %v1865_v60 = vsel %vm1863_vm12, %v3191_v2, %v3251_v41  ;;  %v2645_v21 = vunpack.i.l.bf16 %v5080_v56  ;;  %v5081_v2 = vld [vmem:[#allocation13_spill] sm:$0xff]  ;;  %v1114_v41 = vsel %vm1108_vm15, %v1105_v46, %v3241_v16 }
 0x1b7   : > { %v3259_v50 = vpop.permute.xlu1 %3258  ;;  %v1898_v14 = vpack.c.bf16 %v1865_v60, %v1864_v31  ;;  %v2666_v62 = vunpack.i.h.bf16 %v5081_v2  ;;  %v2665_v48 = vunpack.i.l.bf16 %v5081_v2  ;;  %v5090_v31 = vld [vmem:[#allocation37_spill] sm:$0xff]  ;;  %v1123_v56 = vsel %vm1117_vm0, %v1114_v41, %v3246_v54 }
 0x1b8   : > { %v3261_v5 = vunpack.i.h.bf16 %v3259_v50  ;;  %v3260_v1 = vunpack.i.l.bf16 %v3259_v50  ;;  %v1005_v53 = vsel %vm1000_vm2, %v5084_v4, %v2645_v21  ;;  %v2806_v60 = vunpack.i.h.bf16 %v5090_v31  ;;  %v5096_v16 = vld [vmem:[#allocation5_spill] sm:$0xff] }
 0x1b9   : > { %2563 = vmatprep.mubr.msk.bf16.mxu1 %vm2072_vm11, %v1898_v14  ;;  %v1015_v36 = vsel %vm1009_vm3, %v1006_v8, %v2666_v62  ;;  %v1014_v22 = vsel %vm1009_vm3, %v1005_v53, %v2665_v48  ;;  %v2805_v50 = vunpack.i.l.bf16 %v5090_v31 }
 0x1ba   : > { %v1866_v49 = vsel %vm1863_vm12, %v3220_v47, %v3260_v1  ;;  %v1867_v61 = vsel %vm1863_vm12, %v3221_v35, %v3261_v5  ;;  %v1023_v42 = vsel %vm1018_vm4, %v1014_v22, %v2685_v58  ;;  %v1024_v45 = vsel %vm1018_vm4, %v1015_v36, %v2686_v11 }
 0x1bb   : > { %v1901_v7 = vpack.c.bf16 %v1867_v61, %v1866_v49  ;;  %v1032_v35 = vsel %vm1027_vm5, %v1023_v42, %v2705_v12  ;;  %v1033_v47 = vsel %vm1027_vm5, %v1024_v45, %v2706_v13  ;;  %v3256_v1 = vunpack.i.h.bf16 %v3254_v39  ;;  %v4839_v37 = vpop.permute.xlu1 %3268 }
 0x1bc   : > { %v1041_v33 = vsel %vm1036_vm6, %v1032_v35, %v2725_v59  ;;  %v1042_v29 = vsel %vm1036_vm6, %v1033_v47, %v2726_v10  ;;  %v2651_v13 = vunpack.i.h.bf16 %v5093_v19  ;;  %v2650_v12 = vunpack.i.l.bf16 %v5093_v19  ;;  %v5097_v59 = vld [vmem:[#allocation15_spill] sm:$0xff]  ;;  %v5098_v35 = vld [vmem:[#allocation18_spill] sm:$0xff] }
 0x1bd   : > { %2564 = vmatmul.mubr.msk.bf16.vlgmr.msra.gmra.mrb[0].mxu1 %vm2072_vm11, %v1901_v7  ;;  %v1050_v14 = vsel %vm5018_vm7, %v1041_v33, %v2745_v38  ;;  %v1051_v5 = vsel %vm5018_vm7, %v1042_v29, %v2746_v44  ;;  %v1122_v7 = vsel %vm1117_vm0, %v1113_v6, %v3245_v34  ;;  %v1132_v11 = vsel %vm1126_vm1, %v1123_v56, %v3256_v1 }
 0x1be   : > { %v1059_v49 = vsel %vm5017_vm8, %v1050_v14, %v2765_v18  ;;  %v1060_v61 = vsel %vm5017_vm8, %v1051_v5, %v2766_v25  ;;  %v1131_v28 = vsel %vm1126_vm1, %v1122_v7, %v3255_v51  ;;  %vm5091_vm8 = vcmask 982016   ;;  %v5100_v7 = vld [vmem:[#allocation24_spill] sm:$0xff] }
 0x1bf   : > { %v1068_v9 = vsel %vm1063_vm9, %v1059_v49, %v2785_v3  ;;  %v1069_v21 = vsel %vm1063_vm9, %v1060_v61, %v2786_v15  ;;  %vm5092_vm7 = vmmov %vm5091_vm8  ;;  %v3279_v36 = vpop.permute.xlu1 %3278  ;;  %v2675_v42 = vunpack.i.l.bf16 %v5094_v52  ;;  %v1007_v57 = vsel %vm1000_vm2, %v5096_v16, %v2650_v12  ;;  %v5099_v3 = vld [vmem:[#allocation21_spill] sm:$0xff] }
 0x1c0   : > { %v1077_v62 = vsel %vm1072_vm10, %v1068_v9, %v2805_v50  ;;  %v1078_v48 = vsel %vm1072_vm10, %v1069_v21, %v2806_v60  ;;  %v2691_v27 = vunpack.i.h.bf16 %v5097_v59  ;;  %v2690_v46 = vunpack.i.l.bf16 %v5097_v59 }
 0x1c1   : > { %v1086_v58 = vsel %vm5091_vm8, %v1077_v62, %v3225_v23  ;;  %v1087_v55 = vsel %vm5092_vm7, %v1078_v48, %v3226_v24  ;;  %v5095_v24 = vld [vmem:[#allocation6_spill] sm:$0xff]  ;;  %v2710_v47 = vunpack.i.l.bf16 %v5098_v35  ;;  %v3271_v30 = vunpack.i.h.bf16 %v4839_v37 }
 0x1c2   : > { %v1902_v40 = vpack.c.bf16 %v1087_v55, %v1086_v58  ;;  %v1008_v22 = vsel %vm1000_vm2, %v5095_v24, %v2651_v13  ;;  %v3270_v38 = vunpack.i.l.bf16 %v4839_v37  ;;  %v3281_v39 = vunpack.i.h.bf16 %v3279_v36 }
 0x1c3   : > { %v1017_v20 = vsel %vm1009_vm3, %v1008_v22, %v2676_v63  ;;  %v3289_v26 = vpop.permute.xlu1 %3288  ;;  %v1016_v54 = vsel %vm1009_vm3, %v1007_v57, %v2675_v42  ;;  %v2711_v34 = vunpack.i.h.bf16 %v5098_v35  ;;  %v3280_v15 = vunpack.i.l.bf16 %v3279_v36 }
 0x1c4   : > { %v2730_v6 = vunpack.i.l.bf16 %v5099_v3  ;;  %v1025_v31 = vsel %vm1018_vm4, %v1016_v54, %v2690_v46  ;;  %v1026_v60 = vsel %vm1018_vm4, %v1017_v20, %v2691_v27  ;;  %v2731_v1 = vunpack.i.h.bf16 %v5099_v3 }
 0x1c5   : > { %v1034_v5 = vsel %vm1027_vm5, %v1025_v31, %v2710_v47  ;;  %v1035_v61 = vsel %vm1027_vm5, %v1026_v60, %v2711_v34  ;;  %v2751_v56 = vunpack.i.h.bf16 %v5100_v7  ;;  %v2750_v9 = vunpack.i.l.bf16 %v5100_v7 }
 0x1c6   : > { %v3291_v48 = vunpack.i.h.bf16 %v3289_v26  ;;  %vm5104_vm2 = vcmask 588800   ;;  %vm5106_vm4 = vcmask 687104   ;;  %vm2248_vm8 = vcmask 24576  }
 0x1c7   : > { %vm5105_vm3 = vmmov %vm5104_vm2 }
 0x1c8   : > { %vm5107_vm5 = vmmov %vm5106_vm4 }
 0x1cb   : > { %v3264_v0 = vpop.permute.xlu0 %3263 }
 0x1cc   : > { %v3266_v17 = vunpack.i.h.bf16 %v3264_v0  ;;  %v3265_v2 = vunpack.i.l.bf16 %v3264_v0  ;;  %v1043_v0 = vsel %vm1036_vm6, %v1034_v5, %v2730_v6 }
 0x1cd   : > { %v1052_v12 = vsel %vm5104_vm2, %v1043_v0, %v2750_v9 }
 0x1ce   : > { %v1892_v8 = vsel %vm1863_vm12, %v1131_v28, %v3265_v2  ;;  %v1893_v4 = vsel %vm1863_vm12, %v1132_v11, %v3266_v17  ;;  %v3299_v28 = vpop.permute.xlu1 %3298  ;;  %v5102_v11 = vld [vmem:[#allocation32_spill] sm:$0xff] }
 0x1cf   : > { %v3274_v53 = vpop.permute.xlu0 %3273  ;;  %v1903_v43 = vpack.c.bf16 %v1893_v4, %v1892_v8  ;;  %v2791_v58 = vunpack.i.h.bf16 %v5102_v11  ;;  %v2790_v55 = vunpack.i.l.bf16 %v5102_v11  ;;  %v3290_v4 = vunpack.i.l.bf16 %v3289_v26 }
 0x1d0   : > { %v3276_v45 = vunpack.i.h.bf16 %v3274_v53  ;;  %v3275_v10 = vunpack.i.l.bf16 %v3274_v53  ;;  %v1044_v53 = vsel %vm1036_vm6, %v1035_v61, %v2731_v1  ;;  %v3301_v63 = vunpack.i.h.bf16 %v3299_v28  ;;  %vm5108_vm6 = vmmov %vm5092_vm7 }
 0x1d1   : > { %2137 = vmatprep.mubr.bf16.mxu0 %v1903_v43  ;;  %v5103_v43 = vld [vmem:[#allocation36_spill] sm:$0xff]  ;;  %v1053_v52 = vsel %vm5105_vm3, %v1044_v53, %v2751_v56  ;;  %v3300_v22 = vunpack.i.l.bf16 %v3299_v28  ;;  %vm5109_vm7 = vmmov %vm5108_vm6 }
 0x1d2   : > { %2138 = vmatmul.mubr.bf16.gmra.mrb[8].mxu0 %v1902_v40  ;;  %v1098_v32 = vsel %vm1090_vm13, %v3271_v30, %v3276_v45  ;;  %v1097_v41 = vsel %vm1090_vm13, %v3270_v38, %v3275_v10  ;;  %v2811_v40 = vunpack.i.h.bf16 %v5103_v43  ;;  %v2810_v19 = vunpack.i.l.bf16 %v5103_v43 }
 0x1d3   : > { %v3284_v23 = vpop.permute.xlu0 %3283  ;;  %v1107_v51 = vsel %vm1099_vm14, %v1098_v32, %v3281_v39  ;;  %v1106_v21 = vsel %vm1099_vm14, %v1097_v41, %v3280_v15 }
 0x1d4   : > { %v3286_v50 = vunpack.i.h.bf16 %v3284_v23  ;;  %v3285_v49 = vunpack.i.l.bf16 %v3284_v23 }
 0x1d6   : > { %v1116_v8 = vsel %vm1108_vm15, %v1107_v51, %v3286_v50  ;;  %v1115_v13 = vsel %vm1108_vm15, %v1106_v21, %v3285_v49 }
 0x1d7   : > { %v3294_v44 = vpop.permute.xlu0 %3293  ;;  %v1125_v24 = vsel %vm1117_vm0, %v1116_v8, %v3291_v48  ;;  %v1124_v16 = vsel %vm1117_vm0, %v1115_v13, %v3290_v4 }
 0x1d8   : > { %v3296_v25 = vunpack.i.h.bf16 %v3294_v44  ;;  %v3295_v18 = vunpack.i.l.bf16 %v3294_v44  ;;  %v1134_v35 = vsel %vm1126_vm1, %v1125_v24, %v3301_v63  ;;  %v1133_v26 = vsel %vm1126_vm1, %v1124_v16, %v3300_v22 }
 0x1da   : > { %v1868_v33 = vsel %vm1863_vm12, %v3265_v2, %v3295_v18  ;;  %v1869_v29 = vsel %vm1863_vm12, %v3266_v17, %v3296_v25  ;;  %v5101_v17 = vld [vmem:[#allocation28_spill] sm:$0xff] }
 0x1db   : > { %v1904_v14 = vpack.c.bf16 %v1869_v29, %v1868_v33  ;;  %v2771_v2 = vunpack.i.h.bf16 %v5101_v17  ;;  %v2770_v62 = vunpack.i.l.bf16 %v5101_v17 }
 0x1dd   : > { %2567 = vmatprep.mubr.msk.bf16.mxu1 %vm2072_vm11, %v1904_v14  ;;  %v1061_v36 = vsel %vm5106_vm4, %v1052_v12, %v2770_v62  ;;  %v1062_v23 = vsel %vm5107_vm5, %v1053_v52, %v2771_v2 }
 0x1de   : > { %v1070_v42 = vsel %vm1063_vm9, %v1061_v36, %v2790_v55  ;;  %v1071_v45 = vsel %vm1063_vm9, %v1062_v23, %v2791_v58 }
 0x1df   : > { %v1079_v27 = vsel %vm1072_vm10, %v1070_v42, %v2810_v19  ;;  %v1080_v46 = vsel %vm1072_vm10, %v1071_v45, %v2811_v40 }
 0x1e0   : > { %v1088_v39 = vsel %vm5108_vm6, %v1079_v27, %v3270_v38  ;;  %v1089_v54 = vsel %vm5109_vm7, %v1080_v46, %v3271_v30 }
 0x1e1   : > { %v1905_v6 = vpack.c.bf16 %v1089_v54, %v1088_v39 }
 0x1e2   : > { %v3309_v57 = vpop.permute.xlu1 %3308 }
 0x1e3   : > { %v3311_v10 = vunpack.i.h.bf16 %v3309_v57  ;;  %v3310_v59 = vunpack.i.l.bf16 %v3309_v57 }
 0x1e4   : > { %v3304_v20 = vpop.permute.xlu0 %3303 }
 0x1e5   : > { %v3306_v47 = vunpack.i.h.bf16 %v3304_v20  ;;  %v3305_v44 = vunpack.i.l.bf16 %v3304_v20  ;;  %v1871_v25 = vsel %vm1863_vm12, %v3310_v59, %v3311_v10  ;;  %v1895_v18 = vsel %vm1863_vm12, %v1134_v35, %v3310_v59 }
 0x1e7   : > { %v1870_v34 = vsel %vm1863_vm12, %v3305_v44, %v3306_v47  ;;  %v1894_v32 = vsel %vm1863_vm12, %v1133_v26, %v3305_v44 }
 0x1e8   : > { %v1907_v15 = vpack.c.bf16 %v1871_v25, %v1870_v34  ;;  %v1906_v3 = vpack.c.bf16 %v1895_v18, %v1894_v32 }
 0x1ea   : > { %2145 = vmatprep.mubr.bf16.mxu0 %v1906_v3  ;;  %2568 = vmatmul.mubr.msk.bf16.gmra.mrb[4].mxu1 %vm2072_vm11, %v1907_v15 }
 0x1eb   : > { %2146 = vmatmul.mubr.bf16.gmra.mrb[12].mxu0 %v1905_v6 }
 0x25d   : > { %v2520_v38 = vpop.f32.mrb[0].mxu0 }
 0x25e   : > { %v2521_v41 = vpop.f32.mrb[1].mxu0 }
 0x25f   : > { %v2522_v33 = vadd.f32 %v2521_v41, %v2520_v38  ;;  %v2523_v37 = vpop.f32.mrb[2].mxu0 }
 0x260   : > { %v2524_v29 = vpop.f32.mrb[3].mxu0 }
 0x261   : > { %v2525_v31 = vadd.f32 %v2524_v29, %v2523_v37 }
 0x281   : > { %v2526_v30 = vpop.f32.mrb[4].mxu0 }
 0x282   : > { %v2527_v60 = vpop.f32.mrb[5].mxu0 }
 0x283   : > { %v2528_v50 = vadd.f32 %v2527_v60, %v2526_v30  ;;  %v2529_v14 = vpop.f32.mrb[6].mxu0 }
 0x284   : > { %v2530_v5 = vpop.f32.mrb[7].mxu0 }
 0x285   : > { %v2531_v1 = vadd.f32 %v2530_v5, %v2529_v14 }
 0x290   : > { %v2565_v51 = vpop.f32.mrb[0].mxu1 }
 0x291   : > { %v2197_v49 = vadd.f32 %v2565_v51, %v2528_v50  ;;  %v2188_v61 = vpop.f32.mrb[1].mxu1 }
 0x292   : > { %v2189_v7 = vadd.f32 %v2522_v33, %v2188_v61  ;;  %v2566_v56 = vpop.f32.mrb[2].mxu1 }
 0x293   : > { %2221 = vst.msk [vmem:[%s4916_s27 + $0x10] sm:$0xff] %vm1090_vm13, %v2197_v49  ;;  %v2200_v9 = vadd.f32 %v2566_v56, %v2531_v1  ;;  %v2191_v21 = vpop.f32.mrb[3].mxu1  ;;  %v2252_v2 = vmul.f32 %v2197_v49, %v2197_v49  ;;  %v2230_v58 = vsel %vm1090_vm13, %v2197_v49, 0.0 }
 0x294   : > { %2219 = vst.msk [vmem:[%s4916_s27] sm:$0xff] %vm1090_vm13, %v2189_v7  ;;  %v2250_v0 = vmul.f32 %v2189_v7, %v2189_v7  ;;  %v2192_v17 = vadd.f32 %v2525_v31, %v2191_v21  ;;  %v2227_v62 = vsel %vm1090_vm13, %v2189_v7, 0.0 }
 0x295   : > { %2222 = vst.msk [vmem:[%s4916_s27 + $0x18] sm:$0xff] %vm1090_vm13, %v2200_v9  ;;  %v2253_v8 = vmul.f32 %v2200_v9, %v2200_v9  ;;  %v2261_v40 = vsel %vm1090_vm13, %v2252_v2, 0.0  ;;  %v2232_v19 = vsel %vm1090_vm13, %v2200_v9, 0.0 }
 0x296   : > { %2220 = vst.msk [vmem:[%s4916_s27 + $0x8] sm:$0xff] %vm1090_vm13, %v2192_v17  ;;  %v2228_v48 = vsel %vm1090_vm13, %v2192_v17, 0.0  ;;  %v2251_v28 = vmul.f32 %v2192_v17, %v2192_v17  ;;  %v2258_v55 = vsel %vm1090_vm13, %v2250_v0, 0.0 }
 0x297   : > { %v2229_v11 = vadd.f32 %v2228_v48, %v2227_v62  ;;  %v2263_v52 = vsel %vm1090_vm13, %v2253_v8, 0.0 }
 0x298   : > { %v2259_v4 = vsel %vm1090_vm13, %v2251_v28, 0.0 }
 0x299   : > { %v2231_v53 = vadd.f32 %v2230_v58, %v2229_v11  ;;  %v2260_v43 = vadd.f32 %v2259_v4, %v2258_v55 }
 0x29b   : > { %v2262_v13 = vadd.f32 %v2261_v40, %v2260_v43  ;;  %v2233_v12 = vadd.f32 %v2232_v19, %v2231_v53 }
 0x29d   : > { %v2264_v63 = vadd.f32 %v2263_v52, %v2262_v13 }
 0x2a5   : > { %v2532_v36 = vpop.f32.mrb[8].mxu0 }
 0x2a6   : > { %v2533_v23 = vpop.f32.mrb[9].mxu0 }
 0x2a7   : > { %v2534_v24 = vadd.f32 %v2533_v23, %v2532_v36  ;;  %v2535_v22 = vpop.f32.mrb[10].mxu0 }
 0x2a8   : > { %v2536_v42 = vpop.f32.mrb[11].mxu0 }
 0x2a9   : > { %v2537_v45 = vadd.f32 %v2536_v42, %v2535_v22 }
 0x2bd   : > { %v2569_v16 = vpop.f32.mrb[4].mxu1 }
 0x2be   : > { %v2538_v57 = vpop.f32.mrb[12].mxu0  ;;  %v2204_v20 = vpop.f32.mrb[5].mxu1 }
 0x2bf   : > { %v2205_v10 = vadd.f32 %v2534_v24, %v2204_v20  ;;  %v2539_v59 = vpop.f32.mrb[13].mxu0  ;;  %v2570_v27 = vpop.f32.mrb[6].mxu1 }
 0x2c0   : > { %v2540_v46 = vadd.f32 %v2539_v59, %v2538_v57  ;;  %v2541_v35 = vpop.f32.mrb[14].mxu0  ;;  %v2207_v47 = vpop.f32.mrb[7].mxu1 }
 0x2c1   : > { %2223 = vst.msk [vmem:[%s4916_s27 + $0x20] sm:$0xff] %vm1090_vm13, %v2205_v10  ;;  %v2234_v44 = vsel %vm1090_vm13, %v2205_v10, 0.0  ;;  %v2254_v39 = vmul.f32 %v2205_v10, %v2205_v10  ;;  %v2208_v26 = vadd.f32 %v2537_v45, %v2207_v47  ;;  %v2542_v25 = vpop.f32.mrb[15].mxu0 }
 0x2c2   : > { %v2235_v18 = vadd.f32 %v2234_v44, %v2233_v12  ;;  %v2213_v54 = vadd.f32 %v2569_v16, %v2540_v46  ;;  %v2543_v34 = vadd.f32 %v2542_v25, %v2541_v35 }
 0x2c3   : > { %v2265_v32 = vsel %vm1090_vm13, %v2254_v39, 0.0  ;;  %2224 = vst.msk [vmem:[%s4916_s27 + $0x28] sm:$0xff] %vm1090_vm13, %v2208_v26  ;;  %v2236_v15 = vsel %vm1090_vm13, %v2208_v26, 0.0  ;;  %v2255_v3 = vmul.f32 %v2208_v26, %v2208_v26 }
 0x2c4   : > { %v2266_v6 = vadd.f32 %v2265_v32, %v2264_v63  ;;  %2225 = vst.msk [vmem:[%s4916_s27 + $0x30] sm:$0xff] %vm1090_vm13, %v2213_v54  ;;  %v2238_v38 = vsel %vm1090_vm13, %v2213_v54, 0.0  ;;  %v2256_v41 = vmul.f32 %v2213_v54, %v2213_v54  ;;  %v2237_v33 = vadd.f32 %v2236_v15, %v2235_v18 }
 0x2c5   : > { %v2267_v37 = vsel %vm1090_vm13, %v2255_v3, 0.0  ;;  %v2216_v29 = vadd.f32 %v2570_v27, %v2543_v34 }
 0x2c6   : > { %v2269_v31 = vsel %vm1090_vm13, %v2256_v41, 0.0  ;;  %v2239_v30 = vadd.f32 %v2238_v38, %v2237_v33  ;;  %v2268_v60 = vadd.f32 %v2267_v37, %v2266_v6 }
 0x2c7   : > { %2226 = vst.msk [vmem:[%s4916_s27 + $0x38] sm:$0xff] %vm1090_vm13, %v2216_v29  ;;  %v2240_v50 = vsel %vm1090_vm13, %v2216_v29, 0.0  ;;  %v2257_v14 = vmul.f32 %v2216_v29, %v2216_v29 }
 0x2c8   : > { %v2270_v5 = vadd.f32 %v2269_v31, %v2268_v60  ;;  %v2241_v1 = vadd.f32 %v2240_v50, %v2239_v30 }
 0x2c9   : > { %v2271_v51 = vsel %vm1090_vm13, %v2257_v14, 0.0 }
 0x2ca   : > { %v2242_v49 = vrot.slane %v2241_v1, 4  ;;  %v2272_v61 = vadd.f32 %v2271_v51, %v2270_v5 }
 0x2cc   : > { %v2243_v7 = vadd.f32 %v2242_v49, %v2241_v1  ;;  %v2273_v56 = vrot.slane %v2272_v61, 4 }
 0x2ce   : > { %v2244_v9 = vrot.slane %v2243_v7, 2  ;;  %v2274_v21 = vadd.f32 %v2273_v56, %v2272_v61 }
 0x2d0   : > { %v2245_v0 = vadd.f32 %v2244_v9, %v2243_v7  ;;  %v2275_v17 = vrot.slane %v2274_v21, 2 }
 0x2d2   : > { %v2246_v2 = vrot.slane %v2245_v0, 1  ;;  %v2276_v62 = vadd.f32 %v2275_v17, %v2274_v21 }
 0x2d4   : > { %v2247_v48 = vadd.f32 %v2246_v2, %v2245_v0  ;;  %v2277_v28 = vrot.slane %v2276_v62, 1 }
 0x2d6   : > { %2249 = vst.msk [vmem:[%s363_s11] sm:$0x1] %vm2248_vm8, %v2247_v48  ;;  %v2278_v11 = vadd.f32 %v2277_v28, %v2276_v62 }
 0x2d8   : > { %2279 = vst.msk [vmem:[%s363_s11 + $0x1] sm:$0x1] %vm2248_vm8, %v2278_v11 }
 0x2d9 PF: > { %s16_s22 = sadd.s32 1, %s3371_s22   ;;  %s5110_s18 = smov %s3363_s20 }
 0x2da   : > { %p13_p10 = scmp.ge.s32.totalorder %s16_s22, 18   ;;  %s5111_s19 = smov %s3367_s21 }
 0x2db   : > { %s5112_s20 = smov %s5115_s23  ;;  %s5113_s21 = smov %s5119_s24 }
 0x2dc   :  { %15 = sbr.rel (!%p13_p10) target bundleno = 3 (0x3), region = 84 }

// kernel: up3d_forward.3
= control target key start
LH: loop header
LB: loop body
LE: loop exit
PB: predicated region body
PF: predicated region fallthrough
CT: control target
= control target key end

     0   :  { %s3113_s18 = smov 0   ;;  %s3115_s19 = smov 0   ;;  %s4679_s0 = inlined_call_operand.vmem [shape: bf16[2,10,10,10,4], index: 0, kind: input, shape index: {}, may-alias: {0,1,2}]   ;;  %s4680_s1 = inlined_call_operand.vmem [shape: bf16[2,10,10,10,4], index: 1, kind: input, shape index: {}, may-alias: {0,1,2}]   ;;  %s4681_s2 = inlined_call_operand.vmem [shape: bf16[2,10,10,10,4], index: 2, kind: input, shape index: {}, may-alias: {0,1,2}]   ;;  %s4682_s3 = inlined_call_operand.vmem [shape: bf16[108,4], index: 3, kind: input, shape index: {}]   ;;  %s4683_s4 = inlined_call_operand.vmem [shape: f32[2,8,64,4], index: 4, kind: output, shape index: {0}]   ;;  %s4684_s5 = inlined_call_operand.vmem [shape: f32[2,8,2,4], index: 5, kind: output, shape index: {1}]  }
   0x1   :  { %s3117_s20 = smov 0   ;;  %s3119_s21 = smov 0  }
   0x2   :  { %s3121_s22 = smov 0  }
   0x3 LB: > { %s25_s23 = sadd.s32 1, %s3057_s20  ;;  %s28_s24 = sadd.s32 1, %s3061_s21  ;;  %s3065_s22 = sphi %s3121_s22, %s16_s22   ;;  %s3061_s21 = sphi %s3119_s21, %s4832_s21   ;;  %s3057_s20 = sphi %s3117_s20, %s4831_s20   ;;  %s3053_s19 = sphi %s3115_s19, %s4830_s19   ;;  %s3049_s18 = sphi %s3113_s18, %s4829_s18  }
   0x4   : > { %p26_p0 = scmp.ge.s32.totalorder %s25_s23, 8  ;;  %p2229_p1 = scmp.ge.s32.totalorder %s3065_s22, 1 }
   0x5   : > { %p252_p2 = scmp.lt.s32.totalorder %s3065_s22, 17 }
   0x6   : > { %s4834_s23 = smov (%p26_p0, %s25_s23), 0  ;;  %s4836_s24 = smov (!%p26_p0, %s28_s24), %s3061_s21 }
   0x7   : > { %p253_p3 = pnand %p2229_p1, %p252_p2  ;;  %p30_p4 = scmp.ge.s32.totalorder %s4836_s24, 2 }
   0x9   : > { %s4838_s24 = smov (%p30_p4, %s4836_s24), 0  ;;  %256 = sbr.rel (%p253_p3) target bundleno = 726 (0x2d6), region = 36 }
  0x10   : > { %p316_p5 = scmp.lt.s32.totalorder %s3053_s19, 1  ;;  %p318_p6 = scmp.lt.s32.totalorder %s3049_s18, 9  ;;  %vm501_vm0 = vcmask 1046528   ;;  %vm550_vm1 = vcmask 1045504   ;;  %vm1000_vm2 = vcmask 31744   ;;  %vm1009_vm3 = vcmask 64512  }
  0x11   : > { %s325_s8 = sadd.s32 1, %s3049_s18  ;;  %s3067_s10 = smov 4   ;;  %vm1018_vm4 = vcmask 97280   ;;  %vm1027_vm5 = vcmask 130048   ;;  %vm1036_vm6 = vcmask 162816   ;;  %vm1045_vm7 = vcmask 195584  }
  0x12   : > { %s4840_s19 = smov (!%p316_p5, %s3053_s19), 1  ;;  %p3219_p7 = scmp.lt.s32.totalorder %s325_s8, 9  ;;  %vm1054_vm8 = vcmask 228352   ;;  %vm4730_vm9 = vcmask 261120   ;;  %vm1072_vm10 = vcmask 293888   ;;  %vm1081_vm11 = vcmask 326656  }
  0x13   : > { %s319_s25 = scalar_select %p318_p6, %s3049_s18, 9  ;;  %vm1090_vm12 = vcmask 359424   ;;  %vm1099_vm13 = vcmask 392192   ;;  %vm1108_vm14 = vcmask 424960   ;;  %vm1117_vm15 = vcmask 457728  }
  0x14   : > { %s3150_s26 = smul.u32 200, %s4840_s19  ;;  %s4842_s8 = smov (!%p3219_p7, %s325_s8), 9 }
  0x15   : > { %s2300_s27 = smul.u32 20, %s319_s25  ;;  %s3068_s13 = smov 8  }
  0x16   : > { %s2302_s11 = smul.u32 20, %s4842_s8  ;;  %s3069_s25 = smov 12  }
  0x17   : > { %s322_s28 = sadd.s32 %s3150_s26, %s2300_s27  ;;  %s3070_s27 = smov 16  }
  0x18   : > { %s2230_s29 = sshll.u32 %s322_s28, 2  ;;  %s332_s12 = sadd.s32 %s2302_s11, %s3150_s26 }
  0x19   : > { %s3156_s7 = scalar_lea.vmem %s4679_s0, %s2230_s29  ;;  %s2231_s14 = sshll.u32 %s332_s12, 2 }
  0x1a   : > { %v373_v0 = vld [vmem:[%s3156_s7 + $0x20] ss:$8 sps:$4 sm:$0xff]   ;;  %v3160_v1 = vld [vmem:[%s3156_s7 + $0x24] sm:$0x1]  ;;  %v3163_v2 = vld [vmem:[%s3156_s7 + $0x2c] sm:$0x1]  ;;  %s3323_s17 = scalar_lea.vmem %s4680_s1, %s2231_s14 }
  0x1b   : > { %v3165_v3 = vunpack.c.l.bf16 %v373_v0  ;;  %v394_v4 = vunpack.c.l.bf16 %v3160_v1  ;;  %v3168_v5 = vunpack.c.h.bf16 %v373_v0  ;;  %v396_v6 = vunpack.c.l.bf16 %v3163_v2  ;;  %v367_v7 = vld [vmem:[%s3156_s7 + $0x8] ss:$8 sps:$4 sm:$0xff]   ;;  %v3173_v8 = vld [vmem:[%s3156_s7 + $0xc] sm:$0x1]  ;;  %v370_v9 = vld [vmem:[%s3156_s7 + $0x14] sm:$0x1] }
  0x1c   : > { %v3176_v10 = vunpack.c.l.bf16 %v367_v7  ;;  %v388_v11 = vunpack.c.l.bf16 %v3173_v8  ;;  %v3179_v12 = vunpack.c.h.bf16 %v367_v7  ;;  %v365_v13 = vld [vmem:[%s3156_s7] ss:$48 sps:$4 sm:$0xff]   ;;  %v366_v14 = vld [vmem:[%s3156_s7 + $0x4] sm:$0x1]  ;;  %v390_v19 = vunpack.c.l.bf16 %v370_v9  ;;  %v378_v23 = vld [vmem:[%s3156_s7 + $0x34] sm:$0x1] }
  0x1d   : > { %4731 = vst [vmem:[#allocation2_spill] sm:$0xff] %v3165_v3  ;;  %4732 = vst [vmem:[#allocation3_spill] sm:$0xff] %v3168_v5  ;;  %v514_v15 = vrot.slane %v3165_v3, 1  ;;  %v515_v16 = vrot.slane %v394_v4, 1  ;;  %v517_v17 = vrot.slane %v3168_v5, 1  ;;  %v518_v18 = vrot.slane %v396_v6, 1 }
  0x1e   : > { %4733 = vst [vmem:[#allocation4_spill] sm:$0xff] %v3176_v10  ;;  %4734 = vst [vmem:[#allocation5_spill] sm:$0xff] %v3179_v12  ;;  %v505_v20 = vrot.slane %v3176_v10, 1  ;;  %v506_v21 = vrot.slane %v388_v11, 1  ;;  %v508_v22 = vrot.slane %v3179_v12, 1  ;;  %v3199_v26 = vunpack.c.l.bf16 %v365_v13  ;;  %s3071_s28 = smov 20  }
  0x1f   : > { %v3194_v24 = vsel %vm501_vm0, %v514_v15, %v515_v16  ;;  %v3197_v25 = vsel %vm501_vm0, %v517_v17, %v518_v18  ;;  %v386_v27 = vunpack.c.l.bf16 %v366_v14  ;;  %v3202_v28 = vld [vmem:[%s3156_s7 + $0x38] ss:$8 sps:$4 sm:$0xff]   ;;  %v380_v29 = vld [vmem:[%s3156_s7 + $0x3c] sm:$0x1]  ;;  %v509_v32 = vrot.slane %v390_v19, 1  ;;  %s3072_s29 = smov 24  }
  0x20   : > { %4735 = vst [vmem:[#allocation6_spill] sm:$0xff] %v3199_v26  ;;  %v3207_v30 = vpack.i.bf16 %v3197_v25, %v3194_v24  ;;  %v3210_v31 = vsel %vm501_vm0, %v505_v20, %v506_v21  ;;  %v3212_v33 = vunpack.c.h.bf16 %v365_v13  ;;  %v3215_v34 = vld [vmem:[%s3156_s7 + $0x18] ss:$48 sps:$4 sm:$0xff]   ;;  %v502_v35 = vrot.slane %v3199_v26, 1  ;;  %v372_v39 = vld [vmem:[%s3156_s7 + $0x1c] sm:$0x1] }
  0x21   : > { %v503_v36 = vrot.slane %v386_v27, 1  ;;  %v398_v37 = vunpack.c.l.bf16 %v378_v23  ;;  %v3225_v38 = vunpack.c.l.bf16 %v3202_v28  ;;  %v400_v40 = vunpack.c.l.bf16 %v380_v29  ;;  %s336_s30 = sadd.s32 2, %s3049_s18  ;;  %s3073_s6 = smov 28  }
  0x22   : > { %4736 = vst [vmem:[#allocation7_spill] sm:$0xff] %v3212_v33  ;;  %2371 = vrot.lane.b32.xlu1 %v3207_v30, %s3067_s10  ;;  %v520_v41 = vrot.slane %v3212_v33, 1  ;;  %v3232_v42 = vunpack.c.l.bf16 %v3215_v34  ;;  %v3235_v43 = vsel %vm501_vm0, %v508_v22, %v509_v32  ;;  %v392_v49 = vunpack.c.l.bf16 %v372_v39  ;;  %p339_p8 = scmp.lt.s32.totalorder %s336_s30, 9  ;;  %s3074_s8 = smov 32  }
  0x23   : > { %4738 = vst [vmem:[#allocation8_spill] sm:$0xff] %v3225_v38  ;;  %v504_v44 = vsel %vm501_vm0, %v502_v35, %v503_v36  ;;  %v521_v45 = vrot.slane %v398_v37, 1  ;;  %v523_v46 = vrot.slane %v3225_v38, 1  ;;  %v524_v48 = vrot.slane %v400_v40, 1  ;;  %v382_v35 = vld [vmem:[%s3156_s7 + $0x44] sm:$0x1] }
  0x24   : > { %4739 = vst [vmem:[#allocation9_spill] sm:$0xff] %v3232_v42  ;;  %v2360_v47 = vpack.i.bf16 %v3210_v31, %v504_v44  ;;  %v511_v50 = vrot.slane %v3232_v42, 1  ;;  %v557_v52 = vrot.slane %v3179_v12, 2  ;;  %v558_v53 = vrot.slane %v390_v19, 2  ;;  %v3337_v44 = vld [vmem:[%s3323_s17] ss:$8 sps:$4 sm:$0xff]  }
  0x25   : > { %v3248_v51 = vsel %vm501_vm0, %v520_v41, %v521_v45  ;;  %v560_v54 = vrot.slane %v3232_v42, 2  ;;  %v3254_v55 = vsel %vm501_vm0, %v523_v46, %v524_v48  ;;  %v512_v56 = vrot.slane %v392_v49, 1  ;;  %v3334_v41 = vld [vmem:[%s3323_s17 + $0x10] ss:$8 sps:$4 sm:$0xff]   ;;  %v410_v46 = vld [vmem:[%s3323_s17 + $0x14] sm:$0x1] }
  0x26   : > { %2361 = vrot.lane.b32.xlu0 %v2360_v47, %s3067_s10  ;;  %v561_v57 = vrot.slane %v392_v49, 2  ;;  %v551_v58 = vrot.slane %v3199_v26, 2  ;;  %v3259_v59 = vpack.i.bf16 %v3254_v55, %v3248_v51  ;;  %v3262_v60 = vsel %vm550_vm1, %v557_v52, %v558_v53  ;;  %v3344_v47 = vld [vmem:[%s3323_s17 + $0xc] sm:$0x1]  ;;  %s4844_s30 = smov (!%p339_p8, %s336_s30), 9  ;;  %s3075_s11 = smov 36  }
  0x27   : > { %v552_v61 = vrot.slane %v386_v27, 2  ;;  %v554_v62 = vrot.slane %v3176_v10, 2  ;;  %v513_v63 = vsel %vm501_vm0, %v511_v50, %v512_v56  ;;  %v555_v7 = vrot.slane %v388_v11, 2  ;;  %s3076_s16 = smov 40   ;;  %p349_p9 = scmp.lt.s32.totalorder %s3049_s18, 7 }
  0x28   : > { %v3267_v0 = vsel %vm550_vm1, %v560_v54, %v561_v57  ;;  %v569_v8 = vrot.slane %v3212_v33, 2  ;;  %2376 = vrot.lane.b32.xlu1 %v3259_v59, %s3067_s10  ;;  %v3274_v9 = vpack.i.bf16 %v513_v63, %v3235_v43  ;;  %v570_v15 = vrot.slane %v398_v37, 2 }
  0x29   : > { %v3278_v13 = vpack.i.bf16 %v3267_v0, %v3262_v60  ;;  %v553_v14 = vsel %vm550_vm1, %v551_v58, %v552_v61  ;;  %v3282_v16 = vsel %vm550_vm1, %v554_v62, %v555_v7  ;;  %v572_v11 = vrot.slane %v3225_v38, 2  ;;  %s4846_s18 = smov (!%p349_p9, %s3049_s18), 7 }
  0x2a   : > { %v573_v17 = vrot.slane %v400_v40, 2  ;;  %v563_v18 = vrot.slane %v3165_v3, 2  ;;  %2366 = vrot.lane.b32.xlu0 %v3274_v9, %s3067_s10  ;;  %v2380_v19 = vpack.i.bf16 %v3282_v16, %v553_v14  ;;  %v3290_v20 = vsel %vm550_vm1, %v569_v8, %v570_v15 }
  0x2b   : > { %v564_v21 = vrot.slane %v394_v4, 2  ;;  %v566_v22 = vrot.slane %v3168_v5, 2  ;;  %v567_v27 = vrot.slane %v396_v6, 2  ;;  %v2405_v2 = vpack.i.bf16 %v3165_v3, %v3232_v42 }
  0x2c   : > { %v3296_v23 = vsel %vm550_vm1, %v572_v11, %v573_v17  ;;  %2386 = vrot.lane.b32.xlu1 %v3278_v13, %s3068_s13  ;;  %v3318_v6 = vunpack.c.h.bf16 %v3202_v28  ;;  %v402_v36 = vunpack.c.l.bf16 %v382_v35  ;;  %v2395_v37 = vpack.i.bf16 %v3179_v12, %v3176_v10  ;;  %v384_v17 = vld [vmem:[%s3156_s7 + $0x4c] sm:$0x1]  ;;  %v412_v35 = vld [vmem:[%s3323_s17 + $0x1c] sm:$0x1]  ;;  %s2303_s7 = smul.u32 20, %s4844_s30 }
  0x2d   : > { %v3305_v29 = vpack.i.bf16 %v3296_v23, %v3290_v20  ;;  %v565_v1 = vsel %vm550_vm1, %v563_v18, %v564_v21  ;;  %v568_v4 = vsel %vm550_vm1, %v566_v22, %v567_v27  ;;  %v2410_v45 = vpack.i.bf16 %v3212_v33, %v3168_v5 }
  0x2e   : > { %2381 = vrot.lane.b32.xlu0 %v2380_v19, %s3068_s13  ;;  %v3310_v32 = vpack.i.bf16 %v568_v4, %v565_v1  ;;  %v2415_v28 = vpack.i.bf16 %v3318_v6, %v3225_v38  ;;  %v625_v39 = vrot.slane %v3318_v6, 1  ;;  %v626_v40 = vrot.slane %v402_v36, 1  ;;  %s343_s9 = sadd.s32 %s2303_s7, %s3150_s26  ;;  %s3080_s7 = smov 56  }
  0x2f   : > { %v2425_v48 = vpack.i.bf16 %v3194_v24, %v513_v63  ;;  %v3349_v49 = vunpack.c.l.bf16 %v3334_v41  ;;  %v3352_v50 = vunpack.c.h.bf16 %v3337_v44  ;;  %v3355_v53 = vunpack.c.l.bf16 %v410_v46  ;;  %s2232_s26 = sshll.u32 %s343_s9, 2 }
  0x30   : > { %2401 = vrot.lane.b32.xlu1 %v3305_v29, %s3068_s13  ;;  %v627_v52 = vsel %vm501_vm0, %v625_v39, %v626_v40  ;;  %v2420_v54 = vpack.i.bf16 %v3235_v43, %v3210_v31  ;;  %v428_v57 = vunpack.c.l.bf16 %v3344_v47  ;;  %v652_v31 = vrot.slane %v3318_v6, 2  ;;  %s3475_s15 = scalar_lea.vmem %s4681_s2, %s2232_s26  ;;  %s3081_s26 = smov 60  }
  0x31   : > { %v805_v56 = vrot.slane %v3349_v49, 1  ;;  %v802_v24 = vrot.slane %v3352_v50, 1  ;;  %v806_v58 = vrot.slane %v3355_v53, 1  ;;  %v2435_v61 = vpack.i.bf16 %v627_v52, %v3254_v55 }
  0x32   : > { %2391 = vrot.lane.b32.xlu0 %v3310_v32, %s3068_s13  ;;  %v803_v62 = vrot.slane %v428_v57, 1  ;;  %v653_v43 = vrot.slane %v402_v36, 2  ;;  %v2430_v63 = vpack.i.bf16 %v3248_v51, %v3197_v25  ;;  %v2445_v14 = vpack.i.bf16 %v565_v1, %v3267_v0 }
  0x33   : > { %v3375_v7 = vsel %vm501_vm0, %v805_v56, %v806_v58  ;;  %v2440_v25 = vpack.i.bf16 %v3262_v60, %v3282_v16  ;;  %v2450_v11 = vpack.i.bf16 %v3290_v20, %v568_v4  ;;  %v2465_v0 = vpack.i.bf16 %v3168_v5, %v3165_v3  ;;  %v414_v56 = vld [vmem:[%s3323_s17 + $0x24] sm:$0x1] }
  0x34   : > { %2406 = vrot.lane.b32.xlu1 %v2405_v2, %s3069_s25  ;;  %v3378_v8 = vsel %vm501_vm0, %v802_v24, %v803_v62  ;;  %v654_v15 = vsel %vm550_vm1, %v652_v31, %v653_v43  ;;  %v403_v18 = vunpack.c.h.bf16 %v3215_v34  ;;  %v404_v19 = vunpack.c.l.bf16 %v384_v17 }
  0x35   : > { %v2455_v51 = vpack.i.bf16 %v654_v15, %v3296_v23  ;;  %v2460_v60 = vpack.i.bf16 %v3232_v42, %v3179_v12  ;;  %v2470_v22 = vpack.i.bf16 %v3225_v38, %v3212_v33  ;;  %v3421_v2 = vunpack.c.h.bf16 %v3334_v41 }
  0x36   : > { %2396 = vrot.lane.b32.xlu0 %v2395_v37, %s3069_s25  ;;  %v2475_v16 = vpack.i.bf16 %v403_v18, %v3318_v6  ;;  %v705_v20 = vrot.slane %v403_v18, 1  ;;  %v706_v21 = vrot.slane %v404_v19, 1  ;;  %v732_v27 = vrot.slane %v403_v18, 2  ;;  %v417_v6 = vld [vmem:[%s3323_s17 + $0x30] ss:$8 sps:$4 sm:$0xff]  }
  0x37   : > { %v733_v1 = vrot.slane %v404_v19, 2  ;;  %v3427_v36 = vunpack.c.l.bf16 %v412_v35  ;;  %v413_v37 = vld [vmem:[%s3323_s17 + $0x20] ss:$8 sps:$4 sm:$0xff]   ;;  %v3442_v39 = vunpack.c.l.bf16 %v417_v6  ;;  %v3444_v40 = vunpack.c.h.bf16 %v417_v6  ;;  %v446_v6 = vld [vmem:[%s3475_s15 + $0x4] sm:$0x1] }
  0x38   : > { %2416 = vrot.lane.b32.xlu1 %v2415_v28, %s3069_s25  ;;  %v707_v34 = vsel %vm501_vm0, %v705_v20, %v706_v21  ;;  %v3454_v46 = vunpack.c.h.bf16 %v413_v37  ;;  %v3483_v43 = vunpack.c.l.bf16 %v414_v56  ;;  %v2550_v20 = vpack.i.bf16 %v806_v58, %v3375_v7 }
  0x39   : > { %v2495_v23 = vpack.i.bf16 %v707_v34, %v627_v52  ;;  %v734_v4 = vsel %vm550_vm1, %v732_v27, %v733_v1  ;;  %v809_v41 = vrot.slane %v3427_v36, 1 }
  0x3a   : > { %2411 = vrot.lane.b32.xlu0 %v2410_v45, %s3069_s25  ;;  %v3452_v45 = vunpack.c.l.bf16 %v413_v37  ;;  %v812_v17 = vrot.slane %v3483_v43, 1 }
  0x3c   : > { %2426 = vrot.lane.b32.xlu1 %v2425_v48, %s3070_s27  ;;  %v416_v48 = vld [vmem:[%s3323_s17 + $0x2c] sm:$0x1]  ;;  %v3480_v62 = vpack.i.bf16 %v3454_v46, %v3452_v45 }
  0x3e   : > { %2421 = vrot.lane.b32.xlu0 %v2420_v54, %s3070_s27 }
  0x40   : > { %2436 = vrot.lane.b32.xlu1 %v2435_v61, %s3070_s27  ;;  %v3470_v61 = vunpack.c.l.bf16 %v416_v48  ;;  %v466_v48 = vunpack.c.l.bf16 %v446_v6 }
  0x42   : > { %2431 = vrot.lane.b32.xlu0 %v2430_v63, %s3070_s27 }
  0x44   : > { %2446 = vrot.lane.b32.xlu1 %v2445_v14, %s3071_s28  ;;  %v814_v14 = vrot.slane %v3454_v46, 1 }
  0x46   : > { %2441 = vrot.lane.b32.xlu0 %v2440_v25, %s3071_s28  ;;  %v449_v25 = vld [vmem:[%s3475_s15 + $0x10] ss:$8 sps:$4 sm:$0xff]  }
  0x47   : > { %v3500_v19 = vunpack.c.l.bf16 %v449_v25 }
  0x48   : > { %2456 = vrot.lane.b32.xlu1 %v2455_v51, %s3071_s28 }
  0x49   : > { %v1197_v27 = vrot.slane %v3500_v19, 7 }
  0x4a   : > { %2451 = vrot.lane.b32.xlu0 %v2450_v11, %s3071_s28  ;;  %v811_v11 = vrot.slane %v3452_v45, 1 }
  0x4c   : > { %2466 = vrot.lane.b32.xlu1 %v2465_v0, %s3072_s29  ;;  %v445_v0 = vld [vmem:[%s3475_s15] ss:$8 sps:$4 sm:$0xff]   ;;  %v3514_v34 = vsel %vm501_vm0, %v811_v11, %v812_v17 }
  0x4d   : > { %v465_v21 = vunpack.c.l.bf16 %v445_v0  ;;  %v2560_v58 = vpack.i.bf16 %v812_v17, %v3514_v34  ;;  %v1284_v17 = vrot.slane %v466_v48, 1 }
  0x4e   : > { %2461 = vrot.lane.b32.xlu0 %v2460_v60, %s3072_s29  ;;  %v3502_v60 = vunpack.c.h.bf16 %v449_v25 }
  0x4f   : > { %v1195_v35 = vrot.slane %v465_v21, 7  ;;  %v2580_v47 = vpack.i.bf16 %v466_v48, %v465_v21  ;;  %v1283_v11 = vrot.slane %v465_v21, 1  ;;  %v1289_v21 = vrot.slane %v3500_v19, 1 }
  0x50   : > { %2476 = vrot.lane.b32.xlu1 %v2475_v16, %s3072_s29  ;;  %v1198_v1 = vrot.slane %v3502_v60, 7 }
  0x52   : > { %2471 = vrot.lane.b32.xlu0 %v2470_v22, %s3072_s29  ;;  %v3511_v22 = vunpack.c.h.bf16 %v445_v0  ;;  %v3526_v37 = vpack.i.bf16 %v1198_v1, %v1197_v27 }
  0x54   : > { %2486 = vrot.lane.b32.xlu1 %v3207_v30, %s3073_s6  ;;  %v2515_v30 = vpack.i.bf16 %v734_v4, %v654_v15  ;;  %v815_v15 = vrot.slane %v3470_v61, 1  ;;  %v448_v4 = vld [vmem:[%s3475_s15 + $0xc] sm:$0x1]  ;;  %v1286_v25 = vrot.slane %v3511_v22, 1 }
  0x56   : > { %2481 = vrot.lane.b32.xlu0 %v3274_v9, %s3073_s6  ;;  %v3424_v9 = vld [vmem:[%s3323_s17 + $0x4] sm:$0x1]  ;;  %v3505_v16 = vsel %vm501_vm0, %v814_v14, %v815_v15 }
  0x57   : > { %v426_v28 = vunpack.c.l.bf16 %v3424_v9 }
  0x58   : > { %2496 = vrot.lane.b32.xlu1 %v2495_v23, %s3073_s6  ;;  %v2565_v23 = vpack.i.bf16 %v815_v15, %v3505_v16 }
  0x59   : > { %v800_v54 = vrot.slane %v426_v28, 1  ;;  %v848_v56 = vrot.slane %v426_v28, 2 }
  0x5a   : > { %2491 = vrot.lane.b32.xlu0 %v3259_v59, %s3073_s6  ;;  %v3432_v59 = vunpack.c.l.bf16 %v3337_v44 }
  0x5c   : > { %2506 = vrot.lane.b32.xlu1 %v3310_v32, %s3074_s8  ;;  %v3440_v32 = vpack.i.bf16 %v3421_v2, %v3349_v49  ;;  %v2520_v44 = vpack.i.bf16 %v3352_v50, %v3432_v59  ;;  %v799_v52 = vrot.slane %v3432_v59, 1 }
  0x5e   : > { %2501 = vrot.lane.b32.xlu0 %v3278_v13, %s3074_s8  ;;  %v808_v13 = vrot.slane %v3421_v2, 1  ;;  %v801_v31 = vsel %vm501_vm0, %v799_v52, %v800_v54  ;;  %v450_v52 = vld [vmem:[%s3475_s15 + $0x14] sm:$0x1]  ;;  %v847_v54 = vrot.slane %v3432_v59, 2 }
  0x5f   : > { %v2540_v51 = vpack.i.bf16 %v3378_v8, %v801_v31  ;;  %v850_v31 = vrot.slane %v3352_v50, 2 }
  0x60   : > { %2516 = vrot.lane.b32.xlu1 %v2515_v30, %s3074_s8  ;;  %v3468_v24 = vsel %vm501_vm0, %v808_v13, %v809_v41  ;;  %v1196_v30 = vrot.slane %v3511_v22, 7  ;;  %v468_v13 = vunpack.c.l.bf16 %v448_v4  ;;  %v3542_v59 = vsel %vm550_vm1, %v847_v54, %v848_v56  ;;  %v454_v56 = vld [vmem:[%s3475_s15 + $0x24] sm:$0x1] }
  0x61   : > { %v2545_v63 = vpack.i.bf16 %v3468_v24, %v3375_v7  ;;  %v2555_v18 = vpack.i.bf16 %v809_v41, %v3468_v24  ;;  %v452_v41 = vld [vmem:[%s3475_s15 + $0x1c] sm:$0x1] }
  0x62   : > { %2511 = vrot.lane.b32.xlu0 %v3305_v29, %s3074_s8  ;;  %v3464_v29 = vpack.i.bf16 %v3444_v40, %v3442_v39  ;;  %v2585_v14 = vpack.i.bf16 %v468_v13, %v3511_v22  ;;  %v472_v15 = vunpack.c.l.bf16 %v452_v41 }
  0x64   : > { %2526 = vrot.lane.b32.xlu1 %v3440_v32, %s3075_s11  ;;  %v3552_v0 = vpack.i.bf16 %v472_v15, %v3502_v60  ;;  %v1293_v22 = vrot.slane %v472_v15, 1  ;;  %v418_v15 = vld [vmem:[%s3323_s17 + $0x34] sm:$0x1] }
  0x66   : > { %2521 = vrot.lane.b32.xlu0 %v2520_v44, %s3075_s11  ;;  %v2570_v44 = vpack.i.bf16 %v1196_v30, %v1195_v35 }
  0x68   : > { %2536 = vrot.lane.b32.xlu1 %v3464_v29, %s3075_s11 }
  0x6a   : > { %2531 = vrot.lane.b32.xlu0 %v3480_v62, %s3075_s11 }
  0x6c   : > { %2546 = vrot.lane.b32.xlu1 %v2545_v63, %s3076_s16  ;;  %v851_v63 = vrot.slane %v428_v57, 2  ;;  %v470_v57 = vunpack.c.l.bf16 %v450_v52 }
  0x6e   : > { %2541 = vrot.lane.b32.xlu0 %v2540_v51, %s3076_s16  ;;  %v1287_v51 = vrot.slane %v468_v13, 1  ;;  %v3545_v9 = vsel %vm550_vm1, %v850_v31, %v851_v63  ;;  %v3559_v4 = vpack.i.bf16 %v470_v57, %v3500_v19  ;;  %v1290_v35 = vrot.slane %v470_v57, 1 }
  0x6f   : > { %v2620_v31 = vpack.i.bf16 %v1197_v27, %v1196_v30  ;;  %v474_v63 = vunpack.c.l.bf16 %v454_v56  ;;  %v420_v30 = vld [vmem:[%s3323_s17 + $0x3c] sm:$0x1]  ;;  %v422_v56 = vld [vmem:[%s3323_s17 + $0x44] sm:$0x1] }
  0x70   : > { %2556 = vrot.lane.b32.xlu1 %v2555_v18, %s3067_s10  ;;  %v1288_v18 = vsel %vm501_vm0, %v1286_v25, %v1287_v51 }
  0x71   : > { %v2605_v6 = vpack.i.bf16 %v1287_v51, %v1288_v18 }
  0x72   : > { %2551 = vrot.lane.b32.xlu0 %v2550_v20, %s3067_s10  ;;  %v1292_v20 = vrot.slane %v3502_v60, 1 }
  0x74   : > { %2566 = vrot.lane.b32.xlu1 %v2565_v23, %s3067_s10  ;;  %v453_v23 = vld [vmem:[%s3475_s15 + $0x20] ss:$8 sps:$4 sm:$0xff]   ;;  %v1294_v60 = vsel %vm501_vm0, %v1292_v20, %v1293_v22 }
  0x75   : > { %v473_v13 = vunpack.c.l.bf16 %v453_v23  ;;  %v3570_v48 = vpack.i.bf16 %v1293_v22, %v1294_v60  ;;  %v3608_v22 = vunpack.c.h.bf16 %v453_v23  ;;  %v820_v60 = vrot.slane %v3444_v40, 1 }
  0x76   : > { %2561 = vrot.lane.b32.xlu0 %v2560_v58, %s3067_s10  ;;  %v1285_v58 = vsel %vm501_vm0, %v1283_v11, %v1284_v17  ;;  %v817_v11 = vrot.slane %v3442_v39, 1 }
  0x77   : > { %v2600_v41 = vpack.i.bf16 %v1284_v17, %v1285_v58  ;;  %v1199_v19 = vrot.slane %v473_v13, 7  ;;  %v3585_v25 = vpack.i.bf16 %v474_v63, %v473_v13  ;;  %v1295_v51 = vrot.slane %v473_v13, 1  ;;  %v3618_v13 = vld [vmem:[%s3323_s17 + $0x4c] sm:$0x1] }
  0x78   : > { %2576 = vrot.lane.b32.xlu1 %v3526_v37, %s3068_s13 }
  0x79   : > { %v2625_v54 = vpack.i.bf16 %v1199_v19, %v1198_v1  ;;  %v3587_v1 = vunpack.c.l.bf16 %v418_v15 }
  0x7a   : > { %2571 = vrot.lane.b32.xlu0 %v2570_v44, %s3068_s13  ;;  %v1291_v44 = vsel %vm501_vm0, %v1289_v21, %v1290_v35 }
  0x7b   : > { %v3573_v52 = vpack.i.bf16 %v1290_v35, %v1291_v44  ;;  %v818_v17 = vrot.slane %v3587_v1, 1  ;;  %v423_v35 = vld [vmem:[%s3323_s17 + $0x40] ss:$8 sps:$4 sm:$0xff]  }
  0x7c   : > { %2586 = vrot.lane.b32.xlu1 %v2585_v14, %s3069_s25 }
  0x7d   : > { %v3611_v58 = vsel %vm501_vm0, %v817_v11, %v818_v17 }
  0x7e   : > { %2581 = vrot.lane.b32.xlu0 %v2580_v47, %s3069_s25  ;;  %v1296_v47 = vrot.slane %v474_v63, 1  ;;  %v2675_v23 = vpack.i.bf16 %v818_v17, %v3611_v58 }
  0x80   : > { %2596 = vrot.lane.b32.xlu1 %v3552_v0, %s3069_s25  ;;  %v1297_v57 = vsel %vm501_vm0, %v1295_v51, %v1296_v47  ;;  %v3639_v51 = vunpack.c.l.bf16 %v423_v35 }
  0x81   : > { %v3606_v20 = vpack.i.bf16 %v1296_v47, %v1297_v57  ;;  %v3641_v47 = vunpack.c.l.bf16 %v422_v56 }
  0x82   : > { %2591 = vrot.lane.b32.xlu0 %v3559_v4, %s3069_s25  ;;  %v921_v56 = vrot.slane %v3639_v51, 1 }
  0x84   : > { %2606 = vrot.lane.b32.xlu1 %v2605_v6, %s3070_s27 }
  0x86   : > { %2601 = vrot.lane.b32.xlu0 %v2600_v41, %s3070_s27 }
  0x88   : > { %2616 = vrot.lane.b32.xlu1 %v3570_v48, %s3070_s27 }
  0x8a   : > { %2611 = vrot.lane.b32.xlu0 %v3573_v52, %s3070_s27 }
  0x8c   : > { %2626 = vrot.lane.b32.xlu1 %v2625_v54, %s3071_s28  ;;  %v4686_v54 = vrot.slane %v3608_v22, 7 }
  0x8e   : > { %2621 = vrot.lane.b32.xlu0 %v2620_v31, %s3071_s28  ;;  %v4685_v31 = vunpack.c.l.bf16 %v3618_v13  ;;  %v2685_v57 = vpack.i.bf16 %v4686_v54, %v1199_v19  ;;  %v457_v54 = vld [vmem:[%s3475_s15 + $0x30] ss:$8 sps:$4 sm:$0xff]  }
  0x90   : > { %2636 = vrot.lane.b32.xlu1 %v3559_v4, %s3072_s29  ;;  %v1137_v17 = vrot.slane %v4685_v31, 1 }
  0x92   : > { %2631 = vrot.lane.b32.xlu0 %v2585_v14, %s3072_s29  ;;  %v3602_v14 = vunpack.c.l.bf16 %v420_v30 }
  0x94   : > { %2646 = vrot.lane.b32.xlu1 %v3585_v25, %s3072_s29  ;;  %v3592_v27 = vpop.permute.xlu1 %2371  ;;  %v821_v41 = vrot.slane %v3602_v14, 1 }
  0x95   : > { %4740 = vst [vmem:[#allocation10_spill] sm:$0xff] %v3592_v27 }
  0x96   : > { %2641 = vrot.lane.b32.xlu0 %v3552_v0, %s3072_s29  ;;  %v3637_v15 = vsel %vm501_vm0, %v820_v60, %v821_v41 }
  0x97   : > { %v2680_v60 = vpack.i.bf16 %v821_v41, %v3637_v15 }
  0x98   : > { %v3600_v18 = vpop.permute.xlu0 %2361  ;;  %2656 = vrot.lane.b32.xlu1 %v3573_v52, %s3073_s6 }
  0x9a   : > { %2651 = vrot.lane.b32.xlu0 %v2605_v6, %s3073_s6  ;;  %v3614_v21 = vpop.permute.xlu1 %2376  ;;  %v3629_v6 = vunpack.c.h.bf16 %v423_v35 }
  0x9b   : > { %4741 = vst [vmem:[#allocation11_spill] sm:$0xff] %v3614_v21 }
  0x9c   : > { %v3622_v44 = vpop.permute.xlu0 %2366  ;;  %2666 = vrot.lane.b32.xlu1 %v3606_v20, %s3073_s6  ;;  %v1136_v11 = vrot.slane %v3629_v6, 1 }
  0x9e   : > { %2661 = vrot.lane.b32.xlu0 %v3570_v48, %s3073_s6  ;;  %v3634_v63 = vpop.permute.xlu1 %2386  ;;  %v1138_v19 = vsel %vm501_vm0, %v1136_v11, %v1137_v17 }
  0x9f   : > { %v2705_v41 = vpack.i.bf16 %v1137_v17, %v1138_v19 }
  0xa0   : > { %v3643_v30 = vpop.permute.xlu0 %2381  ;;  %2676 = vrot.lane.b32.xlu1 %v2675_v23, %s3067_s10  ;;  %v922_v23 = vrot.slane %v3641_v47, 1 }
  0xa1   : > { %4742 = vst [vmem:[#allocation12_spill] sm:$0xff] %v3643_v30 }
  0xa2   : > { %2671 = vrot.lane.b32.xlu0 %v3526_v37, %s3074_s8  ;;  %v3653_v35 = vpop.permute.xlu1 %2401  ;;  %v3666_v37 = vsel %vm501_vm0, %v921_v56, %v922_v23  ;;  %v3682_v56 = vunpack.c.l.bf16 %v457_v54 }
  0xa3   : > { %4743 = vst [vmem:[#allocation13_spill] sm:$0xff] %v3653_v35  ;;  %v2700_v11 = vpack.i.bf16 %v922_v23, %v3666_v37 }
  0xa4   : > { %v3658_v55 = vpop.permute.xlu0 %2391  ;;  %2686 = vrot.lane.b32.xlu1 %v2685_v57, %s3074_s8 }
  0xa5   : > { %4744 = vst [vmem:[#allocation14_spill] sm:$0xff] %v3658_v55  ;;  %v479_v55 = vunpack.c.h.bf16 %v457_v54 }
  0xa6   : > { %2681 = vrot.lane.b32.xlu0 %v2680_v60, %s3067_s10  ;;  %v3663_v31 = vpop.permute.xlu1 %2406  ;;  %v456_v60 = vld [vmem:[%s3475_s15 + $0x2c] sm:$0x1] }
  0xa7   : > { %4745 = vst [vmem:[#allocation15_spill] sm:$0xff] %v3663_v31  ;;  %v476_v17 = vunpack.c.l.bf16 %v456_v60  ;;  %v1202_v23 = vrot.slane %v479_v55, 7 }
  0xa8   : > { %v3668_v28 = vpop.permute.xlu0 %2396  ;;  %2696 = vrot.lane.b32.xlu1 %v3552_v0, %s3075_s11 }
  0xa9   : > { %4746 = vst [vmem:[#allocation16_spill] sm:$0xff] %v3668_v28  ;;  %v3696_v54 = vpack.i.bf16 %v476_v17, %v3608_v22  ;;  %v856_v28 = vrot.slane %v3421_v2, 2 }
  0xaa   : > { %2691 = vrot.lane.b32.xlu0 %v3559_v4, %s3075_s11  ;;  %v3675_v33 = vpop.permute.xlu1 %2416  ;;  %v1201_v4 = vrot.slane %v3682_v56, 7 }
  0xab   : > { %4747 = vst [vmem:[#allocation17_spill] sm:$0xff] %v3675_v33  ;;  %v1299_v33 = vrot.slane %v476_v17, 1  ;;  %v458_v17 = vld [vmem:[%s3475_s15 + $0x34] sm:$0x1] }
  0xac   : > { %v3679_v38 = vpop.permute.xlu0 %2411  ;;  %2706 = vrot.lane.b32.xlu1 %v2705_v41, %s3067_s10  ;;  %v3702_v60 = vpack.i.bf16 %v1202_v23, %v1201_v4 }
  0xad   : > { %4748 = vst [vmem:[#allocation18_spill] sm:$0xff] %v3679_v38  ;;  %v1298_v38 = vrot.slane %v3608_v22, 1 }
  0xae   : > { %2701 = vrot.lane.b32.xlu0 %v2700_v11, %s3067_s10  ;;  %v3685_v0 = vpop.permute.xlu1 %2426  ;;  %s3077_s10 = smov 44  }
  0xaf   : > { %4749 = vst [vmem:[#allocation19_spill] sm:$0xff] %v3685_v0 }
  0xb0   : > { %v3687_v19 = vpop.permute.xlu0 %2421  ;;  %2716 = vrot.lane.b32.xlu1 %v3585_v25, %s3075_s11 }
  0xb1   : > { %4750 = vst [vmem:[#allocation20_spill] sm:$0xff] %v3687_v19 }
  0xb2   : > { %2711 = vrot.lane.b32.xlu0 %v2685_v57, %s3068_s13  ;;  %v3693_v41 = vpop.permute.xlu1 %2436 }
  0xb3   : > { %4751 = vst [vmem:[#allocation21_spill] sm:$0xff] %v3693_v41  ;;  %v460_v41 = vld [vmem:[%s3475_s15 + $0x3c] sm:$0x1] }
  0xb4   : > { %v3698_v11 = vpop.permute.xlu0 %2431  ;;  %2726 = vrot.lane.b32.xlu1 %v3573_v52, %s3076_s16  ;;  %v480_v21 = vunpack.c.l.bf16 %v460_v41 }
  0xb5   : > { %4752 = vst [vmem:[#allocation22_spill] sm:$0xff] %v3698_v11  ;;  %v1300_v11 = vsel %vm501_vm0, %v1298_v38, %v1299_v33  ;;  %v478_v38 = vunpack.c.l.bf16 %v458_v17 }
  0xb6   : > { %2721 = vrot.lane.b32.xlu0 %v3696_v54, %s3075_s11  ;;  %v3707_v57 = vpop.permute.xlu1 %2446  ;;  %v2755_v35 = vpack.i.bf16 %v1299_v33, %v1300_v11 }
  0xb7   : > { %4753 = vst [vmem:[#allocation23_spill] sm:$0xff] %v3707_v57  ;;  %v1305_v57 = vrot.slane %v480_v21, 1  ;;  %v3739_v41 = vpack.i.bf16 %v478_v38, %v3682_v56  ;;  %v1302_v11 = vrot.slane %v478_v38, 1 }
  0xb8   : > { %v3709_v3 = vpop.permute.xlu0 %2441  ;;  %2736 = vrot.lane.b32.xlu1 %v3702_v60, %s3068_s13  ;;  %s3078_s13 = smov 48  }
  0xb9   : > { %4754 = vst [vmem:[#allocation24_spill] sm:$0xff] %v3709_v3 }
  0xba   : > { %2731 = vrot.lane.b32.xlu0 %v3570_v48, %s3076_s16  ;;  %v3717_v52 = vpop.permute.xlu1 %2456  ;;  %v3731_v48 = vpack.i.bf16 %v480_v21, %v479_v55 }
  0xbb   : > { %4755 = vst [vmem:[#allocation25_spill] sm:$0xff] %v3717_v52  ;;  %v1304_v52 = vrot.slane %v479_v55, 1 }
  0xbc   : > { %v3720_v5 = vpop.permute.xlu0 %2451  ;;  %2746 = vrot.lane.b32.xlu1 %v3696_v54, %s3069_s25 }
  0xbd   : > { %4756 = vst [vmem:[#allocation26_spill] sm:$0xff] %v3720_v5  ;;  %v461_v5 = vld [vmem:[%s3475_s15 + $0x40] ss:$8 sps:$4 sm:$0xff]   ;;  %v1306_v21 = vsel %vm501_vm0, %v1304_v52, %v1305_v57 }
  0xbe   : > { %2741 = vrot.lane.b32.xlu0 %v3585_v25, %s3069_s25  ;;  %v3726_v27 = vpop.permute.xlu1 %2466  ;;  %v1301_v25 = vrot.slane %v3682_v56, 1  ;;  %v481_v55 = vunpack.c.l.bf16 %v461_v5  ;;  %v3755_v56 = vpack.i.bf16 %v1305_v57, %v1306_v21  ;;  %v4766_v21 = vrot.slane %v3608_v22, 7 }
  0xbf   : > { %4757 = vst [vmem:[#allocation27_spill] sm:$0xff] %v3726_v27 }
  0xc0   : > { %v3728_v3 = vpop.permute.xlu0 %2461  ;;  %2756 = vrot.lane.b32.xlu1 %v2755_v35, %s3076_s16  ;;  %v1356_v38 = vrot.slane %v481_v55, 7 }
  0xc1   : > { %4758 = vst [vmem:[#allocation28_spill] sm:$0xff] %v3728_v3 }
  0xc2   : > { %2751 = vrot.lane.b32.xlu0 %v3606_v20, %s3076_s16  ;;  %v3736_v33 = vpop.permute.xlu1 %2476 }
  0xc3   : > { %4759 = vst [vmem:[#allocation29_spill] sm:$0xff] %v3736_v33  ;;  %v1303_v33 = vsel %vm501_vm0, %v1301_v25, %v1302_v11  ;;  %v2795_v25 = vpack.i.bf16 %v1356_v38, %v1202_v23 }
  0xc4   : > { %v3742_v17 = vpop.permute.xlu0 %2471  ;;  %2766 = vrot.lane.b32.xlu1 %v3731_v48, %s3069_s25  ;;  %v3761_v52 = vpack.i.bf16 %v1302_v11, %v1303_v33 }
  0xc5   : > { %4760 = vst [vmem:[#allocation30_spill] sm:$0xff] %v3742_v17 }
  0xc6   : > { %2761 = vrot.lane.b32.xlu0 %v3739_v41, %s3069_s25  ;;  %v3749_v3 = vpop.permute.xlu1 %2486 }
  0xc7   : > { %4761 = vst [vmem:[#allocation31_spill] sm:$0xff] %v3749_v3  ;;  %v462_v3 = vld [vmem:[%s3475_s15 + $0x44] sm:$0x1] }
  0xc8   : > { %v3752_v27 = vpop.permute.xlu0 %2481  ;;  %2776 = vrot.lane.b32.xlu1 %v2755_v35, %s3070_s27  ;;  %v482_v33 = vunpack.c.l.bf16 %v462_v3  ;;  %v483_v3 = vunpack.c.h.bf16 %v461_v5 }
  0xc9   : > { %4762 = vst [vmem:[#allocation32_spill] sm:$0xff] %v3752_v27  ;;  %v2790_v27 = vpack.i.bf16 %v1201_v4, %v4766_v21 }
  0xca   : > { %2771 = vrot.lane.b32.xlu0 %v3606_v20, %s3070_s27  ;;  %v3759_v17 = vpop.permute.xlu1 %2496  ;;  %v2815_v23 = vpack.i.bf16 %v482_v33, %v481_v55  ;;  %v1482_v21 = vrot.slane %v483_v3, 7 }
  0xcb   : > { %4763 = vst [vmem:[#allocation33_spill] sm:$0xff] %v3759_v17  ;;  %v1430_v17 = vrot.slane %v481_v55, 1 }
  0xcc   : > { %v3763_v19 = vpop.permute.xlu0 %2491  ;;  %2786 = vrot.lane.b32.xlu1 %v3755_v56, %s3070_s27  ;;  %v2845_v5 = vpack.i.bf16 %v1482_v21, %v1356_v38 }
  0xcd   : > { %4764 = vst [vmem:[#allocation34_spill] sm:$0xff] %v3763_v19 }
  0xce   : > { %2781 = vrot.lane.b32.xlu0 %v3761_v52, %s3070_s27  ;;  %v3770_v57 = vpop.permute.xlu1 %2506  ;;  %s3082_s27 = smov 64  }
  0xcf   : > { %4765 = vst [vmem:[#allocation35_spill] sm:$0xff] %v3770_v57  ;;  %v1431_v57 = vrot.slane %v482_v33, 1 }
  0xd0   : > { %v3774_v20 = vpop.permute.xlu0 %2501  ;;  %2796 = vrot.lane.b32.xlu1 %v2795_v25, %s3071_s28 }
  0xd1   : > { %4767 = vst [vmem:[#allocation36_spill] sm:$0xff] %v3774_v20  ;;  %v854_v20 = vrot.slane %v3355_v53, 2 }
  0xd2   : > { %2791 = vrot.lane.b32.xlu0 %v2790_v27, %s3071_s28  ;;  %v3778_v11 = vpop.permute.xlu1 %2516  ;;  %v1432_v27 = vsel %vm501_vm0, %v1430_v17, %v1431_v57  ;;  %v464_v17 = vld [vmem:[%s3475_s15 + $0x4c] sm:$0x1] }
  0xd3   : > { %4768 = vst [vmem:[#allocation37_spill] sm:$0xff] %v3778_v11 }
  0xd4   : > { %v3780_v19 = vpop.permute.xlu0 %2511  ;;  %2806 = vrot.lane.b32.xlu1 %v3739_v41, %s3072_s29 }
  0xd5   : > { %4769 = vst [vmem:[#allocation38_spill] sm:$0xff] %v3780_v19 }
  0xd6   : > { %2801 = vrot.lane.b32.xlu0 %v3696_v54, %s3072_s29  ;;  %v3786_v22 = vpop.permute.xlu1 %2526  ;;  %v2835_v54 = vpack.i.bf16 %v1431_v57, %v1432_v27  ;;  %v484_v57 = vunpack.c.l.bf16 %v464_v17  ;;  %v1556_v27 = vrot.slane %v483_v3, 1  ;;  %v853_v17 = vrot.slane %v3349_v49, 2 }
  0xd7   : > { %4770 = vst [vmem:[#allocation39_spill] sm:$0xff] %v3786_v22 }
  0xd8   : > { %v3788_v4 = vpop.permute.xlu0 %2521  ;;  %2816 = vrot.lane.b32.xlu1 %v2815_v23, %s3072_s29  ;;  %v1557_v11 = vrot.slane %v484_v57, 1 }
  0xd9   : > { %4771 = vst [vmem:[#allocation40_spill] sm:$0xff] %v3788_v4 }
  0xda   : > { %2811 = vrot.lane.b32.xlu0 %v3731_v48, %s3072_s29  ;;  %v3794_v25 = vpop.permute.xlu1 %2536  ;;  %s3079_s29 = smov 52  }
  0xdb   : > { %4772 = vst [vmem:[#allocation41_spill] sm:$0xff] %v3794_v25 }
  0xdc   : > { %v3796_v55 = vpop.permute.xlu0 %2531  ;;  %2826 = vrot.lane.b32.xlu1 %v3761_v52, %s3073_s6 }
  0xdd   : > { %4773 = vst [vmem:[#allocation42_spill] sm:$0xff] %v3796_v55 }
  0xde   : > { %2821 = vrot.lane.b32.xlu0 %v2755_v35, %s3073_s6  ;;  %v3801_v33 = vpop.permute.xlu1 %2546 }
  0xdf   : > { %4774 = vst [vmem:[#allocation43_spill] sm:$0xff] %v3801_v33 }
  0xe0   : > { %v3803_v19 = vpop.permute.xlu0 %2541  ;;  %2836 = vrot.lane.b32.xlu1 %v2835_v54, %s3073_s6 }
  0xe1   : > { %4775 = vst [vmem:[#allocation44_spill] sm:$0xff] %v3803_v19  ;;  %v2865_v19 = vpack.i.bf16 %v484_v57, %v483_v3 }
  0xe2   : > { %2831 = vrot.lane.b32.xlu0 %v3755_v56, %s3073_s6  ;;  %v3809_v25 = vpop.permute.xlu1 %2556 }
  0xe4   : > { %v3811_v55 = vpop.permute.xlu0 %2551  ;;  %2846 = vrot.lane.b32.xlu1 %v2845_v5, %s3074_s8 }
  0xe6   : > { %2841 = vrot.lane.b32.xlu0 %v3702_v60, %s3074_s8  ;;  %v2567_v35 = vpop.permute.xlu1 %2566  ;;  %v1558_v60 = vsel %vm501_vm0, %v1556_v27, %v1557_v11 }
  0xe7   : > { %v2569_v33 = vunpack.i.h.bf16 %v2567_v35  ;;  %v2568_v38 = vunpack.i.l.bf16 %v2567_v35 }
  0xe8   : > { %v2562_v21 = vpop.permute.xlu0 %2561  ;;  %2856 = vrot.lane.b32.xlu1 %v3731_v48, %s3075_s11  ;;  %v857_v48 = vrot.slane %v3427_v36, 2 }
  0xe9   : > { %v2564_v4 = vunpack.i.h.bf16 %v2562_v21  ;;  %v2563_v22 = vunpack.i.l.bf16 %v2562_v21  ;;  %v1614_v3 = vsel %vm1000_vm2, %v3470_v61, %v2569_v33  ;;  %v1613_v57 = vsel %vm1000_vm2, %v3454_v46, %v2568_v38 }
  0xea   : > { %2851 = vrot.lane.b32.xlu0 %v3739_v41, %s3075_s11  ;;  %v2577_v5 = vpop.permute.xlu1 %2576 }
  0xeb   : > { %v2579_v0 = vunpack.i.h.bf16 %v2577_v5  ;;  %v2578_v35 = vunpack.i.l.bf16 %v2577_v5  ;;  %v1612_v41 = vsel %vm1000_vm2, %v3483_v43, %v2564_v4  ;;  %v1611_v27 = vsel %vm1000_vm2, %v3452_v45, %v2563_v22 }
  0xec   : > { %v3833_v21 = vpop.permute.xlu0 %2571  ;;  %2866 = vrot.lane.b32.xlu1 %v2865_v19, %s3075_s11  ;;  %v2885_v19 = vpack.i.bf16 %v1557_v11, %v1558_v60  ;;  %v4776_v11 = vpack.i.bf16 %v3545_v9, %v3542_v59  ;;  %v2900_v60 = vpack.i.bf16 %v3349_v49, %v3352_v50  ;;  %v3020_v59 = vld [vmem:[%s4682_s3] sm:$0xff]  }
  0xed   : > { %v3837_v5 = vsel %vm1009_vm3, %v1611_v27, %v2578_v35  ;;  %v3840_v12 = vsel %vm1009_vm3, %v1612_v41, %v2578_v35  ;;  %v3843_v33 = vsel %vm1009_vm3, %v1613_v57, %v2579_v0  ;;  %v3846_v38 = vsel %vm1009_vm3, %v1614_v3, %v2579_v0  ;;  %2262 = vmatprep.subr.bf16.mxu0 %v3020_v59 }
  0xee   : > { %2861 = vrot.lane.b32.xlu0 %v2815_v23, %s3075_s11  ;;  %v3849_v4 = vpop.permute.xlu1 %2586  ;;  %v855_v27 = vsel %vm550_vm1, %v853_v17, %v854_v20  ;;  %v858_v35 = vsel %vm550_vm1, %v856_v28, %v857_v48  ;;  %v2905_v28 = vpack.i.bf16 %v3452_v45, %v3421_v2  ;;  %v860_v20 = vrot.slane %v3483_v43, 2  ;;  %v3021_v48 = vld [vmem:[%s4682_s3 + $0x8] sm:$0xff]   ;;  %2284 = vmatprep.subr.bf16.mxu1 %v3020_v59 }
  0xef   : > { %v2895_v23 = vpack.i.bf16 %v858_v35, %v855_v27  ;;  %2263 = vmatpush3.bf16.msra.mxu0 %v3020_v59  ;;  %2291 = vmatpush3.bf16.msra.mxu1 %v3020_v59  ;;  %v2554_v59 = vunpack.i.h.bf16 %v3811_v55  ;;  %v2589_v30 = vunpack.i.h.bf16 %v3849_v4 }
  0xf0   : > { %v3851_v22 = vpop.permute.xlu0 %2581  ;;  %2876 = vrot.lane.b32.xlu1 %v3755_v56, %s3076_s16  ;;  %2264 = vmatprep.subr.bf16.mxu0 %v3021_v48 }
  0xf1   : > { %2285 = vmatprep.subr.bf16.mxu1 %v3021_v48  ;;  %v1608_v42 = vsel %vm1000_vm2, %v3355_v53, %v2554_v59 }
  0xf2   : > { %2871 = vrot.lane.b32.xlu0 %v3761_v52, %s3076_s16  ;;  %v3859_v57 = vpop.permute.xlu1 %2596  ;;  %v859_v52 = vrot.slane %v3452_v45, 2  ;;  %v2915_v45 = vpack.i.bf16 %v3514_v34, %v3468_v24 }
  0xf3   : > { %2265 = vmatpush3.bf16.msra.mxu0 %v3021_v48  ;;  %2292 = vmatpush3.bf16.msra.mxu1 %v3021_v48  ;;  %v2574_v48 = vunpack.i.h.bf16 %v3833_v21 }
  0xf4   : > { %v3861_v0 = vpop.permute.xlu0 %2591  ;;  %2886 = vrot.lane.b32.xlu1 %v2885_v19, %s3076_s16  ;;  %v3888_v43 = vsel %vm550_vm1, %v859_v52, %v860_v20  ;;  %v4777_v19 = vpack.i.bf16 %v3375_v7, %v3378_v8  ;;  %v3022_v52 = vld [vmem:[%s4682_s3 + $0x10] sm:$0xff]   ;;  %v3023_v8 = vld [vmem:[%s4682_s3 + $0x18] sm:$0xff]  }
  0xf5   : > { %v2925_v24 = vpack.i.bf16 %v3888_v43, %v858_v35  ;;  %2266 = vmatprep.subr.bf16.mxu0 %v3022_v52  ;;  %2286 = vmatprep.subr.bf16.mxu1 %v3022_v52 }
  0xf6   : > { %2881 = vrot.lane.b32.xlu0 %v2835_v54, %s3076_s16  ;;  %v3865_v3 = vpop.permute.xlu1 %2606 }
  0xf7   : > { %2267 = vmatpush3.bf16.msra.mxu0 %v3022_v52  ;;  %2293 = vmatpush3.bf16.msra.mxu1 %v3022_v52 }
  0xf8   : > { %v3867_v56 = vpop.permute.xlu0 %2601  ;;  %2896 = vrot.lane.b32.xlu1 %v2895_v23, %s3077_s10  ;;  %2268 = vmatprep.subr.bf16.mxu0 %v3023_v8 }
  0xf9   : > { %2287 = vmatprep.subr.bf16.mxu1 %v3023_v8 }
  0xfa   : > { %2891 = vrot.lane.b32.xlu0 %v4776_v11, %s3077_s10  ;;  %v3878_v54 = vpop.permute.xlu1 %2616 }
  0xfb   : > { %2269 = vmatpush3.bf16.msra.mxu0 %v3023_v8  ;;  %2294 = vmatpush3.bf16.msra.mxu1 %v3023_v8 }
  0xfc   : > { %v3882_v17 = vpop.permute.xlu0 %2611  ;;  %2906 = vrot.lane.b32.xlu1 %v2905_v28, %s3078_s13  ;;  %v2920_v28 = vpack.i.bf16 %v855_v27, %v3545_v9 }
  0xfe   : > { %2901 = vrot.lane.b32.xlu0 %v2900_v60, %s3078_s13  ;;  %v3897_v50 = vpop.permute.xlu1 %2626 }
 0x100   : > { %v3899_v41 = vpop.permute.xlu0 %2621  ;;  %2916 = vrot.lane.b32.xlu1 %v2915_v45, %s3079_s29  ;;  %v2558_v45 = vunpack.i.l.bf16 %v3809_v25 }
 0x102   : > { %2911 = vrot.lane.b32.xlu0 %v4777_v19, %s3079_s29  ;;  %v3907_v23 = vpop.permute.xlu1 %2636  ;;  %v2573_v19 = vunpack.i.l.bf16 %v3833_v21  ;;  %v1609_v31 = vsel %vm1000_vm2, %v3421_v2, %v2558_v45  ;;  %v2599_v45 = vunpack.i.h.bf16 %v3859_v57 }
 0x103   : > { %v1625_v8 = vsel %vm1009_vm3, %v1609_v31, %v2574_v48  ;;  %v2593_v31 = vunpack.i.l.bf16 %v3861_v0 }
 0x104   : > { %v3913_v20 = vpop.permute.xlu0 %2631  ;;  %2926 = vrot.lane.b32.xlu1 %v2925_v24, %s3080_s7 }
 0x106   : > { %2921 = vrot.lane.b32.xlu0 %v2920_v28, %s3080_s7  ;;  %v3917_v7 = vpop.permute.xlu1 %2646  ;;  %v2588_v28 = vunpack.i.l.bf16 %v3849_v4  ;;  %v1624_v4 = vsel %vm1009_vm3, %v1608_v42, %v2573_v19  ;;  %v2608_v42 = vunpack.i.l.bf16 %v3865_v3 }
 0x108   : > { %v3922_v9 = vpop.permute.xlu0 %2641  ;;  %2936 = vrot.lane.b32.xlu1 %v3480_v62, %s3081_s26  ;;  %v2559_v62 = vunpack.i.h.bf16 %v3809_v25  ;;  %v2583_v25 = vunpack.i.l.bf16 %v3851_v22  ;;  %v1641_v53 = vsel %vm1018_vm4, %v1625_v8, %v2588_v28  ;;  %v2603_v28 = vunpack.i.l.bf16 %v3867_v56 }
 0x10a   : > { %2931 = vrot.lane.b32.xlu0 %v3440_v32, %s3081_s26  ;;  %v3928_v27 = vpop.permute.xlu1 %2656  ;;  %v2553_v32 = vunpack.i.l.bf16 %v3811_v55  ;;  %v1610_v55 = vsel %vm1000_vm2, %v3427_v36, %v2559_v62  ;;  %v2584_v62 = vunpack.i.h.bf16 %v3851_v22 }
 0x10b   : > { %v1626_v36 = vsel %vm1009_vm3, %v1610_v55, %v2574_v48  ;;  %v2594_v48 = vunpack.i.h.bf16 %v3861_v0  ;;  %v2614_v0 = vunpack.i.h.bf16 %v3882_v17 }
 0x10c   : > { %v3930_v35 = vpop.permute.xlu0 %2651  ;;  %v1607_v26 = vsel %vm1000_vm2, %v3349_v49, %v2553_v32  ;;  %v2598_v49 = vunpack.i.l.bf16 %v3859_v57  ;;  %v1642_v32 = vsel %vm1018_vm4, %v1626_v36, %v2589_v30  ;;  %v2618_v57 = vunpack.i.l.bf16 %v3878_v54 }
 0x10d   : > { %v1623_v2 = vsel %vm1009_vm3, %v1607_v26, %v2573_v19  ;;  %v2609_v26 = vunpack.i.h.bf16 %v3865_v3  ;;  %v2604_v19 = vunpack.i.h.bf16 %v3867_v56  ;;  %v1640_v55 = vsel %vm1018_vm4, %v1624_v4, %v2584_v62 }
 0x10e   : > { %v3932_v11 = vpop.permute.xlu1 %2666  ;;  %v1639_v22 = vsel %vm1018_vm4, %v1623_v2, %v2583_v25  ;;  %v2619_v30 = vunpack.i.h.bf16 %v3878_v54  ;;  %v2613_v36 = vunpack.i.l.bf16 %v3882_v17  ;;  %v1645_v3 = vsel %vm1018_vm4, %v3843_v33, %v2598_v49 }
 0x10f   : > { %v1646_v25 = vsel %vm1018_vm4, %v3846_v38, %v2599_v45  ;;  %v1643_v56 = vsel %vm1018_vm4, %v3837_v5, %v2593_v31  ;;  %v2628_v2 = vunpack.i.l.bf16 %v3897_v50  ;;  %v1644_v54 = vsel %vm1018_vm4, %v3840_v12, %v2594_v48 }
 0x110   : > { %v3934_v60 = vpop.permute.xlu0 %2661  ;;  %v1657_v4 = vsel %vm1027_vm5, %v1641_v53, %v2608_v42  ;;  %v1658_v17 = vsel %vm1027_vm5, %v1642_v32, %v2609_v26  ;;  %v2629_v62 = vunpack.i.h.bf16 %v3897_v50  ;;  %v1655_v33 = vsel %vm1027_vm5, %v1639_v22, %v2603_v28 }
 0x111   : > { %v1656_v38 = vsel %vm1027_vm5, %v1640_v55, %v2604_v19  ;;  %v1661_v5 = vsel %vm1027_vm5, %v1645_v3, %v2618_v57  ;;  %v2623_v45 = vunpack.i.l.bf16 %v3899_v41  ;;  %v1662_v31 = vsel %vm1027_vm5, %v1646_v25, %v2619_v30 }
 0x112   : > { %v3941_v24 = vpop.permute.xlu1 %2676  ;;  %v1659_v12 = vsel %vm1027_vm5, %v1643_v56, %v2613_v36  ;;  %v1660_v53 = vsel %vm1027_vm5, %v1644_v54, %v2614_v0  ;;  %v2624_v32 = vunpack.i.h.bf16 %v3899_v41  ;;  %v2639_v26 = vunpack.i.h.bf16 %v3907_v23 }
 0x113   : > { %v1675_v50 = vsel %vm1036_vm6, %v1659_v12, %v2628_v2  ;;  %v1676_v48 = vsel %vm1036_vm6, %v1660_v53, %v2628_v2  ;;  %v2638_v42 = vunpack.i.l.bf16 %v3907_v23  ;;  %v1677_v19 = vsel %vm1036_vm6, %v1661_v5, %v2629_v62 }
 0x114   : > { %v3945_v52 = vpop.permute.xlu0 %2671  ;;  %v1678_v28 = vsel %vm1036_vm6, %v1662_v31, %v2629_v62  ;;  %v2634_v57 = vunpack.i.h.bf16 %v3913_v20  ;;  %v2633_v55 = vunpack.i.l.bf16 %v3913_v20  ;;  %v1671_v41 = vsel %vm1036_vm6, %v1655_v33, %v2623_v45 }
 0x115   : > { %v2649_v30 = vunpack.i.h.bf16 %v3917_v7  ;;  %v2648_v0 = vunpack.i.l.bf16 %v3917_v7  ;;  %v2643_v23 = vunpack.i.l.bf16 %v3922_v9  ;;  %v1673_v3 = vsel %vm1036_vm6, %v1657_v4, %v2624_v32 }
 0x116   : > { %v3962_v10 = vpop.permute.xlu1 %2686  ;;  %v1674_v25 = vsel %vm1036_vm6, %v1658_v17, %v2624_v32  ;;  %v2644_v56 = vunpack.i.h.bf16 %v3922_v9  ;;  %v2658_v20 = vunpack.i.l.bf16 %v3928_v27  ;;  %v1672_v2 = vsel %vm1036_vm6, %v1656_v38, %v2623_v45 }
 0x117   : > { %v1689_v54 = vsel %vm1045_vm7, %v1673_v3, %v2638_v42  ;;  %v1690_v62 = vsel %vm1045_vm7, %v1674_v25, %v2639_v26  ;;  %v2659_v7 = vunpack.i.h.bf16 %v3928_v27  ;;  %v1687_v5 = vsel %vm1045_vm7, %v1671_v41, %v2633_v55 }
 0x118   : > { %v3972_v59 = vpop.permute.xlu0 %2681  ;;  %v1688_v4 = vsel %vm1045_vm7, %v1672_v2, %v2634_v57  ;;  %v2654_v17 = vunpack.i.h.bf16 %v3930_v35  ;;  %v2653_v9 = vunpack.i.l.bf16 %v3930_v35  ;;  %v1693_v31 = vsel %vm1045_vm7, %v1677_v19, %v2648_v0 }
 0x119   : > { %v1694_v38 = vsel %vm1045_vm7, %v1678_v28, %v2649_v30  ;;  %v1691_v45 = vsel %vm1045_vm7, %v1675_v50, %v2643_v23  ;;  %v2673_v12 = vunpack.i.l.bf16 %v3945_v52  ;;  %v1692_v27 = vsel %vm1045_vm7, %v1676_v48, %v2644_v56  ;;  %v3024_v50 = vld [vmem:[%s4682_s3 + $0x20] sm:$0xff]  }
 0x11a   : > { %v3982_v8 = vpop.permute.xlu1 %2696  ;;  %v1705_v32 = vsel %vm1054_vm8, %v1689_v54, %v2658_v20  ;;  %v1706_v57 = vsel %vm1054_vm8, %v1690_v62, %v2659_v7  ;;  %v2674_v35 = vunpack.i.h.bf16 %v3945_v52  ;;  %v1703_v48 = vsel %vm1054_vm8, %v1687_v5, %v2653_v9  ;;  %2270 = vmatprep.subr.bf16.mxu0 %v3024_v50  ;;  %2288 = vmatprep.subr.bf16.mxu1 %v3024_v50 }
 0x11b   : > { %v1704_v41 = vsel %vm1054_vm8, %v1688_v4, %v2654_v17  ;;  %v2668_v30 = vunpack.i.l.bf16 %v3932_v11  ;;  %v1719_v0 = vsel %vm4730_vm9, %v1703_v48, %v2673_v12  ;;  %v2699_v23 = vunpack.i.h.bf16 %v3982_v8  ;;  %2271 = vmatpush3.bf16.msra.mxu0 %v3024_v50  ;;  %2295 = vmatpush3.bf16.msra.mxu1 %v3024_v50 }
 0x11c   : > { %v3995_v21 = vpop.permute.xlu0 %2691  ;;  %v1720_v52 = vsel %vm4730_vm9, %v1704_v41, %v2673_v12  ;;  %v2698_v3 = vunpack.i.l.bf16 %v3982_v8  ;;  %v2669_v56 = vunpack.i.h.bf16 %v3932_v11  ;;  %v2664_v20 = vunpack.i.h.bf16 %v3934_v60  ;;  %v3025_v11 = vld [vmem:[%s4682_s3 + $0x28] sm:$0xff]  }
 0x11d   : > { %v2694_v26 = vunpack.i.h.bf16 %v3995_v21  ;;  %v2693_v42 = vunpack.i.l.bf16 %v3995_v21  ;;  %v2663_v21 = vunpack.i.l.bf16 %v3934_v60  ;;  %v1721_v62 = vsel %vm4730_vm9, %v1705_v32, %v2674_v35  ;;  %2272 = vmatprep.subr.bf16.mxu0 %v3025_v11  ;;  %2289 = vmatprep.subr.bf16.mxu1 %v3025_v11 }
 0x11e   : > { %v4006_v49 = vpop.permute.xlu1 %2706  ;;  %v1722_v7 = vsel %vm4730_vm9, %v1706_v57, %v2674_v35  ;;  %v2689_v60 = vunpack.i.h.bf16 %v3962_v10  ;;  %v2688_v17 = vunpack.i.l.bf16 %v3962_v10 }
 0x11f   : > { %v1735_v2 = vsel %vm1072_vm10, %v1719_v0, %v2693_v42  ;;  %v1736_v54 = vsel %vm1072_vm10, %v1720_v52, %v2694_v26  ;;  %v1707_v32 = vsel %vm1054_vm8, %v1691_v45, %v2663_v21  ;;  %v1737_v26 = vsel %vm1072_vm10, %v1721_v62, %v2698_v3  ;;  %2273 = vmatpush3.bf16.msra.mxu0 %v3025_v11 }
 0x120   : > { %v4016_v22 = vpop.permute.xlu0 %2701  ;;  %v1738_v42 = vsel %vm1072_vm10, %v1722_v7, %v2699_v23  ;;  %2296 = vmatpush3.bf16.msra.mxu1 %v3025_v11  ;;  %v1710_v21 = vsel %vm1054_vm8, %v1694_v38, %v2669_v56  ;;  %v1708_v0 = vsel %vm1054_vm8, %v1692_v27, %v2664_v20  ;;  %v1723_v52 = vsel %vm4730_vm9, %v1707_v32, %v2688_v17 }
 0x121   : > { %v1726_v38 = vsel %vm4730_vm9, %v1710_v21, %v2689_v60  ;;  %v1724_v7 = vsel %vm4730_vm9, %v1708_v0, %v2688_v17  ;;  %v4780_v21 = vpack.i.bf16 %v3505_v16, %v3514_v34 }
 0x122   : > { %v4026_v36 = vpop.permute.xlu1 %2716 }
 0x123   : > { %v2719_v3 = vunpack.i.h.bf16 %v4026_v36 }
 0x124   : > { %v4036_v33 = vpop.permute.xlu0 %2711 }
 0x125   : > { %v1740_v32 = vsel %vm1072_vm10, %v1724_v7, %v2719_v3  ;;  %v866_v3 = vrot.slane %v3587_v1, 2  ;;  %v949_v7 = vrot.slane %v3641_v47, 2 }
 0x126   : > { %v2727_v53 = vpop.permute.xlu1 %2726 }
 0x127   : > { %v2729_v19 = vunpack.i.h.bf16 %v2727_v53  ;;  %v2728_v55 = vunpack.i.l.bf16 %v2727_v53  ;;  %v1709_v53 = vsel %vm1054_vm8, %v1693_v31, %v2668_v30  ;;  %v3026_v30 = vld [vmem:[%s4682_s3 + $0x30] sm:$0x3f]  }
 0x128   : > { %v4052_v28 = vpop.permute.xlu0 %2721  ;;  %v1725_v23 = vsel %vm4730_vm9, %v1709_v53, %v2689_v60  ;;  %2298 = vmatprep.subr.msk.bf16.mxu0 %vm550_vm1, %v3026_v30  ;;  %v1913_v62 = vsel %vm550_vm1, %v3026_v30, 0  ;;  %2299 = vmatprep.subr.msk.bf16.mxu1 %vm550_vm1, %v3026_v30 }
 0x129   : > { %v1751_v8 = vsel %vm1081_vm11, %v1735_v2, %v2728_v55  ;;  %v1752_v5 = vsel %vm1081_vm11, %v1736_v54, %v2729_v19  ;;  %v2724_v10 = vunpack.i.h.bf16 %v4052_v28  ;;  %v2723_v31 = vunpack.i.l.bf16 %v4052_v28  ;;  %2275 = vmatpush3.bf16.msra.mxu0 %v1913_v62  ;;  %2297 = vmatpush3.bf16.msra.mxu1 %v1913_v62 }
 0x12a   : > { %v4065_v25 = vpop.permute.xlu1 %2736  ;;  %v1783_v35 = vrot.slane %v1751_v8, 1  ;;  %v1784_v19 = vrot.slane %v1752_v5, 1  ;;  %v2718_v28 = vunpack.i.l.bf16 %v4026_v36 }
 0x12b   : > { %v1742_v36 = vsel %vm1072_vm10, %v1726_v38, %v2724_v10  ;;  %v1741_v8 = vsel %vm1072_vm10, %v1725_v23, %v2723_v31  ;;  %v865_v23 = vrot.slane %v3442_v39, 2  ;;  %v2970_v38 = vpack.i.bf16 %v3442_v39, %v3454_v46 }
 0x12c   : > { %v2732_v4 = vpop.permute.xlu0 %2731  ;;  %v1785_v20 = vsel %vm501_vm0, %v1783_v35, %v1784_v19  ;;  %v1739_v53 = vsel %vm1072_vm10, %v1723_v52, %v2718_v28  ;;  %v868_v28 = vrot.slane %v3444_v40, 2 }
 0x12d   : > { %v2734_v9 = vunpack.i.h.bf16 %v2732_v4  ;;  %v2733_v12 = vunpack.i.l.bf16 %v2732_v4 }
 0x12e   : > { %v4084_v57 = vpop.permute.xlu1 %2746 }
 0x12f   : > { %v1753_v55 = vsel %vm1081_vm11, %v1737_v26, %v2733_v12  ;;  %v1754_v50 = vsel %vm1081_vm11, %v1738_v42, %v2734_v9 }
 0x130   : > { %v1786_v45 = vrot.slane %v1753_v55, 1  ;;  %v1787_v48 = vrot.slane %v1754_v50, 1  ;;  %v4090_v41 = vpop.permute.xlu0 %2741  ;;  %v4778_v55 = vrot.slane %v3470_v61, 2  ;;  %v4779_v50 = vrot.slane %v3454_v46, 2 }
 0x132   : > { %v2757_v2 = vpop.permute.xlu1 %2756  ;;  %v1788_v54 = vsel %vm501_vm0, %v1786_v45, %v1787_v48  ;;  %v4124_v10 = vsel %vm550_vm1, %v4779_v50, %v4778_v55  ;;  %v2738_v50 = vunpack.i.l.bf16 %v4065_v25 }
 0x133   : > { %v2759_v27 = vunpack.i.h.bf16 %v2757_v2  ;;  %v2758_v56 = vunpack.i.l.bf16 %v2757_v2  ;;  %v2940_v4 = vpack.i.bf16 %v1788_v54, %v1785_v20  ;;  %v2960_v52 = vpack.i.bf16 %v4124_v10, %v3888_v43 }
 0x134   : > { %v2752_v5 = vpop.permute.xlu0 %2751  ;;  %v869_v2 = vrot.slane %v3602_v14, 2  ;;  %v2955_v43 = vpack.i.bf16 %v3637_v15, %v3611_v58  ;;  %v948_v20 = vrot.slane %v3639_v51, 2 }
 0x135   : > { %v1757_v11 = vsel %vm1081_vm11, %v1741_v8, %v2758_v56  ;;  %v1758_v9 = vsel %vm1081_vm11, %v1742_v36, %v2759_v27  ;;  %v2754_v12 = vunpack.i.h.bf16 %v2752_v5  ;;  %v2753_v60 = vunpack.i.l.bf16 %v2752_v5  ;;  %2941 = vrot.lane.b32.xlu0 %v2940_v4, %s3082_s27 }
 0x136   : > { %v1792_v26 = vrot.slane %v1757_v11, 1  ;;  %v1793_v42 = vrot.slane %v1758_v9, 1  ;;  %v4115_v17 = vpop.permute.xlu1 %2766  ;;  %v867_v27 = vsel %vm550_vm1, %v865_v23, %v866_v3  ;;  %v4154_v56 = vsel %vm550_vm1, %v868_v28, %v869_v2 }
 0x137   : > { %v1755_v35 = vsel %vm1081_vm11, %v1739_v53, %v2753_v60  ;;  %v1756_v19 = vsel %vm1081_vm11, %v1740_v32, %v2754_v12  ;;  %v2985_v8 = vpack.i.bf16 %v3666_v37, %v3637_v15  ;;  %v2965_v46 = vpack.i.bf16 %v4154_v56, %v867_v27 }
 0x138   : > { %v1789_v31 = vrot.slane %v1755_v35, 1  ;;  %v1790_v45 = vrot.slane %v1756_v19, 1  ;;  %v4126_v48 = vpop.permute.xlu0 %2761  ;;  %v1794_v30 = vsel %vm501_vm0, %v1792_v26, %v1793_v42  ;;  %v2980_v4 = vpack.i.bf16 %v3611_v58, %v3505_v16 }
 0x139   : > { %2951 = vrot.lane.b32.xlu0 %v4780_v21, %s3076_s16  ;;  %v2679_v11 = vunpack.i.h.bf16 %v3941_v24  ;;  %v2678_v9 = vunpack.i.l.bf16 %v3941_v24  ;;  %v2684_v12 = vunpack.i.h.bf16 %v3972_v59  ;;  %v4173_v60 = vsel %vm550_vm1, %v948_v20, %v949_v7 }
 0x13a   : > { %v4133_v0 = vpop.permute.xlu1 %2776  ;;  %v1791_v61 = vsel %vm501_vm0, %v1789_v31, %v1790_v45  ;;  %v2683_v15 = vunpack.i.l.bf16 %v3972_v59  ;;  %v2709_v37 = vunpack.i.h.bf16 %v4006_v49  ;;  %v2975_v32 = vpack.i.bf16 %v3639_v51, %v3444_v40 }
 0x13b   : > { %v2945_v62 = vpack.i.bf16 %v1794_v30, %v1791_v61  ;;  %v2990_v16 = vpack.i.bf16 %v867_v27, %v4124_v10  ;;  %v2708_v58 = vunpack.i.l.bf16 %v4006_v49  ;;  %v2704_v24 = vunpack.i.h.bf16 %v4016_v22 }
 0x13c   : > { %v4142_v54 = vpop.permute.xlu0 %2771  ;;  %v2703_v26 = vunpack.i.l.bf16 %v4016_v22  ;;  %v2714_v42 = vunpack.i.h.bf16 %v4036_v33  ;;  %v2713_v35 = vunpack.i.l.bf16 %v4036_v33  ;;  %v2995_v19 = vpack.i.bf16 %v4173_v60, %v4154_v56 }
 0x13d   : > { %2946 = vrot.lane.b32.xlu1 %v2945_v62, %s3082_s27  ;;  %2961 = vrot.lane.b32.xlu0 %v2960_v52, %s3077_s10  ;;  %v3005_v49 = vpack.i.bf16 %v3629_v6, %v3639_v51  ;;  %v1616_v55 = vsel %vm1000_vm2, %v3587_v1, %v2679_v11  ;;  %v1615_v22 = vsel %vm1000_vm2, %v3442_v39, %v2678_v9  ;;  %v4781_v31 = vunpack.c.l.bf16 %v3618_v13 }
 0x13e   : > { %v4146_v34 = vpop.permute.xlu1 %2786  ;;  %v1618_v33 = vsel %vm1000_vm2, %v3602_v14, %v2684_v12  ;;  %v1617_v10 = vsel %vm1000_vm2, %v3444_v40, %v2683_v15  ;;  %v2739_v30 = vunpack.i.h.bf16 %v4065_v25  ;;  %v2748_v21 = vunpack.i.l.bf16 %v4084_v57 }
 0x13f   : > { %v1622_v45 = vsel %vm1000_vm2, %v4781_v31, %v2709_v37  ;;  %v1621_v39 = vsel %vm1000_vm2, %v3629_v6, %v2708_v58  ;;  %v1620_v14 = vsel %vm1000_vm2, %v3641_v47, %v2704_v24  ;;  %v1619_v61 = vsel %vm1000_vm2, %v3639_v51, %v2703_v26 }
 0x140   : > { %v4158_v36 = vpop.permute.xlu0 %2781  ;;  %v2749_v40 = vunpack.i.h.bf16 %v4084_v57  ;;  %v1631_v13 = vsel %vm1009_vm3, %v1615_v22, %v2713_v35  ;;  %v1632_v52 = vsel %vm1009_vm3, %v1616_v55, %v2713_v35  ;;  %v1633_v25 = vsel %vm1009_vm3, %v1617_v10, %v2714_v42 }
 0x141   : > { %2956 = vrot.lane.b32.xlu1 %v2955_v43, %s3076_s16  ;;  %2971 = vrot.lane.b32.xlu0 %v2970_v38, %s3078_s13  ;;  %v2743_v23 = vunpack.i.l.bf16 %v4090_v41  ;;  %v1634_v47 = vsel %vm1009_vm3, %v1618_v33, %v2714_v42  ;;  %v1635_v28 = vsel %vm1009_vm3, %v1619_v61, %v2738_v50  ;;  %v1636_v57 = vsel %vm1009_vm3, %v1620_v14, %v2738_v50  ;;  %s2233_s16 = sshll.u32 %s4846_s18, 3 }
 0x142   : > { %v4164_v5 = vpop.permute.xlu1 %2796  ;;  %v2744_v2 = vunpack.i.h.bf16 %v4090_v41  ;;  %v1637_v62 = vsel %vm1009_vm3, %v1621_v39, %v2739_v30  ;;  %v1638_v43 = vsel %vm1009_vm3, %v1622_v45, %v2739_v30  ;;  %v1649_v38 = vsel %vm1018_vm4, %v1633_v25, %v2748_v21 }
 0x143   : > { %v2768_v27 = vunpack.i.l.bf16 %v4115_v17  ;;  %v1650_v20 = vsel %vm1018_vm4, %v1634_v47, %v2749_v40  ;;  %v2769_v7 = vunpack.i.h.bf16 %v4115_v17  ;;  %v1647_v41 = vsel %vm1018_vm4, %v1631_v13, %v2743_v23 }
 0x144   : > { %v4177_v53 = vpop.permute.xlu0 %2791  ;;  %v2779_v11 = vunpack.i.h.bf16 %v4133_v0  ;;  %v2778_v9 = vunpack.i.l.bf16 %v4133_v0  ;;  %v2773_v12 = vunpack.i.l.bf16 %v4142_v54  ;;  %v1648_v17 = vsel %vm1018_vm4, %v1632_v52, %v2744_v2 }
 0x145   : > { %2966 = vrot.lane.b32.xlu1 %v2965_v46, %s3077_s10  ;;  %2981 = vrot.lane.b32.xlu0 %v2980_v4, %s3079_s29  ;;  %v2764_v46 = vunpack.i.h.bf16 %v4126_v48  ;;  %v2763_v4 = vunpack.i.l.bf16 %v4126_v48  ;;  %v2774_v15 = vunpack.i.h.bf16 %v4142_v54  ;;  %v2788_v48 = vunpack.i.l.bf16 %v4146_v34  ;;  %s2234_s10 = sshll.u32 %s4840_s19, 6 }
 0x146   : > { %v4189_v59 = vpop.permute.xlu1 %2806  ;;  %v2783_v37 = vunpack.i.l.bf16 %v4158_v36  ;;  %v2789_v0 = vunpack.i.h.bf16 %v4146_v34  ;;  %v2799_v26 = vunpack.i.h.bf16 %v4164_v5  ;;  %v1665_v42 = vsel %vm1027_vm5, %v1649_v38, %v2778_v9 }
 0x147   : > { %v1651_v24 = vsel %vm1018_vm4, %v1635_v28, %v2763_v4  ;;  %v1652_v54 = vsel %vm1018_vm4, %v1636_v57, %v2764_v46  ;;  %v1666_v35 = vsel %vm1027_vm5, %v1650_v20, %v2779_v11  ;;  %v1663_v34 = vsel %vm1027_vm5, %v1647_v41, %v2773_v12 }
 0x148   : > { %v4209_v1 = vpop.permute.xlu0 %2801  ;;  %v1664_v22 = vsel %vm1027_vm5, %v1648_v17, %v2774_v15  ;;  %v1667_v50 = vsel %vm1027_vm5, %v1651_v24, %v2783_v37  ;;  %v2794_v10 = vunpack.i.h.bf16 %v4177_v53  ;;  %v2808_v30 = vunpack.i.l.bf16 %v4189_v59 }
 0x149   : > { %2976 = vrot.lane.b32.xlu1 %v2975_v32, %s3078_s13  ;;  %2991 = vrot.lane.b32.xlu0 %v2990_v16, %s3080_s7  ;;  %v1653_v32 = vsel %vm1018_vm4, %v1637_v62, %v2768_v27  ;;  %v2784_v16 = vunpack.i.h.bf16 %v4158_v36  ;;  %v2793_v36 = vunpack.i.l.bf16 %v4177_v53  ;;  %v2809_v14 = vunpack.i.h.bf16 %v4189_v59  ;;  %s353_s13 = sadd.s32 %s2234_s10, %s2233_s16 }
 0x14a   : > { %v4224_v3 = vpop.permute.xlu1 %2816  ;;  %v1669_v33 = vsel %vm1027_vm5, %v1653_v32, %v2788_v48  ;;  %v2803_v61 = vunpack.i.l.bf16 %v4209_v1  ;;  %v2804_v52 = vunpack.i.h.bf16 %v4209_v1  ;;  %v1681_v23 = vsel %vm1036_vm6, %v1665_v42, %v2794_v10  ;;  %s2235_s28 = sshll.u32 %s353_s13, 3 }
 0x14b   : > { %v1668_v31 = vsel %vm1027_vm5, %v1652_v54, %v2784_v16  ;;  %v1685_v39 = vsel %vm1036_vm6, %v1669_v33, %v2799_v26  ;;  %v1679_v53 = vsel %vm1036_vm6, %v1663_v34, %v2793_v36  ;;  %v1680_v13 = vsel %vm1036_vm6, %v1664_v22, %v2793_v36  ;;  %s4625_s6 = scalar_lea.vmem %s4683_s4, %s2235_s28 }
 0x14c   : > { %v4234_v56 = vpop.permute.xlu0 %2811  ;;  %v1682_v59 = vsel %vm1036_vm6, %v1666_v35, %v2794_v10  ;;  %v2819_v47 = vunpack.i.h.bf16 %v4224_v3  ;;  %v2818_v28 = vunpack.i.l.bf16 %v4224_v3  ;;  %v1697_v57 = vsel %vm1045_vm7, %v1681_v23, %v2808_v30 }
 0x14d   : > { %2986 = vrot.lane.b32.xlu1 %v2985_v8, %s3079_s29  ;;  %3001 = vrot.lane.b32.xlu0 %v3464_v29, %s3081_s26  ;;  %v2798_v8 = vunpack.i.l.bf16 %v4164_v5  ;;  %v1654_v29 = vsel %vm1018_vm4, %v1638_v43, %v2769_v7  ;;  %v2814_v2 = vunpack.i.h.bf16 %v4234_v56  ;;  %v2813_v1 = vunpack.i.l.bf16 %v4234_v56 }
 0x14e   : > { %v4247_v60 = vpop.permute.xlu1 %2826  ;;  %v1670_v5 = vsel %vm1027_vm5, %v1654_v29, %v2789_v0  ;;  %v1698_v6 = vsel %vm1045_vm7, %v1682_v59, %v2809_v14  ;;  %v1695_v51 = vsel %vm1045_vm7, %v1679_v53, %v2803_v61  ;;  %v1696_v27 = vsel %vm1045_vm7, %v1680_v13, %v2804_v52 }
 0x14f   : > { %v1683_v45 = vsel %vm1036_vm6, %v1667_v50, %v2798_v8  ;;  %v1686_v40 = vsel %vm1036_vm6, %v1670_v5, %v2799_v26  ;;  %v2828_v62 = vunpack.i.l.bf16 %v4247_v60  ;;  %v1701_v56 = vsel %vm1045_vm7, %v1685_v39, %v2818_v28 }
 0x150   : > { %v4257_v58 = vpop.permute.xlu0 %2821  ;;  %v1702_v4 = vsel %vm1045_vm7, %v1686_v40, %v2819_v47  ;;  %v1699_v9 = vsel %vm1045_vm7, %v1683_v45, %v2813_v1  ;;  %vm1831_vm1 = vcmask 523264  }
 0x151   : > { %2996 = vrot.lane.b32.xlu1 %v2995_v19, %s3080_s7  ;;  %v1684_v19 = vsel %vm1036_vm6, %v1668_v31, %v2798_v8  ;;  %v2823_v38 = vunpack.i.l.bf16 %v4257_v58  ;;  %v2824_v3 = vunpack.i.h.bf16 %v4257_v58  ;;  %s2236_s7 = sshll.u32 %s4840_s19, 3 }
 0x152   : > { %v2837_v55 = vpop.permute.xlu1 %2836  ;;  %v1700_v12 = vsel %vm1045_vm7, %v1684_v19, %v2814_v2  ;;  %s361_s8 = sadd.s32 %s2236_s7, %s4846_s18 }
 0x153   : > { %v2839_v20 = vunpack.i.h.bf16 %v2837_v55  ;;  %v2838_v7 = vunpack.i.l.bf16 %v2837_v55  ;;  %v1711_v37 = vsel %vm1054_vm8, %v1695_v51, %v2823_v38  ;;  %v1712_v16 = vsel %vm1054_vm8, %v1696_v27, %v2824_v3  ;;  %s2237_s9 = sshll.u32 %s361_s8, 1 }
 0x154   : > { %v2832_v21 = vpop.permute.xlu0 %2831  ;;  %s363_s12 = scalar_lea.vmem %s4684_s5, %s2237_s9 }
 0x155   : > { %3006 = vrot.lane.b32.xlu1 %v3005_v49, %s3081_s26  ;;  %v2829_v49 = vunpack.i.h.bf16 %v4247_v60  ;;  %v2834_v41 = vunpack.i.h.bf16 %v2832_v21  ;;  %v2833_v11 = vunpack.i.l.bf16 %v2832_v21  ;;  %v1713_v60 = vsel %vm1054_vm8, %v1697_v57, %v2828_v62 }
 0x156   : > { %v2847_v25 = vpop.permute.xlu1 %2846  ;;  %v1717_v8 = vsel %vm1054_vm8, %v1701_v56, %v2838_v7  ;;  %v1718_v58 = vsel %vm1054_vm8, %v1702_v4, %v2839_v20 }
 0x157   : > { %v2848_v17 = vunpack.i.l.bf16 %v2847_v25  ;;  %v1714_v48 = vsel %vm1054_vm8, %v1698_v6, %v2829_v49  ;;  %v2849_v32 = vunpack.i.h.bf16 %v2847_v25  ;;  %v1715_v54 = vsel %vm1054_vm8, %v1699_v9, %v2833_v11 }
 0x158   : > { %v2842_v43 = vpop.permute.xlu0 %2841  ;;  %v1716_v26 = vsel %vm1054_vm8, %v1700_v12, %v2834_v41 }
 0x159   : > { %v2843_v0 = vunpack.i.l.bf16 %v2842_v43  ;;  %v2844_v29 = vunpack.i.h.bf16 %v2842_v43  ;;  %v1731_v34 = vsel %vm4730_vm9, %v1715_v54, %v2848_v17  ;;  %v1732_v50 = vsel %vm4730_vm9, %v1716_v26, %v2848_v17 }
 0x15a   : > { %v2857_v46 = vpop.permute.xlu1 %2856  ;;  %v1733_v10 = vsel %vm4730_vm9, %v1717_v8, %v2849_v32  ;;  %v1734_v5 = vsel %vm4730_vm9, %v1718_v58, %v2849_v32  ;;  %v2364_v26 = vunpack.i.h.bf16 %v3600_v18 }
 0x15b   : > { %v2859_v42 = vunpack.i.h.bf16 %v2857_v46  ;;  %v2858_v35 = vunpack.i.l.bf16 %v2857_v46  ;;  %v1727_v31 = vsel %vm4730_vm9, %v1711_v37, %v2843_v0  ;;  %v1728_v45 = vsel %vm4730_vm9, %v1712_v16, %v2843_v0 }
 0x15c   : > { %v2852_v15 = vpop.permute.xlu0 %2851  ;;  %v1729_v30 = vsel %vm4730_vm9, %v1713_v60, %v2844_v29  ;;  %v1730_v21 = vsel %vm4730_vm9, %v1714_v48, %v2844_v29 }
 0x15d   : > { %v2854_v36 = vunpack.i.h.bf16 %v2852_v15  ;;  %v2853_v55 = vunpack.i.l.bf16 %v2852_v15  ;;  %v1745_v14 = vsel %vm1072_vm10, %v1729_v30, %v2858_v35  ;;  %v1746_v61 = vsel %vm1072_vm10, %v1730_v21, %v2859_v42 }
 0x15e   : > { %v2867_v24 = vpop.permute.xlu1 %2866  ;;  %v2363_v42 = vunpack.i.l.bf16 %v3600_v18  ;;  %v2369_v35 = vunpack.i.h.bf16 %v3622_v44  ;;  %v4785_v18 = vld [vmem:[#allocation12_spill] sm:$0xff] }
 0x15f   : > { %v2868_v22 = vunpack.i.l.bf16 %v2867_v24  ;;  %v2869_v19 = vunpack.i.h.bf16 %v2867_v24  ;;  %v1743_v13 = vsel %vm1072_vm10, %v1727_v31, %v2853_v55  ;;  %v1744_v52 = vsel %vm1072_vm10, %v1728_v45, %v2854_v36  ;;  %v4782_v55 = vld [vmem:[#allocation4_spill] sm:$0xff]  ;;  %v4784_v31 = vld [vmem:[#allocation9_spill] sm:$0xff] }
 0x160   : > { %v2862_v33 = vpop.permute.xlu0 %2861  ;;  %v2388_v36 = vunpack.i.l.bf16 %v3634_v63  ;;  %v1004_v45 = vsel %vm1000_vm2, %v4784_v31, %v2369_v35  ;;  %v2384_v30 = vunpack.i.h.bf16 %v4785_v18  ;;  %v2383_v21 = vunpack.i.l.bf16 %v4785_v18  ;;  %v4799_v18 = vld [vmem:[#allocation39_spill] sm:$0xff] }
 0x161   : > { %v1749_v25 = vsel %vm1072_vm10, %v1733_v10, %v2868_v22  ;;  %v2863_v23 = vunpack.i.l.bf16 %v2862_v33  ;;  %v1750_v1 = vsel %vm1072_vm10, %v1734_v5, %v2869_v19  ;;  %v2864_v62 = vunpack.i.h.bf16 %v2862_v33  ;;  %v4783_v33 = vld [vmem:[#allocation6_spill] sm:$0xff] }
 0x162   : > { %v2877_v39 = vpop.permute.xlu1 %2876  ;;  %v1002_v22 = vsel %vm1000_vm2, %v4782_v55, %v2364_v26  ;;  %v2389_v10 = vunpack.i.h.bf16 %v3634_v63  ;;  %v4797_v55 = vld [vmem:[#allocation35_spill] sm:$0xff] }
 0x163   : > { %v2879_v40 = vunpack.i.h.bf16 %v2877_v39  ;;  %v2878_v53 = vunpack.i.l.bf16 %v2877_v39  ;;  %v1747_v20 = vsel %vm1072_vm10, %v1731_v34, %v2863_v23  ;;  %v1748_v60 = vsel %vm1072_vm10, %v1732_v50, %v2864_v62  ;;  %v4787_v39 = vld [vmem:[#allocation5_spill] sm:$0xff] }
 0x164   : > { %v2872_v59 = vpop.permute.xlu0 %2871  ;;  %v2368_v34 = vunpack.i.l.bf16 %v3622_v44  ;;  %v1001_v50 = vsel %vm1000_vm2, %v4783_v33, %v2363_v42  ;;  %v4786_v44 = vld [vmem:[#allocation15_spill] sm:$0xff]  ;;  %v4796_v42 = vld [vmem:[#allocation32_spill] sm:$0xff]  ;;  %v2508_v33 = vunpack.i.l.bf16 %v4797_v55 }
 0x165   : > { %v1761_v47 = vsel %vm1081_vm11, %v1745_v14, %v2878_v53  ;;  %v1762_v28 = vsel %vm1081_vm11, %v1746_v61, %v2879_v40  ;;  %v2874_v57 = vunpack.i.h.bf16 %v2872_v59  ;;  %v2873_v2 = vunpack.i.l.bf16 %v2872_v59  ;;  %v4788_v40 = vld [vmem:[#allocation16_spill] sm:$0xff] }
 0x166   : > { %v1798_v43 = vrot.slane %v1761_v47, 1  ;;  %v1799_v6 = vrot.slane %v1762_v28, 1  ;;  %v2887_v51 = vpop.permute.xlu1 %2886  ;;  %v2408_v19 = vunpack.i.l.bf16 %v4786_v44  ;;  %v1003_v14 = vsel %vm1000_vm2, %v4787_v39, %v2368_v34  ;;  %v4790_v47 = vld [vmem:[#allocation20_spill] sm:$0xff] }
 0x167   : > { %v1759_v49 = vsel %vm1081_vm11, %v1743_v13, %v2873_v2  ;;  %v1760_v38 = vsel %vm1081_vm11, %v1744_v52, %v2874_v57  ;;  %v2889_v27 = vunpack.i.h.bf16 %v2887_v51  ;;  %v2888_v3 = vunpack.i.l.bf16 %v2887_v51 }
 0x168   : > { %v1795_v7 = vrot.slane %v1759_v49, 1  ;;  %v1796_v46 = vrot.slane %v1760_v38, 1  ;;  %v2882_v56 = vpop.permute.xlu0 %2881  ;;  %v1800_v4 = vsel %vm501_vm0, %v1798_v43, %v1799_v6  ;;  %v2409_v61 = vunpack.i.h.bf16 %v4786_v44  ;;  %v4792_v38 = vld [vmem:[#allocation24_spill] sm:$0xff] }
 0x169   : > { %v1765_v41 = vsel %vm1081_vm11, %v1749_v25, %v2888_v3  ;;  %v1766_v11 = vsel %vm1081_vm11, %v1750_v1, %v2889_v27  ;;  %v2884_v9 = vunpack.i.h.bf16 %v2882_v56  ;;  %v2883_v12 = vunpack.i.l.bf16 %v2882_v56  ;;  %v4789_v25 = vld [vmem:[#allocation19_spill] sm:$0xff] }
 0x16a   : > { %v1804_v17 = vrot.slane %v1765_v41, 1  ;;  %v1805_v15 = vrot.slane %v1766_v11, 1  ;;  %v1797_v48 = vsel %vm501_vm0, %v1795_v7, %v1796_v46  ;;  %v2399_v53 = vunpack.i.h.bf16 %v4788_v40  ;;  %v4368_v13 = vpop.permute.xlu1 %2896  ;;  %v4791_v1 = vld [vmem:[#allocation23_spill] sm:$0xff] }
 0x16b   : > { %v1763_v37 = vsel %vm1081_vm11, %v1747_v20, %v2883_v12  ;;  %v1764_v32 = vsel %vm1081_vm11, %v1748_v60, %v2884_v9  ;;  %v3010_v8 = vpack.i.bf16 %v1800_v4, %v1797_v48  ;;  %v2398_v63 = vunpack.i.l.bf16 %v4788_v40  ;;  %v4793_v9 = vld [vmem:[#allocation27_spill] sm:$0xff] }
 0x16c   : > { %v1801_v0 = vrot.slane %v1763_v37, 1  ;;  %v1802_v16 = vrot.slane %v1764_v32, 1  ;;  %v1806_v58 = vsel %vm501_vm0, %v1804_v17, %v1805_v15  ;;  %v4344_v54 = vpop.permute.xlu0 %2891  ;;  %v1012_v52 = vsel %vm1009_vm3, %v1003_v14, %v2388_v36 }
 0x16d   : > { %3011 = vrot.lane.b32.xlu0 %v3010_v8, %s3082_s27  ;;  %v2429_v23 = vunpack.i.h.bf16 %v4789_v25  ;;  %v2428_v59 = vunpack.i.l.bf16 %v4789_v25  ;;  %v2423_v28 = vunpack.i.l.bf16 %v4790_v47  ;;  %v1013_v57 = vsel %vm1009_vm3, %v1004_v45, %v2389_v10  ;;  %v4801_v25 = vld [vmem:[#allocation44_spill] sm:$0xff] }
 0x16e   : > { %v1803_v29 = vsel %vm501_vm0, %v1801_v0, %v1802_v16  ;;  %v2424_v2 = vunpack.i.h.bf16 %v4790_v47  ;;  %v2449_v62 = vunpack.i.h.bf16 %v4791_v1  ;;  %v2448_v43 = vunpack.i.l.bf16 %v4791_v1  ;;  %v4396_v37 = vpop.permute.xlu1 %2906  ;;  %v4794_v0 = vld [vmem:[#allocation28_spill] sm:$0xff] }
 0x16f   : > { %v3015_v24 = vpack.i.bf16 %v1806_v58, %v1803_v29  ;;  %v1010_v6 = vsel %vm1009_vm3, %v1001_v50, %v2383_v21  ;;  %v1011_v51 = vsel %vm1009_vm3, %v1002_v22, %v2384_v30  ;;  %v1021_v49 = vsel %vm1018_vm4, %v1012_v52, %v2408_v19  ;;  %v4795_v58 = vld [vmem:[#allocation31_spill] sm:$0xff]  ;;  %v4798_v50 = vld [vmem:[#allocation36_spill] sm:$0xff] }
 0x170   : > { %v4356_v5 = vpop.permute.xlu0 %2901  ;;  %v2443_v27 = vunpack.i.l.bf16 %v4792_v38  ;;  %v1022_v3 = vsel %vm1018_vm4, %v1013_v57, %v2409_v61  ;;  %v1019_v20 = vsel %vm1018_vm4, %v1010_v6, %v2398_v63  ;;  %v1020_v7 = vsel %vm1018_vm4, %v1011_v51, %v2399_v53  ;;  %v4800_v21 = vld [vmem:[#allocation40_spill] sm:$0xff] }
 0x171   : > { %3016 = vrot.lane.b32.xlu1 %v3015_v24, %s3082_s27  ;;  %v2444_v46 = vunpack.i.h.bf16 %v4792_v38  ;;  %v1030_v4 = vsel %vm1027_vm5, %v1021_v49, %v2428_v59  ;;  %v1031_v41 = vsel %vm1027_vm5, %v1022_v3, %v2429_v23  ;;  %v1028_v11 = vsel %vm1027_vm5, %v1019_v20, %v2423_v28  ;;  %v4802_v49 = vld [vmem:[#allocation43_spill] sm:$0xff] }
 0x172   : > { %v2468_v12 = vunpack.i.l.bf16 %v4793_v9  ;;  %v1029_v60 = vsel %vm1027_vm5, %v1020_v7, %v2424_v2  ;;  %v1039_v17 = vsel %vm1036_vm6, %v1030_v4, %v2448_v43  ;;  %v1040_v15 = vsel %vm1036_vm6, %v1031_v41, %v2449_v62  ;;  %v4422_v59 = vpop.permute.xlu1 %2916 }
 0x173   : > { %v2469_v48 = vunpack.i.h.bf16 %v4793_v9  ;;  %v1037_v32 = vsel %vm1036_vm6, %v1028_v11, %v2443_v27  ;;  %v2464_v16 = vunpack.i.h.bf16 %v4794_v0  ;;  %v2463_v8 = vunpack.i.l.bf16 %v4794_v0 }
 0x174   : > { %v4386_v56 = vpop.permute.xlu0 %2911  ;;  %v2488_v29 = vunpack.i.l.bf16 %v4795_v58  ;;  %v1038_v24 = vsel %vm1036_vm6, %v1029_v60, %v2444_v46  ;;  %v2489_v26 = vunpack.i.h.bf16 %v4795_v58  ;;  %v2484_v35 = vunpack.i.h.bf16 %v4796_v42 }
 0x175   : > { %v2483_v34 = vunpack.i.l.bf16 %v4796_v42  ;;  %v1048_v36 = vsel %vm1045_vm7, %v1039_v17, %v2468_v12  ;;  %v2509_v22 = vunpack.i.h.bf16 %v4797_v55  ;;  %v2503_v10 = vunpack.i.l.bf16 %v4798_v50 }
 0x176   : > { %v1049_v31 = vsel %vm1045_vm7, %v1040_v15, %v2469_v48  ;;  %v2504_v45 = vunpack.i.h.bf16 %v4798_v50  ;;  %v2528_v30 = vunpack.i.l.bf16 %v4799_v18  ;;  %v2523_v44 = vunpack.i.l.bf16 %v4800_v21  ;;  %v2927_v12 = vpop.permute.xlu1 %2926 }
 0x177   : > { %v1046_v39 = vsel %vm1045_vm7, %v1037_v32, %v2463_v8  ;;  %v1047_v14 = vsel %vm1045_vm7, %v1038_v24, %v2464_v16  ;;  %v1057_v61 = vsel %vm1054_vm8, %v1048_v36, %v2488_v29  ;;  %v2524_v40 = vunpack.i.h.bf16 %v4800_v21 }
 0x178   : > { %v2922_v19 = vpop.permute.xlu0 %2921  ;;  %v1058_v53 = vsel %vm1054_vm8, %v1049_v31, %v2489_v26  ;;  %v1055_v63 = vsel %vm1054_vm8, %v1046_v39, %v2483_v34  ;;  %v1056_v52 = vsel %vm1054_vm8, %v1047_v14, %v2484_v35  ;;  %v2543_v23 = vunpack.i.l.bf16 %v4801_v25 }
 0x179   : > { %v1066_v47 = vsel %vm4730_vm9, %v1057_v61, %v2508_v33  ;;  %v1067_v28 = vsel %vm4730_vm9, %v1058_v53, %v2509_v22  ;;  %v1064_v57 = vsel %vm4730_vm9, %v1055_v63, %v2503_v10  ;;  %v2544_v2 = vunpack.i.h.bf16 %v4801_v25 }
 0x17a   : > { %v1065_v1 = vsel %vm4730_vm9, %v1056_v52, %v2504_v45  ;;  %v2529_v62 = vunpack.i.h.bf16 %v4799_v18  ;;  %v1075_v43 = vsel %vm1072_vm10, %v1066_v47, %v2528_v30  ;;  %v1073_v6 = vsel %vm1072_vm10, %v1064_v57, %v2523_v44  ;;  %v2937_v50 = vpop.permute.xlu1 %2936 }
 0x17b   : > { %v1074_v51 = vsel %vm1072_vm10, %v1065_v1, %v2524_v40  ;;  %v2549_v38 = vunpack.i.h.bf16 %v4802_v49  ;;  %v2894_v27 = vunpack.i.h.bf16 %v4344_v54  ;;  %v2893_v3 = vunpack.i.l.bf16 %v4344_v54 }
 0x17c   : > { %v1082_v20 = vsel %vm1081_vm11, %v1073_v6, %v2543_v23  ;;  %v2904_v7 = vunpack.i.h.bf16 %v4356_v5  ;;  %v2903_v46 = vunpack.i.l.bf16 %v4356_v5  ;;  %v2932_v4 = vpop.permute.xlu0 %2931  ;;  %v1083_v41 = vsel %vm1081_vm11, %v1074_v51, %v2544_v2 }
 0x17d   : > { %v2914_v11 = vunpack.i.h.bf16 %v4386_v56  ;;  %v2913_v9 = vunpack.i.l.bf16 %v4386_v56  ;;  %v2924_v60 = vunpack.i.h.bf16 %v2922_v19  ;;  %v2923_v54 = vunpack.i.l.bf16 %v2922_v19 }
 0x17e   : > { %v1091_v17 = vsel %vm1090_vm12, %v1082_v20, %v2893_v3  ;;  %v1092_v15 = vsel %vm1090_vm12, %v1083_v41, %v2894_v27  ;;  %v2934_v48 = vunpack.i.h.bf16 %v2932_v4  ;;  %v2933_v32 = vunpack.i.l.bf16 %v2932_v4  ;;  %v4803_v27 = vld [vmem:[#allocation10_spill] sm:$0xff]  ;;  %v4805_v41 = vld [vmem:[#allocation13_spill] sm:$0xff] }
 0x17f   : > { %v2548_v5 = vunpack.i.l.bf16 %v4802_v49  ;;  %v1100_v0 = vsel %vm1099_vm13, %v1091_v17, %v2903_v46  ;;  %v1101_v16 = vsel %vm1099_vm13, %v1092_v15, %v2904_v7  ;;  %vm1126_vm0 = vcmask 490496   ;;  %v4804_v7 = vld [vmem:[#allocation11_spill] sm:$0xff]  ;;  %v4807_v17 = vld [vmem:[#allocation2_spill] sm:$0xff] }
 0x180   : > { %v1109_v56 = vsel %vm1108_vm14, %v1100_v0, %v2913_v9  ;;  %v1110_v8 = vsel %vm1108_vm14, %v1101_v16, %v2914_v11  ;;  %vm1899_vm9 = vcmask 883712   ;;  %v2899_v35 = vunpack.i.h.bf16 %v4368_v13  ;;  %v4809_v0 = vld [vmem:[#allocation17_spill] sm:$0xff] }
 0x181   : > { %v1118_v29 = vsel %vm1117_vm15, %v1109_v56, %v2923_v54  ;;  %v1119_v24 = vsel %vm1117_vm15, %v1110_v8, %v2924_v60  ;;  %v2898_v34 = vunpack.i.l.bf16 %v4368_v13  ;;  %v2909_v22 = vunpack.i.h.bf16 %v4396_v37  ;;  %v4806_v60 = vld [vmem:[#allocation3_spill] sm:$0xff]  ;;  %v4810_v8 = vld [vmem:[#allocation18_spill] sm:$0xff] }
 0x182   : > { %v1127_v36 = vsel %vm1126_vm0, %v1118_v29, %v2933_v32  ;;  %v1128_v55 = vsel %vm1126_vm0, %v1119_v24, %v2934_v48  ;;  %v2908_v33 = vunpack.i.l.bf16 %v4396_v37  ;;  %v1076_v45 = vsel %vm1072_vm10, %v1067_v28, %v2529_v62  ;;  %v4808_v48 = vld [vmem:[#allocation14_spill] sm:$0xff] }
 0x183   : > { %v2919_v18 = vunpack.i.h.bf16 %v4422_v59  ;;  %v2918_v30 = vunpack.i.l.bf16 %v4422_v59  ;;  %v1084_v21 = vsel %vm1081_vm11, %v1075_v43, %v2548_v5  ;;  %v1085_v44 = vsel %vm1081_vm11, %v1076_v45, %v2549_v38 }
 0x184   : > { %v2929_v19 = vunpack.i.h.bf16 %v2927_v12  ;;  %v2928_v39 = vunpack.i.l.bf16 %v2927_v12  ;;  %v1093_v37 = vsel %vm1090_vm12, %v1084_v21, %v2898_v34  ;;  %v1094_v14 = vsel %vm1090_vm12, %v1085_v44, %v2899_v35  ;;  %v4812_v35 = vld [vmem:[#allocation7_spill] sm:$0xff] }
 0x185   : > { %v2939_v61 = vunpack.i.h.bf16 %v2937_v50  ;;  %v2938_v40 = vunpack.i.l.bf16 %v2937_v50  ;;  %v1102_v53 = vsel %vm1099_vm13, %v1093_v37, %v2908_v33  ;;  %v1103_v63 = vsel %vm1099_vm13, %v1094_v14, %v2909_v22 }
 0x186   : > { %v1111_v52 = vsel %vm1108_vm14, %v1102_v53, %v2918_v30  ;;  %v1112_v25 = vsel %vm1108_vm14, %v1103_v63, %v2919_v18  ;;  %v2374_v3 = vunpack.i.h.bf16 %v4803_v27  ;;  %v2373_v20 = vunpack.i.l.bf16 %v4803_v27  ;;  %v4816_v63 = vld [vmem:[#allocation26_spill] sm:$0xff] }
 0x187   : > { %v1120_v59 = vsel %vm1117_vm15, %v1111_v52, %v2928_v39  ;;  %v1121_v47 = vsel %vm1117_vm15, %v1112_v25, %v2929_v19  ;;  %v2379_v46 = vunpack.i.h.bf16 %v4804_v7  ;;  %v2378_v4 = vunpack.i.l.bf16 %v4804_v7 }
 0x188   : > { %v1129_v2 = vsel %vm1126_vm0, %v1120_v59, %v2938_v40  ;;  %v1130_v1 = vsel %vm1126_vm0, %v1121_v47, %v2939_v61  ;;  %v2404_v11 = vunpack.i.h.bf16 %v4805_v41  ;;  %v2403_v9 = vunpack.i.l.bf16 %v4805_v41  ;;  %v4817_v47 = vld [vmem:[#allocation29_spill] sm:$0xff] }
 0x189   : > { %v1006_v54 = vsel %vm1000_vm2, %v4806_v60, %v2374_v3  ;;  %v1005_v15 = vsel %vm1000_vm2, %v4807_v17, %v2373_v20  ;;  %v2394_v32 = vunpack.i.h.bf16 %v4808_v48  ;;  %v2393_v5 = vunpack.i.l.bf16 %v4808_v48  ;;  %v4819_v3 = vld [vmem:[#allocation33_spill] sm:$0xff] }
 0x18a   : > { %v2419_v16 = vunpack.i.h.bf16 %v4809_v0  ;;  %v2418_v56 = vunpack.i.l.bf16 %v4809_v0  ;;  %v2413_v29 = vunpack.i.l.bf16 %v4810_v8  ;;  %v1007_v34 = vsel %vm1000_vm2, %v4812_v35, %v2378_v4  ;;  %v4821_v60 = vld [vmem:[#allocation37_spill] sm:$0xff] }
 0x18b   : > { %v1016_v50 = vsel %vm1009_vm3, %v1007_v34, %v2403_v9  ;;  %v1015_v18 = vsel %vm1009_vm3, %v1006_v54, %v2394_v32  ;;  %v1014_v30 = vsel %vm1009_vm3, %v1005_v15, %v2393_v5  ;;  %v2454_v52 = vunpack.i.h.bf16 %v4816_v63  ;;  %v4822_v32 = vld [vmem:[#allocation38_spill] sm:$0xff] }
 0x18c   : > { %v1025_v19 = vsel %vm1018_vm4, %v1016_v50, %v2418_v56  ;;  %v1023_v37 = vsel %vm1018_vm4, %v1014_v30, %v2413_v29  ;;  %v2453_v25 = vunpack.i.l.bf16 %v4816_v63  ;;  %v2499_v20 = vunpack.i.h.bf16 %v4819_v3  ;;  %v4826_v50 = vld [vmem:[#allocation42_spill] sm:$0xff] }
 0x18d   : > { %v2498_v7 = vunpack.i.l.bf16 %v4819_v3  ;;  %v2519_v54 = vunpack.i.h.bf16 %v4821_v60  ;;  %v2518_v17 = vunpack.i.l.bf16 %v4821_v60  ;;  %v2514_v5 = vunpack.i.h.bf16 %v4822_v32 }
 0x18e   : > { %v2513_v0 = vunpack.i.l.bf16 %v4822_v32 }
 0x1a7   : > { %v2942_v58 = vpop.permute.xlu0 %2941 }
 0x1a8   : > { %v2944_v26 = vunpack.i.h.bf16 %v2942_v58  ;;  %v2943_v42 = vunpack.i.l.bf16 %v2942_v58  ;;  %v2414_v58 = vunpack.i.h.bf16 %v4810_v8 }
 0x1aa   : > { %v1832_v10 = vsel %vm1831_vm1, %v1127_v36, %v2943_v42  ;;  %v1833_v31 = vsel %vm1831_vm1, %v1128_v55, %v2944_v26  ;;  %v4811_v26 = vld [vmem:[#allocation8_spill] sm:$0xff]  ;;  %v4813_v36 = vld [vmem:[#allocation21_spill] sm:$0xff]  ;;  %v1024_v14 = vsel %vm1018_vm4, %v1015_v18, %v2414_v58 }
 0x1ab   : > { %v1840_v13 = vpack.c.bf16 %v1833_v31, %v1832_v10  ;;  %v4478_v51 = vpop.permute.xlu0 %2951  ;;  %v1008_v42 = vsel %vm1000_vm2, %v4811_v26, %v2379_v46  ;;  %v2439_v55 = vunpack.i.h.bf16 %v4813_v36  ;;  %v2438_v22 = vunpack.i.l.bf16 %v4813_v36  ;;  %v4814_v10 = vld [vmem:[#allocation22_spill] sm:$0xff]  ;;  %v4823_v58 = vld [vmem:[#allocation41_spill] sm:$0xff] }
 0x1ac   : > { %v1017_v33 = vsel %vm1009_vm3, %v1008_v42, %v2404_v11  ;;  %v2434_v31 = vunpack.i.h.bf16 %v4814_v10  ;;  %v2433_v45 = vunpack.i.l.bf16 %v4814_v10  ;;  %v4820_v46 = vld [vmem:[#allocation34_spill] sm:$0xff]  ;;  %v2539_v29 = vunpack.i.h.bf16 %v4823_v58 }
 0x1ad   : > { %2276 = vmatprep.mubr.msk.bf16.mxu0 %vm1899_vm9, %v1840_v13  ;;  %v4815_v13 = vld [vmem:[#allocation25_spill] sm:$0xff]  ;;  %v1026_v39 = vsel %vm1018_vm4, %v1017_v33, %v2419_v16  ;;  %v1034_v40 = vsel %vm1027_vm5, %v1025_v19, %v2438_v22  ;;  %v2494_v4 = vunpack.i.h.bf16 %v4820_v46  ;;  %v2493_v41 = vunpack.i.l.bf16 %v4820_v46 }
 0x1ae   : > { %v2459_v21 = vunpack.i.h.bf16 %v4815_v13  ;;  %v2458_v44 = vunpack.i.l.bf16 %v4815_v13  ;;  %v1035_v53 = vsel %vm1027_vm5, %v1026_v39, %v2439_v55  ;;  %v1033_v59 = vsel %vm1027_vm5, %v1024_v14, %v2434_v31 }
 0x1af   : > { %v2947_v23 = vpop.permute.xlu1 %2946  ;;  %v4482_v38 = vpop.permute.xlu0 %2961  ;;  %v1042_v9 = vsel %vm1036_vm6, %v1033_v59, %v2454_v52  ;;  %v2538_v26 = vunpack.i.l.bf16 %v4823_v58  ;;  %vm4824_vm3 = vcmask 261120   ;;  %v2534_v10 = vunpack.i.h.bf16 %v4826_v50 }
 0x1b0   : > { %v2949_v28 = vunpack.i.h.bf16 %v2947_v23  ;;  %v2948_v57 = vunpack.i.l.bf16 %v2947_v23  ;;  %v1032_v23 = vsel %vm1027_vm5, %v1023_v37, %v2433_v45  ;;  %vm4825_vm4 = vmmov %vm4824_vm3  ;;  %v2533_v31 = vunpack.i.l.bf16 %v4826_v50 }
 0x1b1   : > { %v1041_v11 = vsel %vm1036_vm6, %v1032_v23, %v2453_v25  ;;  %vm4827_vm5 = vmmov %vm4824_vm3  ;;  %v2954_v30 = vunpack.i.h.bf16 %v4478_v51  ;;  %v2953_v13 = vunpack.i.l.bf16 %v4478_v51  ;;  %v2964_v19 = vunpack.i.h.bf16 %v4482_v38 }
 0x1b2   : > { %v1834_v62 = vsel %vm1831_vm1, %v1129_v2, %v2948_v57  ;;  %v1835_v43 = vsel %vm1831_vm1, %v1130_v1, %v2949_v28  ;;  %v2479_v28 = vunpack.i.h.bf16 %v4817_v47  ;;  %v2478_v57 = vunpack.i.l.bf16 %v4817_v47 }
 0x1b3   : > { %v1841_v6 = vpack.c.bf16 %v1835_v43, %v1834_v62  ;;  %v4480_v49 = vpop.permute.xlu1 %2956  ;;  %v4502_v24 = vpop.permute.xlu0 %2971  ;;  %v1043_v1 = vsel %vm1036_vm6, %v1034_v40, %v2458_v44  ;;  %v1044_v62 = vsel %vm1036_vm6, %v1035_v53, %v2459_v21  ;;  %v4818_v43 = vld [vmem:[#allocation30_spill] sm:$0xff]  ;;  %vm4828_vm6 = vmmov %vm4824_vm3  ;;  %v2963_v39 = vunpack.i.l.bf16 %v4482_v38 }
 0x1b4   : > { %v2473_v27 = vunpack.i.l.bf16 %v4818_v43  ;;  %v1052_v15 = vsel %vm1045_vm7, %v1043_v1, %v2478_v57  ;;  %v1053_v48 = vsel %vm1045_vm7, %v1044_v62, %v2479_v28  ;;  %v2959_v37 = vunpack.i.h.bf16 %v4480_v49 }
 0x1b5   : > { %2277 = vmatmul.mubr.msk.bf16.vlgmr.msra.gmra.mrb[0].mxu0 %vm1899_vm9, %v1841_v6  ;;  %v2474_v6 = vunpack.i.h.bf16 %v4818_v43  ;;  %v1061_v42 = vsel %vm1054_vm8, %v1052_v15, %v2498_v7  ;;  %v1062_v35 = vsel %vm1054_vm8, %v1053_v48, %v2499_v20  ;;  %v2958_v14 = vunpack.i.l.bf16 %v4480_v49 }
 0x1b6   : > { %v1050_v56 = vsel %vm1045_vm7, %v1041_v11, %v2473_v27  ;;  %v1070_v22 = vsel %vm4824_vm3, %v1061_v42, %v2518_v17  ;;  %v1071_v33 = vsel %vm4825_vm4, %v1062_v35, %v2519_v54  ;;  %v2974_v40 = vunpack.i.h.bf16 %v4502_v24 }
 0x1b7   : > { %v4490_v12 = vpop.permute.xlu1 %2966  ;;  %v4532_v2 = vpop.permute.xlu0 %2981  ;;  %v1051_v8 = vsel %vm1045_vm7, %v1042_v9, %v2474_v6  ;;  %v1059_v34 = vsel %vm1054_vm8, %v1050_v56, %v2493_v41  ;;  %v1079_v21 = vsel %vm1072_vm10, %v1070_v22, %v2538_v26  ;;  %v1080_v44 = vsel %vm1072_vm10, %v1071_v33, %v2539_v29 }
 0x1b8   : > { %v1060_v36 = vsel %vm1054_vm8, %v1051_v8, %v2494_v4  ;;  %v1068_v45 = vsel %vm4827_vm5, %v1059_v34, %v2513_v0  ;;  %v2973_v53 = vunpack.i.l.bf16 %v4502_v24  ;;  %v2969_v25 = vunpack.i.h.bf16 %v4490_v12 }
 0x1b9   : > { %v1069_v18 = vsel %vm4828_vm6, %v1060_v36, %v2514_v5  ;;  %v1077_v52 = vsel %vm1072_vm10, %v1068_v45, %v2533_v31  ;;  %v2968_v23 = vunpack.i.l.bf16 %v4490_v12  ;;  %v2984_v47 = vunpack.i.h.bf16 %v4532_v2 }
 0x1ba   : > { %v1078_v51 = vsel %vm1072_vm10, %v1069_v18, %v2534_v10  ;;  %v1086_v59 = vsel %vm1081_vm11, %v1077_v52, %v2953_v13  ;;  %v2983_v49 = vunpack.i.l.bf16 %v4532_v2  ;;  %v1089_v43 = vsel %vm1081_vm11, %v1080_v44, %v2959_v37 }
 0x1bb   : > { %v4522_v61 = vpop.permute.xlu1 %2976  ;;  %v2992_v55 = vpop.permute.xlu0 %2991  ;;  %v1087_v38 = vsel %vm1081_vm11, %v1078_v51, %v2954_v30  ;;  %v1095_v24 = vsel %vm1090_vm12, %v1086_v59, %v2963_v39  ;;  %v1088_v6 = vsel %vm1081_vm11, %v1079_v21, %v2958_v14  ;;  %v1098_v20 = vsel %vm1090_vm12, %v1089_v43, %v2969_v25 }
 0x1bc   : > { %v1096_v57 = vsel %vm1090_vm12, %v1087_v38, %v2964_v19  ;;  %v2994_v1 = vunpack.i.h.bf16 %v2992_v55  ;;  %v2993_v62 = vunpack.i.l.bf16 %v2992_v55  ;;  %v1104_v12 = vsel %vm1099_vm13, %v1095_v24, %v2973_v53 }
 0x1bd   : > { %v1105_v27 = vsel %vm1099_vm13, %v1096_v57, %v2974_v40  ;;  %v1097_v3 = vsel %vm1090_vm12, %v1088_v6, %v2968_v23  ;;  %v1113_v46 = vsel %vm1108_vm14, %v1104_v12, %v2983_v49  ;;  %v2979_v41 = vunpack.i.h.bf16 %v4522_v61 }
 0x1be   : > { %v1114_v4 = vsel %vm1108_vm14, %v1105_v27, %v2984_v47  ;;  %v2978_v11 = vunpack.i.l.bf16 %v4522_v61  ;;  %v1122_v60 = vsel %vm1117_vm15, %v1113_v46, %v2993_v62  ;;  %vm2009_vm7 = vcmask 24576  }
 0x1bf   : > { %v4550_v16 = vpop.permute.xlu1 %2986  ;;  %v3002_v28 = vpop.permute.xlu0 %3001  ;;  %v1123_v54 = vsel %vm1117_vm15, %v1114_v4, %v2994_v1  ;;  %v1107_v42 = vsel %vm1099_vm13, %v1098_v20, %v2979_v41 }
 0x1c0   : > { %v3004_v2 = vunpack.i.h.bf16 %v3002_v28  ;;  %v3003_v7 = vunpack.i.l.bf16 %v3002_v28  ;;  %v2989_v17 = vunpack.i.h.bf16 %v4550_v16  ;;  %v2988_v15 = vunpack.i.l.bf16 %v4550_v16 }
 0x1c1   : > { %v1106_v26 = vsel %vm1099_vm13, %v1097_v3, %v2978_v11 }
 0x1c2   : > { %v1131_v29 = vsel %vm1126_vm0, %v1122_v60, %v3003_v7  ;;  %v1132_v61 = vsel %vm1126_vm0, %v1123_v54, %v3004_v2  ;;  %v1115_v16 = vsel %vm1108_vm14, %v1106_v26, %v2988_v15  ;;  %v1116_v36 = vsel %vm1108_vm14, %v1107_v42, %v2989_v17 }
 0x1c3   : > { %v2997_v63 = vpop.permute.xlu1 %2996 }
 0x1c4   : > { %v2999_v32 = vunpack.i.h.bf16 %v2997_v63  ;;  %v2998_v5 = vunpack.i.l.bf16 %v2997_v63 }
 0x1c6   : > { %v1124_v33 = vsel %vm1117_vm15, %v1115_v16, %v2998_v5  ;;  %v1125_v50 = vsel %vm1117_vm15, %v1116_v36, %v2999_v32 }
 0x1c7   : > { %v3007_v9 = vpop.permute.xlu1 %3006 }
 0x1c8   : > { %v3009_v8 = vunpack.i.h.bf16 %v3007_v9  ;;  %v3008_v58 = vunpack.i.l.bf16 %v3007_v9 }
 0x1ca   : > { %v1133_v45 = vsel %vm1126_vm0, %v1124_v33, %v3008_v58  ;;  %v1134_v18 = vsel %vm1126_vm0, %v1125_v50, %v3009_v8 }
 0x1df   : > { %v3012_v48 = vpop.permute.xlu0 %3011 }
 0x1e0   : > { %v3014_v0 = vunpack.i.h.bf16 %v3012_v48  ;;  %v3013_v56 = vunpack.i.l.bf16 %v3012_v48 }
 0x1e2   : > { %v1836_v35 = vsel %vm1831_vm1, %v1131_v29, %v3013_v56  ;;  %v1837_v34 = vsel %vm1831_vm1, %v1132_v61, %v3014_v0 }
 0x1e3   : > { %v3017_v55 = vpop.permute.xlu1 %3016  ;;  %v1842_v22 = vpack.c.bf16 %v1837_v34, %v1836_v35 }
 0x1e4   : > { %v3019_v10 = vunpack.i.h.bf16 %v3017_v55  ;;  %v3018_v31 = vunpack.i.l.bf16 %v3017_v55 }
 0x1e5   : > { %2280 = vmatprep.mubr.msk.bf16.mxu1 %vm1899_vm9, %v1842_v22 }
 0x1e6   : > { %v1838_v30 = vsel %vm1831_vm1, %v1133_v45, %v3018_v31  ;;  %v1839_v13 = vsel %vm1831_vm1, %v1134_v18, %v3019_v10 }
 0x1e7   : > { %v1843_v21 = vpack.c.bf16 %v1839_v13, %v1838_v30 }
 0x1e9   : > { %2281 = vmatmul.mubr.msk.bf16.vlgmr.msra.gmra.mrb[0].mxu1 %vm1899_vm9, %v1843_v21 }
 0x288   : > { %v2278_v44 = vpop.f32.mrb[0].mxu0 }
 0x289   : > { %1982 = vst.msk [vmem:[%s4625_s6 + $0x10] sm:$0xff] %vm1000_vm2, %v2278_v44  ;;  %v1949_v19 = vpop.f32.mrb[1].mxu0  ;;  %v2013_v40 = vmul.f32 %v2278_v44, %v2278_v44  ;;  %v1991_v25 = vsel %vm1000_vm2, %v2278_v44, 0.0 }
 0x28a   : > { %1980 = vst.msk [vmem:[%s4625_s6] sm:$0xff] %vm1000_vm2, %v1949_v19  ;;  %v2011_v39 = vmul.f32 %v1949_v19, %v1949_v19  ;;  %v2279_v37 = vpop.f32.mrb[2].mxu0  ;;  %v1988_v53 = vsel %vm1000_vm2, %v1949_v19, 0.0 }
 0x28b   : > { %1983 = vst.msk [vmem:[%s4625_s6 + $0x18] sm:$0xff] %vm1000_vm2, %v2279_v37  ;;  %v1952_v14 = vpop.f32.mrb[3].mxu0  ;;  %v2014_v59 = vmul.f32 %v2279_v37, %v2279_v37  ;;  %v2022_v28 = vsel %vm1000_vm2, %v2013_v40, 0.0  ;;  %v1993_v24 = vsel %vm1000_vm2, %v2279_v37, 0.0 }
 0x28c   : > { %1981 = vst.msk [vmem:[%s4625_s6 + $0x8] sm:$0xff] %vm1000_vm2, %v1952_v14  ;;  %v1989_v63 = vsel %vm1000_vm2, %v1952_v14, 0.0  ;;  %v2012_v52 = vmul.f32 %v1952_v14, %v1952_v14  ;;  %v2019_v23 = vsel %vm1000_vm2, %v2011_v39, 0.0 }
 0x28d   : > { %v1990_v51 = vadd.f32 %v1989_v63, %v1988_v53  ;;  %v2024_v62 = vsel %vm1000_vm2, %v2014_v59, 0.0 }
 0x28e   : > { %v2020_v38 = vsel %vm1000_vm2, %v2012_v52, 0.0 }
 0x28f   : > { %v1992_v47 = vadd.f32 %v1991_v25, %v1990_v51  ;;  %v2021_v49 = vadd.f32 %v2020_v38, %v2019_v23 }
 0x291   : > { %v2023_v57 = vadd.f32 %v2022_v28, %v2021_v49  ;;  %v1994_v1 = vadd.f32 %v1993_v24, %v1992_v47 }
 0x293   : > { %v2025_v43 = vadd.f32 %v2024_v62, %v2023_v57 }
 0x2bc   : > { %v2282_v6 = vpop.f32.mrb[0].mxu1 }
 0x2bd   : > { %1986 = vst.msk [vmem:[%s4625_s6 + $0x30] sm:$0xff] %vm1000_vm2, %v2282_v6  ;;  %v1965_v12 = vpop.f32.mrb[1].mxu1  ;;  %v2017_v46 = vmul.f32 %v2282_v6, %v2282_v6  ;;  %v1999_v54 = vsel %vm1000_vm2, %v2282_v6, 0.0 }
 0x2be   : > { %1984 = vst.msk [vmem:[%s4625_s6 + $0x20] sm:$0xff] %vm1000_vm2, %v1965_v12  ;;  %v1995_v27 = vsel %vm1000_vm2, %v1965_v12, 0.0  ;;  %v2015_v3 = vmul.f32 %v1965_v12, %v1965_v12  ;;  %v2283_v20 = vpop.f32.mrb[2].mxu1 }
 0x2bf   : > { %v1996_v2 = vadd.f32 %v1995_v27, %v1994_v1  ;;  %1987 = vst.msk [vmem:[%s4625_s6 + $0x38] sm:$0xff] %vm1000_vm2, %v2283_v20  ;;  %v1968_v7 = vpop.f32.mrb[3].mxu1  ;;  %v2018_v17 = vmul.f32 %v2283_v20, %v2283_v20  ;;  %v2030_v5 = vsel %vm1000_vm2, %v2017_v46, 0.0  ;;  %v2001_v0 = vsel %vm1000_vm2, %v2283_v20, 0.0 }
 0x2c0   : > { %v2026_v4 = vsel %vm1000_vm2, %v2015_v3, 0.0  ;;  %1985 = vst.msk [vmem:[%s4625_s6 + $0x28] sm:$0xff] %vm1000_vm2, %v1968_v7  ;;  %v1997_v41 = vsel %vm1000_vm2, %v1968_v7, 0.0  ;;  %v2016_v11 = vmul.f32 %v1968_v7, %v1968_v7 }
 0x2c1   : > { %v2027_v9 = vadd.f32 %v2026_v4, %v2025_v43  ;;  %v1998_v60 = vadd.f32 %v1997_v41, %v1996_v2  ;;  %v2032_v58 = vsel %vm1000_vm2, %v2018_v17, 0.0 }
 0x2c2   : > { %v2028_v15 = vsel %vm1000_vm2, %v2016_v11, 0.0 }
 0x2c3   : > { %v2000_v48 = vadd.f32 %v1999_v54, %v1998_v60  ;;  %v2029_v32 = vadd.f32 %v2028_v15, %v2027_v9 }
 0x2c5   : > { %v2002_v56 = vadd.f32 %v2001_v0, %v2000_v48  ;;  %v2031_v8 = vadd.f32 %v2030_v5, %v2029_v32 }
 0x2c7   : > { %v2003_v29 = vrot.slane %v2002_v56, 4  ;;  %v2033_v61 = vadd.f32 %v2032_v58, %v2031_v8 }
 0x2c9   : > { %v2004_v26 = vadd.f32 %v2003_v29, %v2002_v56  ;;  %v2034_v42 = vrot.slane %v2033_v61, 4 }
 0x2cb   : > { %v2005_v35 = vrot.slane %v2004_v26, 2  ;;  %v2035_v34 = vadd.f32 %v2034_v42, %v2033_v61 }
 0x2cd   : > { %v2006_v16 = vadd.f32 %v2005_v35, %v2004_v26  ;;  %v2036_v36 = vrot.slane %v2035_v34, 2 }
 0x2cf   : > { %v2007_v55 = vrot.slane %v2006_v16, 1  ;;  %v2037_v22 = vadd.f32 %v2036_v36, %v2035_v34 }
 0x2d1   : > { %v2008_v33 = vadd.f32 %v2007_v55, %v2006_v16  ;;  %v2038_v50 = vrot.slane %v2037_v22, 1 }
 0x2d3   : > { %2010 = vst.msk [vmem:[%s363_s12] sm:$0x1] %vm2009_vm7, %v2008_v33  ;;  %v2039_v10 = vadd.f32 %v2038_v50, %v2037_v22 }
 0x2d5   : > { %2040 = vst.msk [vmem:[%s363_s12 + $0x1] sm:$0x1] %vm2009_vm7, %v2039_v10 }
 0x2d6 PF: > { %s16_s22 = sadd.s32 1, %s3065_s22   ;;  %s4829_s18 = smov %s3057_s20 }
 0x2d7   : > { %p13_p10 = scmp.ge.s32.totalorder %s16_s22, 18   ;;  %s4830_s19 = smov %s3061_s21 }
 0x2d8   : > { %s4831_s20 = smov %s4834_s23  ;;  %s4832_s21 = smov %s4838_s24 }
 0x2d9   :  { %15 = sbr.rel (!%p13_p10) target bundleno = 3 (0x3), region = 84 }

</bundles_post_ra>
